<compile_context>
chip_gen: v7x
topology: tpu7x:2x2x1
jax: 0.10.0
libtpu: 0.0.40
codegen_flags: <defaults>
</compile_context>

<pallas_src>
import functools
import math

import jax
import jax.numpy as jnp
from jax import lax
from jax.experimental import pallas as pl
from jax.experimental.pallas import tpu as pltpu


# ---------------------------------------------------------------------------
# In-kernel helpers (operate on plain jnp arrays loaded from refs)
# ---------------------------------------------------------------------------
def _layer_norm(x, gamma, beta, eps=1e-5):
    """LayerNorm in f32; rsqrt goes to the EUP instead of a VALU divide."""
    mu = jnp.mean(x, axis=-1, keepdims=True)
    xc = x - mu
    var = jnp.mean(xc * xc, axis=-1, keepdims=True)
    return gamma * (xc * lax.rsqrt(var + eps)) + beta


def _project_heads(x16, w, b, heads, d_head):
    """(S, D) bf16 @ (D, H*dh) bf16 -> head-major (H, S, dh) bf16 (f32 accum)."""
    y = jnp.dot(x16, w, preferred_element_type=jnp.float32) + b
    s = y.shape[0]
    return jnp.transpose(y.reshape(s, heads, d_head), (1, 0, 2)).astype(jnp.bfloat16)


def _attend(qh, k_ref, v_ref, bias, *, scale, kv_chunk):
    """Head-batched attention; K/V are read from (H, Sk, d) bf16 VMEM scratch.

    qh: (H, TQ, d_k) bf16.  bias: optional f32 (TQ, Sk) additive mask.
    Returns concat-heads context (TQ, H*d_v) f32.
    Uses a single-pass softmax when Sk fits in one chunk, otherwise a
    chunked online softmax so the f32 score intermediate stays bounded.
    """
    heads, tq, _ = qh.shape
    sk = k_ref.shape[1]
    d_v = v_ref.shape[2]
    n_chunks = pl.cdiv(sk, kv_chunk)

    if n_chunks <= 1:
        s = jnp.einsum("hqd,hkd->hqk", qh, k_ref[...],
                       preferred_element_type=jnp.float32) * scale
        if bias is not None:
            s = s + bias[None]
        s = s - jnp.max(s, axis=-1, keepdims=True)
        p = jnp.exp(s)
        p = p * pl.reciprocal(jnp.sum(p, axis=-1, keepdims=True), approx=True)
        o = jnp.einsum("hqk,hkd->hqd", p.astype(jnp.bfloat16), v_ref[...],
                       preferred_element_type=jnp.float32)
    else:
        # TODO(synk): switch to lax.fori_loop once the tail chunk is padded,
        # so long-Sk live ranges are bounded instead of fully unrolled.
        m = jnp.full((heads, tq, 1), -jnp.inf, jnp.float32)
        l = jnp.zeros((heads, tq, 1), jnp.float32)
        acc = jnp.zeros((heads, tq, d_v), jnp.float32)
        for c in range(n_chunks):
            k0 = c * kv_chunk
            cs = min(kv_chunk, sk - k0)
            kc = k_ref[:, k0:k0 + cs, :]
            vc = v_ref[:, k0:k0 + cs, :]
            s = jnp.einsum("hqd,hkd->hqk", qh, kc,
                           preferred_element_type=jnp.float32) * scale
            if bias is not None:
                s = s + bias[None, :, k0:k0 + cs]
            m_new = jnp.maximum(m, jnp.max(s, axis=-1, keepdims=True))
            alpha = jnp.exp(m - m_new)
            p = jnp.exp(s - m_new)
            l = alpha * l + jnp.sum(p, axis=-1, keepdims=True)
            acc = alpha * acc + jnp.einsum("hqk,hkd->hqd",
                                           p.astype(jnp.bfloat16), vc,
                                           preferred_element_type=jnp.float32)
            m = m_new
        o = acc * pl.reciprocal(l, approx=True)

    # concat(heads): (H, TQ, dv) -> (TQ, H*dv)
    return jnp.transpose(o, (1, 0, 2)).reshape(tq, heads * d_v)


# ---------------------------------------------------------------------------
# Fused decoder-layer kernel: grid = (batch, decoder-query tiles)
# ---------------------------------------------------------------------------
def decoder_layer_kernel(
    x_enc_ref, x_dec_ref,
    # masked self-attention
    wq1, bq1, wk1, bk1, wv1, bv1, wo1, bo1, g1, be1,
    # cross attention
    wq2, bq2, wk2, bk2, wv2, bv2, wo2, bo2, g2, be2,
    # feed-forward
    wff1, bff1, wff2, bff2, g3, be3,
    out_ref,
    # persistent bf16 K/V scratch (head-major)
    k1_scr, v1_scr, k2_scr, v2_scr,
    *, heads, d_k, d_v, mask, kv_chunk):
    sd = x_dec_ref.shape[1]        # full decoder sequence length
    tq = out_ref.shape[1]          # query-tile length

    # --- K/V projections hoisted: compute once per batch element (qi == 0)
    #     into persistent VMEM scratch; reused by every query tile. ---
    @pl.when(pl.program_id(1) == 0)
    def _():
        x_kv16 = x_dec_ref[0].astype(jnp.bfloat16)                 # (Sd, D)
        k1_scr[...] = _project_heads(x_kv16, wk1[...], bk1[...], heads, d_k)
        v1_scr[...] = _project_heads(x_kv16, wv1[...], bv1[...], heads, d_v)
        x_enc16 = x_enc_ref[0]                                      # bf16 (Se, D)
        k2_scr[...] = _project_heads(x_enc16, wk2[...], bk2[...], heads, d_k)
        v2_scr[...] = _project_heads(x_enc16, wv2[...], bv2[...], heads, d_v)

    # Query tile sliced from the resident full decoder block (no extra DMA).
    q_start = pl.multiple_of(pl.program_id(1) * tq, tq)
    x_q = x_dec_ref[0, pl.ds(q_start, tq), :]                       # f32 (TQ, D)

    scale = jnp.float32(1.0 / math.sqrt(d_k))

    # Causal additive bias, built once per invocation (shared by all heads).
    if mask:
        row = q_start + lax.broadcasted_iota(jnp.int32, (tq, sd), 0)
        col = lax.broadcasted_iota(jnp.int32, (tq, sd), 1)
        causal_bias = jnp.where(col <= row,
                                jnp.float32(0.0), jnp.float32(-1e30))
    else:
        causal_bias = None

    # --- masked self-attention + residual + LN1 (dropout = identity) ---
    q1 = _project_heads(x_q.astype(jnp.bfloat16), wq1[...], bq1[...], heads, d_k)
    ctx1 = _attend(q1, k1_scr, v1_scr, causal_bias, scale=scale, kv_chunk=kv_chunk)
    attn1 = jnp.dot(ctx1.astype(jnp.bfloat16), wo1[...],
                    preferred_element_type=jnp.float32) + bo1[...]
    x = _layer_norm(x_q + attn1, g1[...], be1[...])

    # --- cross attention (q = decoder state, k/v = encoder memory) + LN2 ---
    q2 = _project_heads(x.astype(jnp.bfloat16), wq2[...], bq2[...], heads, d_k)
    ctx2 = _attend(q2, k2_scr, v2_scr, None, scale=scale, kv_chunk=kv_chunk)
    attn2 = jnp.dot(ctx2.astype(jnp.bfloat16), wo2[...],
                    preferred_element_type=jnp.float32) + bo2[...]
    x = _layer_norm(x + attn2, g2[...], be2[...])

    # --- position-wise feed-forward (bf16 matmuls, f32 accum) + LN3 ---
    h = jnp.dot(x.astype(jnp.bfloat16), wff1[...],
                preferred_element_type=jnp.float32) + bff1[...]
    h = jnp.maximum(h, 0.0)
    ff = jnp.dot(h.astype(jnp.bfloat16), wff2[...],
                 preferred_element_type=jnp.float32) + bff2[...]
    x = _layer_norm(x + ff, g3[...], be3[...])

    out_ref[0] = x.astype(out_ref.dtype)


PARAM_NAMES = [
    "wq1", "bq1", "wk1", "bk1", "wv1", "bv1", "wo1", "bo1", "g1", "be1",
    "wq2", "bq2", "wk2", "bk2", "wv2", "bv2", "wo2", "bo2", "g2", "be2",
    "wff1", "bff1", "wff2", "bff2", "g3", "be3",
]
# matmul weights travel as bf16 (half the DMA/VMEM); biases/LN params stay f32
BF16_PARAMS = {"wq1", "wk1", "wv1", "wo1",
               "wq2", "wk2", "wv2", "wo2",
               "wff1", "wff2"}


def decoder_layer_pallas(x_enc, x_dec, params, *, heads, d_k, d_v, mask,
                         q_tile=None, kv_chunk=512):
    B, Se, D = x_enc.shape
    _, Sd, _ = x_dec.shape
    d_ff = params["wff1"].shape[1]

    if q_tile is None:
        q_tile = Sd if Sd <= 128 else 128
    assert Sd % q_tile == 0, "Sd must be divisible by the query tile"
    n_q = Sd // q_tile

    # Encoder memory feeds only bf16 matmuls -> ingest it in bf16
    # (no-op if the caller already cast it once for all layers).
    x_enc = x_enc.astype(jnp.bfloat16)

    plist = [params[n].astype(jnp.bfloat16) if n in BF16_PARAMS else params[n]
             for n in PARAM_NAMES]

    def _param_spec(a):
        nd = a.ndim
        # Grid-invariant block index -> single-buffer (nothing to prefetch).
        return pl.BlockSpec(a.shape, lambda b, qi, _nd=nd: (0,) * _nd,
                            pipeline_mode=pl.Buffered(1))

    in_specs = (
        [pl.BlockSpec((1, Se, D), lambda b, qi: (b, 0, 0)),   # encoder memory (bf16)
         pl.BlockSpec((1, Sd, D), lambda b, qi: (b, 0, 0))]   # decoder states (f32)
        + [_param_spec(a) for a in plist]
    )
    out_specs = pl.BlockSpec((1, q_tile, D), lambda b, qi: (b, qi, 0))

    scratch_shapes = [
        pltpu.VMEM((heads, Sd, d_k), jnp.bfloat16),   # K1 (self-attn)
        pltpu.VMEM((heads, Sd, d_v), jnp.bfloat16),   # V1
        pltpu.VMEM((heads, Se, d_k), jnp.bfloat16),   # K2 (cross-attn)
        pltpu.VMEM((heads, Se, d_v), jnp.bfloat16),   # V2
    ]

    # --- advisory cost estimate (matches the kernel now that K/V are hoisted) ---
    Hdk, Hdv = heads * d_k, heads * d_v
    flops_self = (2 * B * Sd * D * (2 * Hdk + Hdv) + 2 * B * Sd * Hdv * D
                  + 2 * B * heads * Sd * Sd * (d_k + d_v))
    flops_cross = (2 * B * Sd * D * Hdk + 2 * B * Se * D * (Hdk + Hdv)
                   + 2 * B * Sd * Hdv * D
                   + 2 * B * heads * Sd * Se * (d_k + d_v))
    flops_ffn = 4 * B * Sd * D * d_ff
    transcend = B * heads * Sd * (Sd + Se) + 3 * B * Sd
    bytes_acc = (B * Se * D * 2          # bf16 encoder memory (read)
                 + B * Sd * D * 4        # f32 decoder states (read)
                 + B * Sd * D * 4        # f32 output (write)
                 + sum(int(a.size) * a.dtype.itemsize for a in plist))
    cost = pl.CostEstimate(flops=int(flops_self + flops_cross + flops_ffn),
                           transcendentals=int(transcend),
                           bytes_accessed=int(bytes_acc))

    kern = functools.partial(decoder_layer_kernel,
                             heads=heads, d_k=d_k, d_v=d_v, mask=mask,
                             kv_chunk=kv_chunk)
    return pl.pallas_call(
        kern,
        out_shape=jax.ShapeDtypeStruct((B, Sd, D), jnp.float32),
        grid=(B, n_q),
        in_specs=in_specs,
        out_specs=out_specs,
        scratch_shapes=scratch_shapes,
        compiler_params=pltpu.CompilerParams(
            # qi must be "arbitrary": the K/V scratch is filled at qi == 0 and
            # reused by every later query tile of the same batch element.
            dimension_semantics=("parallel", "arbitrary"),
            vmem_limit_bytes=48 * 1024 * 1024),
        cost_estimate=cost,
    )(x_enc, x_dec, *plist)


# ---------------------------------------------------------------------------
# Parameter initialization (deterministic, synthetic)
# ---------------------------------------------------------------------------
def _init_linear(key, fan_in, fan_out):
    kw, kb = jax.random.split(key)
    lim = 1.0 / math.sqrt(fan_in)
    w = jax.random.uniform(kw, (fan_in, fan_out), jnp.float32, -lim, lim)
    b = jax.random.uniform(kb, (1, fan_out), jnp.float32, -lim, lim)
    return w, b


def init_layer_params(key, d_model, d_ff, heads, d_k, d_v):
    ks = jax.random.split(key, 10)
    p = {}
    p["wq1"], p["bq1"] = _init_linear(ks[0], d_model, heads * d_k)
    p["wk1"], p["bk1"] = _init_linear(ks[1], d_model, heads * d_k)
    p["wv1"], p["bv1"] = _init_linear(ks[2], d_model, heads * d_v)
    p["wo1"], p["bo1"] = _init_linear(ks[3], heads * d_v, d_model)
    p["g1"], p["be1"] = (jnp.ones((1, d_model), jnp.float32),
                         jnp.zeros((1, d_model), jnp.float32))
    p["wq2"], p["bq2"] = _init_linear(ks[4], d_model, heads * d_k)
    p["wk2"], p["bk2"] = _init_linear(ks[5], d_model, heads * d_k)
    p["wv2"], p["bv2"] = _init_linear(ks[6], d_model, heads * d_v)
    p["wo2"], p["bo2"] = _init_linear(ks[7], heads * d_v, d_model)
    p["g2"], p["be2"] = (jnp.ones((1, d_model), jnp.float32),
                         jnp.zeros((1, d_model), jnp.float32))
    p["wff1"], p["bff1"] = _init_linear(ks[8], d_model, d_ff)
    p["wff2"], p["bff2"] = _init_linear(ks[9], d_ff, d_model)
    p["g3"], p["be3"] = (jnp.ones((1, d_model), jnp.float32),
                         jnp.zeros((1, d_model), jnp.float32))
    return p


def decoder_pallas(x_enc, x_dec, layer_params, *, heads, d_k, d_v, mask):
    """Decoder.forward: sequentially apply every decoder layer."""
    # Cast the encoder memory to bf16 ONCE; it is re-read by every layer.
    x_enc = x_enc.astype(jnp.bfloat16)
    # TODO(synk): cross-call prefetch of the next layer's weights (P10) would
    # hide per-layer weight DMA for decode-like (small Sd) shapes.
    for p in layer_params:
        x_dec = decoder_layer_pallas(x_enc, x_dec, p,
                                     heads=heads, d_k=d_k, d_v=d_v, mask=mask)
    return x_dec


# ---------------------------------------------------------------------------
if __name__ == "__main__":
    # small, lane-dense config (D, H*d_k, H*d_v, d_ff all multiples of 128)
    d_model, d_ff, heads, d_k, d_v = 128, 256, 4, 32, 32
    p_prob, mask, n_layers = 0.1, True, 2
    B, S_enc, S_dec = 2, 8, 8

    root = jax.random.PRNGKey(0)
    k_enc, k_dec, k_par = jax.random.split(root, 3)
    x_enc = jax.random.normal(k_enc, (B, S_enc, d_model), jnp.float32)
    x_dec = jax.random.normal(k_dec, (B, S_dec, d_model), jnp.float32)

    layer_keys = jax.random.split(k_par, n_layers)
    layer_params = [init_layer_params(k, d_model, d_ff, heads, d_k, d_v)
                    for k in layer_keys]

    out = decoder_pallas(x_enc, x_dec, layer_params,
                         heads=heads, d_k=d_k, d_v=d_v, mask=mask)
    out = jax.block_until_ready(out)
    assert out.shape == (B, S_dec, d_model)
    assert jnp.all(jnp.isfinite(out))
    print("KERNEL_OK")
</pallas_src>

<mosaic_0001>
module attributes {stable_mosaic.version = 11 : i64} {
  func.func @decoder_layer_kernel(%arg0: i32, %arg1: i32, %arg2: memref<1x8x128xbf16, #tpu.memory_space<vmem>>, %arg3: memref<1x8x128xf32, #tpu.memory_space<vmem>>, %arg4: memref<128x128xbf16, #tpu.memory_space<vmem>>, %arg5: memref<1x128xf32, #tpu.memory_space<vmem>>, %arg6: memref<128x128xbf16, #tpu.memory_space<vmem>>, %arg7: memref<1x128xf32, #tpu.memory_space<vmem>>, %arg8: memref<128x128xbf16, #tpu.memory_space<vmem>>, %arg9: memref<1x128xf32, #tpu.memory_space<vmem>>, %arg10: memref<128x128xbf16, #tpu.memory_space<vmem>>, %arg11: memref<1x128xf32, #tpu.memory_space<vmem>>, %arg12: memref<1x128xf32, #tpu.memory_space<vmem>>, %arg13: memref<1x128xf32, #tpu.memory_space<vmem>>, %arg14: memref<128x128xbf16, #tpu.memory_space<vmem>>, %arg15: memref<1x128xf32, #tpu.memory_space<vmem>>, %arg16: memref<128x128xbf16, #tpu.memory_space<vmem>>, %arg17: memref<1x128xf32, #tpu.memory_space<vmem>>, %arg18: memref<128x128xbf16, #tpu.memory_space<vmem>>, %arg19: memref<1x128xf32, #tpu.memory_space<vmem>>, %arg20: memref<128x128xbf16, #tpu.memory_space<vmem>>, %arg21: memref<1x128xf32, #tpu.memory_space<vmem>>, %arg22: memref<1x128xf32, #tpu.memory_space<vmem>>, %arg23: memref<1x128xf32, #tpu.memory_space<vmem>>, %arg24: memref<128x256xbf16, #tpu.memory_space<vmem>>, %arg25: memref<1x256xf32, #tpu.memory_space<vmem>>, %arg26: memref<256x128xbf16, #tpu.memory_space<vmem>>, %arg27: memref<1x128xf32, #tpu.memory_space<vmem>>, %arg28: memref<1x128xf32, #tpu.memory_space<vmem>>, %arg29: memref<1x128xf32, #tpu.memory_space<vmem>>, %arg30: memref<1x8x128xf32, #tpu.memory_space<vmem>>, %arg31: memref<4x8x32xbf16, #tpu.memory_space<vmem>>, %arg32: memref<4x8x32xbf16, #tpu.memory_space<vmem>>, %arg33: memref<4x8x32xbf16, #tpu.memory_space<vmem>>, %arg34: memref<4x8x32xbf16, #tpu.memory_space<vmem>>) attributes {dimension_semantics = [#tpu.dimension_semantics<parallel>, #tpu.dimension_semantics<arbitrary>], iteration_bounds = array<i64: 2, 1>, scalar_prefetch = 0 : i64, scratch_operands = 4 : i64, tpu.core_type = #tpu.core_type<tc>, window_params = [{transform_indices = @transform_0, window_bounds = array<i64: 1, 8, 128>}, {transform_indices = @transform_1, window_bounds = array<i64: 1, 8, 128>}, {pipeline_mode = #tpu.pipeline_mode<synchronous>, transform_indices = @transform_2, window_bounds = array<i64: 128, 128>}, {pipeline_mode = #tpu.pipeline_mode<synchronous>, transform_indices = @transform_3, window_bounds = array<i64: 1, 128>}, {pipeline_mode = #tpu.pipeline_mode<synchronous>, transform_indices = @transform_4, window_bounds = array<i64: 128, 128>}, {pipeline_mode = #tpu.pipeline_mode<synchronous>, transform_indices = @transform_5, window_bounds = array<i64: 1, 128>}, {pipeline_mode = #tpu.pipeline_mode<synchronous>, transform_indices = @transform_6, window_bounds = array<i64: 128, 128>}, {pipeline_mode = #tpu.pipeline_mode<synchronous>, transform_indices = @transform_7, window_bounds = array<i64: 1, 128>}, {pipeline_mode = #tpu.pipeline_mode<synchronous>, transform_indices = @transform_8, window_bounds = array<i64: 128, 128>}, {pipeline_mode = #tpu.pipeline_mode<synchronous>, transform_indices = @transform_9, window_bounds = array<i64: 1, 128>}, {pipeline_mode = #tpu.pipeline_mode<synchronous>, transform_indices = @transform_10, window_bounds = array<i64: 1, 128>}, {pipeline_mode = #tpu.pipeline_mode<synchronous>, transform_indices = @transform_11, window_bounds = array<i64: 1, 128>}, {pipeline_mode = #tpu.pipeline_mode<synchronous>, transform_indices = @transform_12, window_bounds = array<i64: 128, 128>}, {pipeline_mode = #tpu.pipeline_mode<synchronous>, transform_indices = @transform_13, window_bounds = array<i64: 1, 128>}, {pipeline_mode = #tpu.pipeline_mode<synchronous>, transform_indices = @transform_14, window_bounds = array<i64: 128, 128>}, {pipeline_mode = #tpu.pipeline_mode<synchronous>, transform_indices = @transform_15, window_bounds = array<i64: 1, 128>}, {pipeline_mode = #tpu.pipeline_mode<synchronous>, transform_indices = @transform_16, window_bounds = array<i64: 128, 128>}, {pipeline_mode = #tpu.pipeline_mode<synchronous>, transform_indices = @transform_17, window_bounds = array<i64: 1, 128>}, {pipeline_mode = #tpu.pipeline_mode<synchronous>, transform_indices = @transform_18, window_bounds = array<i64: 128, 128>}, {pipeline_mode = #tpu.pipeline_mode<synchronous>, transform_indices = @transform_19, window_bounds = array<i64: 1, 128>}, {pipeline_mode = #tpu.pipeline_mode<synchronous>, transform_indices = @transform_20, window_bounds = array<i64: 1, 128>}, {pipeline_mode = #tpu.pipeline_mode<synchronous>, transform_indices = @transform_21, window_bounds = array<i64: 1, 128>}, {pipeline_mode = #tpu.pipeline_mode<synchronous>, transform_indices = @transform_22, window_bounds = array<i64: 128, 256>}, {pipeline_mode = #tpu.pipeline_mode<synchronous>, transform_indices = @transform_23, window_bounds = array<i64: 1, 256>}, {pipeline_mode = #tpu.pipeline_mode<synchronous>, transform_indices = @transform_24, window_bounds = array<i64: 256, 128>}, {pipeline_mode = #tpu.pipeline_mode<synchronous>, transform_indices = @transform_25, window_bounds = array<i64: 1, 128>}, {pipeline_mode = #tpu.pipeline_mode<synchronous>, transform_indices = @transform_26, window_bounds = array<i64: 1, 128>}, {pipeline_mode = #tpu.pipeline_mode<synchronous>, transform_indices = @transform_27, window_bounds = array<i64: 1, 128>}, {transform_indices = @transform_28, window_bounds = array<i64: 1, 8, 128>}]} {
    %c0_i32 = arith.constant 0 : i32
    %0 = arith.cmpi eq, %arg1, %c0_i32 : i32
    %1 = arith.extui %0 : i1 to i32
    %c0_i32_0 = arith.constant 0 : i32
    %2 = arith.cmpi ne, %1, %c0_i32_0 : i32
    scf.if %2 {
      %c0_86 = arith.constant 0 : index
      %c0_87 = arith.constant 0 : index
      %c0_88 = arith.constant 0 : index
      %173 = vector.load %arg3[%c0_86, %c0_87, %c0_88] : memref<1x8x128xf32, #tpu.memory_space<vmem>>, vector<1x8x128xf32>
      %174 = vector.shape_cast %173 : vector<1x8x128xf32> to vector<8x128xf32>
      %175 = arith.truncf %174 : vector<8x128xf32> to vector<8x128xbf16>
      %c0_89 = arith.constant 0 : index
      %c0_90 = arith.constant 0 : index
      %176 = vector.load %arg6[%c0_89, %c0_90] : memref<128x128xbf16, #tpu.memory_space<vmem>>, vector<128x128xbf16>
      %c0_91 = arith.constant 0 : index
      %c0_92 = arith.constant 0 : index
      %177 = vector.load %arg7[%c0_91, %c0_92] : memref<1x128xf32, #tpu.memory_space<vmem>>, vector<1x128xf32>
      %cst_93 = arith.constant dense<0.000000e+00> : vector<8x128xf32>
      %178 = tpu.matmul %175, %176, %cst_93 {dimension_numbers = #tpu.dot_dimension_numbers<[1], [0], [0], [1], [0, 0, 1, 1], [], []>} : vector<8x128xbf16>, vector<128x128xbf16>, vector<8x128xf32> -> vector<8x128xf32>
      %179 = vector.broadcast %177 : vector<1x128xf32> to vector<8x128xf32>
      %180 = arith.addf %178, %179 : vector<8x128xf32>
      %181 = vector.shape_cast %180 : vector<8x128xf32> to vector<8x4x32xf32>
      %182 = tpu.transpose %181, [1, 0, 2] : vector<8x4x32xf32> -> vector<4x8x32xf32>
      %183 = arith.truncf %182 : vector<4x8x32xf32> to vector<4x8x32xbf16>
      %c0_94 = arith.constant 0 : index
      %c0_95 = arith.constant 0 : index
      %c0_96 = arith.constant 0 : index
      %184 = vector.load %arg31[%c0_94, %c0_95, %c0_96] : memref<4x8x32xbf16, #tpu.memory_space<vmem>>, vector<4x8x32xbf16>
      tpu.vector_store %arg31[%c0_94, %c0_95, %c0_96], %183 {strides = array<i32>} : memref<4x8x32xbf16, #tpu.memory_space<vmem>>, vector<4x8x32xbf16>,
      %c0_97 = arith.constant 0 : index
      %c0_98 = arith.constant 0 : index
      %185 = vector.load %arg8[%c0_97, %c0_98] : memref<128x128xbf16, #tpu.memory_space<vmem>>, vector<128x128xbf16>
      %c0_99 = arith.constant 0 : index
      %c0_100 = arith.constant 0 : index
      %186 = vector.load %arg9[%c0_99, %c0_100] : memref<1x128xf32, #tpu.memory_space<vmem>>, vector<1x128xf32>
      %cst_101 = arith.constant dense<0.000000e+00> : vector<8x128xf32>
      %187 = tpu.matmul %175, %185, %cst_101 {dimension_numbers = #tpu.dot_dimension_numbers<[1], [0], [0], [1], [0, 0, 1, 1], [], []>} : vector<8x128xbf16>, vector<128x128xbf16>, vector<8x128xf32> -> vector<8x128xf32>
      %188 = vector.broadcast %186 : vector<1x128xf32> to vector<8x128xf32>
      %189 = arith.addf %187, %188 : vector<8x128xf32>
      %190 = vector.shape_cast %189 : vector<8x128xf32> to vector<8x4x32xf32>
      %191 = tpu.transpose %190, [1, 0, 2] : vector<8x4x32xf32> -> vector<4x8x32xf32>
      %192 = arith.truncf %191 : vector<4x8x32xf32> to vector<4x8x32xbf16>
      %c0_102 = arith.constant 0 : index
      %c0_103 = arith.constant 0 : index
      %c0_104 = arith.constant 0 : index
      %193 = vector.load %arg32[%c0_102, %c0_103, %c0_104] : memref<4x8x32xbf16, #tpu.memory_space<vmem>>, vector<4x8x32xbf16>
      tpu.vector_store %arg32[%c0_102, %c0_103, %c0_104], %192 {strides = array<i32>} : memref<4x8x32xbf16, #tpu.memory_space<vmem>>, vector<4x8x32xbf16>,
      %c0_105 = arith.constant 0 : index
      %c0_106 = arith.constant 0 : index
      %c0_107 = arith.constant 0 : index
      %194 = vector.load %arg2[%c0_105, %c0_106, %c0_107] : memref<1x8x128xbf16, #tpu.memory_space<vmem>>, vector<1x8x128xbf16>
      %195 = vector.shape_cast %194 : vector<1x8x128xbf16> to vector<8x128xbf16>
      %c0_108 = arith.constant 0 : index
      %c0_109 = arith.constant 0 : index
      %196 = vector.load %arg16[%c0_108, %c0_109] : memref<128x128xbf16, #tpu.memory_space<vmem>>, vector<128x128xbf16>
      %c0_110 = arith.constant 0 : index
      %c0_111 = arith.constant 0 : index
      %197 = vector.load %arg17[%c0_110, %c0_111] : memref<1x128xf32, #tpu.memory_space<vmem>>, vector<1x128xf32>
      %cst_112 = arith.constant dense<0.000000e+00> : vector<8x128xf32>
      %198 = tpu.matmul %195, %196, %cst_112 {dimension_numbers = #tpu.dot_dimension_numbers<[1], [0], [0], [1], [0, 0, 1, 1], [], []>} : vector<8x128xbf16>, vector<128x128xbf16>, vector<8x128xf32> -> vector<8x128xf32>
      %199 = vector.broadcast %197 : vector<1x128xf32> to vector<8x128xf32>
      %200 = arith.addf %198, %199 : vector<8x128xf32>
      %201 = vector.shape_cast %200 : vector<8x128xf32> to vector<8x4x32xf32>
      %202 = tpu.transpose %201, [1, 0, 2] : vector<8x4x32xf32> -> vector<4x8x32xf32>
      %203 = arith.truncf %202 : vector<4x8x32xf32> to vector<4x8x32xbf16>
      %c0_113 = arith.constant 0 : index
      %c0_114 = arith.constant 0 : index
      %c0_115 = arith.constant 0 : index
      %204 = vector.load %arg33[%c0_113, %c0_114, %c0_115] : memref<4x8x32xbf16, #tpu.memory_space<vmem>>, vector<4x8x32xbf16>
      tpu.vector_store %arg33[%c0_113, %c0_114, %c0_115], %203 {strides = array<i32>} : memref<4x8x32xbf16, #tpu.memory_space<vmem>>, vector<4x8x32xbf16>,
      %c0_116 = arith.constant 0 : index
      %c0_117 = arith.constant 0 : index
      %205 = vector.load %arg18[%c0_116, %c0_117] : memref<128x128xbf16, #tpu.memory_space<vmem>>, vector<128x128xbf16>
      %c0_118 = arith.constant 0 : index
      %c0_119 = arith.constant 0 : index
      %206 = vector.load %arg19[%c0_118, %c0_119] : memref<1x128xf32, #tpu.memory_space<vmem>>, vector<1x128xf32>
      %cst_120 = arith.constant dense<0.000000e+00> : vector<8x128xf32>
      %207 = tpu.matmul %195, %205, %cst_120 {dimension_numbers = #tpu.dot_dimension_numbers<[1], [0], [0], [1], [0, 0, 1, 1], [], []>} : vector<8x128xbf16>, vector<128x128xbf16>, vector<8x128xf32> -> vector<8x128xf32>
      %208 = vector.broadcast %206 : vector<1x128xf32> to vector<8x128xf32>
      %209 = arith.addf %207, %208 : vector<8x128xf32>
      %210 = vector.shape_cast %209 : vector<8x128xf32> to vector<8x4x32xf32>
      %211 = tpu.transpose %210, [1, 0, 2] : vector<8x4x32xf32> -> vector<4x8x32xf32>
      %212 = arith.truncf %211 : vector<4x8x32xf32> to vector<4x8x32xbf16>
      %c0_121 = arith.constant 0 : index
      %c0_122 = arith.constant 0 : index
      %c0_123 = arith.constant 0 : index
      %213 = vector.load %arg34[%c0_121, %c0_122, %c0_123] : memref<4x8x32xbf16, #tpu.memory_space<vmem>>, vector<4x8x32xbf16>
      tpu.vector_store %arg34[%c0_121, %c0_122, %c0_123], %212 {strides = array<i32>} : memref<4x8x32xbf16, #tpu.memory_space<vmem>>, vector<4x8x32xbf16>,
    } else {
    }
    %c8_i32 = arith.constant 8 : i32
    %3 = arith.muli %arg1, %c8_i32 : i32
    %4 = tpu.assume_multiple %3, 8 : i32
    %c0 = arith.constant 0 : index
    %5 = arith.index_cast %4 : i32 to index
    %c0_1 = arith.constant 0 : index
    %6 = vector.load %arg3[%c0, %5, %c0_1] : memref<1x8x128xf32, #tpu.memory_space<vmem>>, vector<1x8x128xf32>
    %7 = vector.shape_cast %6 : vector<1x8x128xf32> to vector<8x128xf32>
    %8 = tpu.iota {dimensions = array<i32: 0>} : vector<8x8xi32>
    %9 = vector.broadcast %4 : i32 to vector<8x8xi32>
    %10 = arith.addi %9, %8 : vector<8x8xi32>
    %11 = tpu.iota {dimensions = array<i32: 1>} : vector<8x8xi32>
    %12 = arith.cmpi sle, %11, %10 : vector<8x8xi32>
    %cst = arith.constant 0.000000e+00 : f32
    %cst_2 = arith.constant -1.000000e+30 : f32
    %13 = vector.broadcast %cst : f32 to vector<8x8xf32>
    %14 = vector.broadcast %cst_2 : f32 to vector<8x8xf32>
    %15 = arith.select %12, %13, %14 : vector<8x8xi1>, vector<8x8xf32>
    %16 = arith.truncf %7 : vector<8x128xf32> to vector<8x128xbf16>
    %c0_3 = arith.constant 0 : index
    %c0_4 = arith.constant 0 : index
    %17 = vector.load %arg4[%c0_3, %c0_4] : memref<128x128xbf16, #tpu.memory_space<vmem>>, vector<128x128xbf16>
    %c0_5 = arith.constant 0 : index
    %c0_6 = arith.constant 0 : index
    %18 = vector.load %arg5[%c0_5, %c0_6] : memref<1x128xf32, #tpu.memory_space<vmem>>, vector<1x128xf32>
    %cst_7 = arith.constant dense<0.000000e+00> : vector<8x128xf32>
    %19 = tpu.matmul %16, %17, %cst_7 {dimension_numbers = #tpu.dot_dimension_numbers<[1], [0], [0], [1], [0, 0, 1, 1], [], []>} : vector<8x128xbf16>, vector<128x128xbf16>, vector<8x128xf32> -> vector<8x128xf32>
    %20 = vector.broadcast %18 : vector<1x128xf32> to vector<8x128xf32>
    %21 = arith.addf %19, %20 : vector<8x128xf32>
    %22 = vector.shape_cast %21 : vector<8x128xf32> to vector<8x4x32xf32>
    %23 = tpu.transpose %22, [1, 0, 2] : vector<8x4x32xf32> -> vector<4x8x32xf32>
    %24 = arith.truncf %23 : vector<4x8x32xf32> to vector<4x8x32xbf16>
    %c0_8 = arith.constant 0 : index
    %c0_9 = arith.constant 0 : index
    %c0_10 = arith.constant 0 : index
    %25 = vector.load %arg31[%c0_8, %c0_9, %c0_10] : memref<4x8x32xbf16, #tpu.memory_space<vmem>>, vector<4x8x32xbf16>
    "tpu.trace_start"() <{level = 10 : i32, message = "hqd,hkd->hqk"}> : () -> ()
    %cst_11 = arith.constant dense<0.000000e+00> : vector<4x8x8xf32>
    %26 = tpu.matmul %24, %25, %cst_11 {dimension_numbers = #tpu.dot_dimension_numbers<[2], [2], [1], [1], [0, 0, 0, 1, 1, 1], [0], [0]>} : vector<4x8x32xbf16>, vector<4x8x32xbf16>, vector<4x8x8xf32> -> vector<4x8x8xf32>
    "tpu.trace_stop"() : () -> ()
    %cst_12 = arith.constant 0.176776692 : f32
    %27 = vector.broadcast %cst_12 : f32 to vector<4x8x8xf32>
    %28 = arith.mulf %26, %27 : vector<4x8x8xf32>
    %29 = vector.shape_cast %15 : vector<8x8xf32> to vector<1x8x8xf32>
    %30 = vector.broadcast %29 : vector<1x8x8xf32> to vector<4x8x8xf32>
    %31 = arith.addf %28, %30 : vector<4x8x8xf32>
    %cst_13 = arith.constant dense<0xFF800000> : vector<4x8xf32>
    %32 = vector.multi_reduction <maximumf>, %31, %cst_13 [2] : vector<4x8x8xf32> to vector<4x8xf32>
    %33 = vector.shape_cast %32 : vector<4x8xf32> to vector<4x8x1xf32>
    %34 = vector.broadcast %33 : vector<4x8x1xf32> to vector<4x8x8xf32>
    %35 = arith.subf %31, %34 : vector<4x8x8xf32>
    %36 = math.exp %35 : vector<4x8x8xf32>
    %cst_14 = arith.constant dense<0.000000e+00> : vector<4x8xf32>
    %37 = vector.multi_reduction <add>, %36, %cst_14 [2] : vector<4x8x8xf32> to vector<4x8xf32>
    %38 = vector.shape_cast %37 : vector<4x8xf32> to vector<4x8x1xf32>
    %39 = tpu.reciprocal %38 {approx = true} : vector<4x8x1xf32> -> vector<4x8x1xf32>
    %40 = vector.broadcast %39 : vector<4x8x1xf32> to vector<4x8x8xf32>
    %41 = arith.mulf %36, %40 : vector<4x8x8xf32>
    %42 = arith.truncf %41 : vector<4x8x8xf32> to vector<4x8x8xbf16>
    %c0_15 = arith.constant 0 : index
    %c0_16 = arith.constant 0 : index
    %c0_17 = arith.constant 0 : index
    %43 = vector.load %arg32[%c0_15, %c0_16, %c0_17] : memref<4x8x32xbf16, #tpu.memory_space<vmem>>, vector<4x8x32xbf16>
    "tpu.trace_start"() <{level = 10 : i32, message = "hqk,hkd->hqd"}> : () -> ()
    %cst_18 = arith.constant dense<0.000000e+00> : vector<4x8x32xf32>
    %44 = tpu.matmul %42, %43, %cst_18 {dimension_numbers = #tpu.dot_dimension_numbers<[2], [1], [1], [2], [0, 0, 0, 1, 1, 2], [0], [0]>} : vector<4x8x8xbf16>, vector<4x8x32xbf16>, vector<4x8x32xf32> -> vector<4x8x32xf32>
    "tpu.trace_stop"() : () -> ()
    %45 = tpu.transpose %44, [1, 0, 2] : vector<4x8x32xf32> -> vector<8x4x32xf32>
    %46 = vector.shape_cast %45 : vector<8x4x32xf32> to vector<8x128xf32>
    %47 = arith.truncf %46 : vector<8x128xf32> to vector<8x128xbf16>
    %c0_19 = arith.constant 0 : index
    %c0_20 = arith.constant 0 : index
    %48 = vector.load %arg10[%c0_19, %c0_20] : memref<128x128xbf16, #tpu.memory_space<vmem>>, vector<128x128xbf16>
    %cst_21 = arith.constant dense<0.000000e+00> : vector<8x128xf32>
    %49 = tpu.matmul %47, %48, %cst_21 {dimension_numbers = #tpu.dot_dimension_numbers<[1], [0], [0], [1], [0, 0, 1, 1], [], []>} : vector<8x128xbf16>, vector<128x128xbf16>, vector<8x128xf32> -> vector<8x128xf32>
    %c0_22 = arith.constant 0 : index
    %c0_23 = arith.constant 0 : index
    %50 = vector.load %arg11[%c0_22, %c0_23] : memref<1x128xf32, #tpu.memory_space<vmem>>, vector<1x128xf32>
    %51 = vector.broadcast %50 : vector<1x128xf32> to vector<8x128xf32>
    %52 = arith.addf %49, %51 : vector<8x128xf32>
    %53 = arith.addf %7, %52 : vector<8x128xf32>
    %c0_24 = arith.constant 0 : index
    %c0_25 = arith.constant 0 : index
    %54 = vector.load %arg12[%c0_24, %c0_25] : memref<1x128xf32, #tpu.memory_space<vmem>>, vector<1x128xf32>
    %c0_26 = arith.constant 0 : index
    %c0_27 = arith.constant 0 : index
    %55 = vector.load %arg13[%c0_26, %c0_27] : memref<1x128xf32, #tpu.memory_space<vmem>>, vector<1x128xf32>
    %cst_28 = arith.constant dense<0.000000e+00> : vector<8xf32>
    %56 = vector.multi_reduction <add>, %53, %cst_28 [1] : vector<8x128xf32> to vector<8xf32>
    %57 = vector.shape_cast %56 : vector<8xf32> to vector<8x1xf32>
    %cst_29 = arith.constant 1.280000e+02 : f32
    %58 = vector.broadcast %cst_29 : f32 to vector<8x1xf32>
    %59 = arith.divf %57, %58 : vector<8x1xf32>
    %60 = vector.broadcast %59 : vector<8x1xf32> to vector<8x128xf32>
    %61 = arith.subf %53, %60 : vector<8x128xf32>
    %62 = arith.mulf %61, %61 : vector<8x128xf32>
    %cst_30 = arith.constant dense<0.000000e+00> : vector<8xf32>
    %63 = vector.multi_reduction <add>, %62, %cst_30 [1] : vector<8x128xf32> to vector<8xf32>
    %64 = vector.shape_cast %63 : vector<8xf32> to vector<8x1xf32>
    %cst_31 = arith.constant 1.280000e+02 : f32
    %65 = vector.broadcast %cst_31 : f32 to vector<8x1xf32>
    %66 = arith.divf %64, %65 : vector<8x1xf32>
    %cst_32 = arith.constant 9.99999974E-6 : f32
    %67 = vector.broadcast %cst_32 : f32 to vector<8x1xf32>
    %68 = arith.addf %66, %67 : vector<8x1xf32>
    %69 = math.rsqrt %68 : vector<8x1xf32>
    %70 = vector.broadcast %69 : vector<8x1xf32> to vector<8x128xf32>
    %71 = arith.mulf %61, %70 : vector<8x128xf32>
    %72 = vector.broadcast %54 : vector<1x128xf32> to vector<8x128xf32>
    %73 = arith.mulf %72, %71 : vector<8x128xf32>
    %74 = vector.broadcast %55 : vector<1x128xf32> to vector<8x128xf32>
    %75 = arith.addf %73, %74 : vector<8x128xf32>
    %76 = arith.truncf %75 : vector<8x128xf32> to vector<8x128xbf16>
    %c0_33 = arith.constant 0 : index
    %c0_34 = arith.constant 0 : index
    %77 = vector.load %arg14[%c0_33, %c0_34] : memref<128x128xbf16, #tpu.memory_space<vmem>>, vector<128x128xbf16>
    %c0_35 = arith.constant 0 : index
    %c0_36 = arith.constant 0 : index
    %78 = vector.load %arg15[%c0_35, %c0_36] : memref<1x128xf32, #tpu.memory_space<vmem>>, vector<1x128xf32>
    %cst_37 = arith.constant dense<0.000000e+00> : vector<8x128xf32>
    %79 = tpu.matmul %76, %77, %cst_37 {dimension_numbers = #tpu.dot_dimension_numbers<[1], [0], [0], [1], [0, 0, 1, 1], [], []>} : vector<8x128xbf16>, vector<128x128xbf16>, vector<8x128xf32> -> vector<8x128xf32>
    %80 = vector.broadcast %78 : vector<1x128xf32> to vector<8x128xf32>
    %81 = arith.addf %79, %80 : vector<8x128xf32>
    %82 = vector.shape_cast %81 : vector<8x128xf32> to vector<8x4x32xf32>
    %83 = tpu.transpose %82, [1, 0, 2] : vector<8x4x32xf32> -> vector<4x8x32xf32>
    %84 = arith.truncf %83 : vector<4x8x32xf32> to vector<4x8x32xbf16>
    %c0_38 = arith.constant 0 : index
    %c0_39 = arith.constant 0 : index
    %c0_40 = arith.constant 0 : index
    %85 = vector.load %arg33[%c0_38, %c0_39, %c0_40] : memref<4x8x32xbf16, #tpu.memory_space<vmem>>, vector<4x8x32xbf16>
    "tpu.trace_start"() <{level = 10 : i32, message = "hqd,hkd->hqk"}> : () -> ()
    %cst_41 = arith.constant dense<0.000000e+00> : vector<4x8x8xf32>
    %86 = tpu.matmul %84, %85, %cst_41 {dimension_numbers = #tpu.dot_dimension_numbers<[2], [2], [1], [1], [0, 0, 0, 1, 1, 1], [0], [0]>} : vector<4x8x32xbf16>, vector<4x8x32xbf16>, vector<4x8x8xf32> -> vector<4x8x8xf32>
    "tpu.trace_stop"() : () -> ()
    %cst_42 = arith.constant 0.176776692 : f32
    %87 = vector.broadcast %cst_42 : f32 to vector<4x8x8xf32>
    %88 = arith.mulf %86, %87 : vector<4x8x8xf32>
    %cst_43 = arith.constant dense<0xFF800000> : vector<4x8xf32>
    %89 = vector.multi_reduction <maximumf>, %88, %cst_43 [2] : vector<4x8x8xf32> to vector<4x8xf32>
    %90 = vector.shape_cast %89 : vector<4x8xf32> to vector<4x8x1xf32>
    %91 = vector.broadcast %90 : vector<4x8x1xf32> to vector<4x8x8xf32>
    %92 = arith.subf %88, %91 : vector<4x8x8xf32>
    %93 = math.exp %92 : vector<4x8x8xf32>
    %cst_44 = arith.constant dense<0.000000e+00> : vector<4x8xf32>
    %94 = vector.multi_reduction <add>, %93, %cst_44 [2] : vector<4x8x8xf32> to vector<4x8xf32>
    %95 = vector.shape_cast %94 : vector<4x8xf32> to vector<4x8x1xf32>
    %96 = tpu.reciprocal %95 {approx = true} : vector<4x8x1xf32> -> vector<4x8x1xf32>
    %97 = vector.broadcast %96 : vector<4x8x1xf32> to vector<4x8x8xf32>
    %98 = arith.mulf %93, %97 : vector<4x8x8xf32>
    %99 = arith.truncf %98 : vector<4x8x8xf32> to vector<4x8x8xbf16>
    %c0_45 = arith.constant 0 : index
    %c0_46 = arith.constant 0 : index
    %c0_47 = arith.constant 0 : index
    %100 = vector.load %arg34[%c0_45, %c0_46, %c0_47] : memref<4x8x32xbf16, #tpu.memory_space<vmem>>, vector<4x8x32xbf16>
    "tpu.trace_start"() <{level = 10 : i32, message = "hqk,hkd->hqd"}> : () -> ()
    %cst_48 = arith.constant dense<0.000000e+00> : vector<4x8x32xf32>
    %101 = tpu.matmul %99, %100, %cst_48 {dimension_numbers = #tpu.dot_dimension_numbers<[2], [1], [1], [2], [0, 0, 0, 1, 1, 2], [0], [0]>} : vector<4x8x8xbf16>, vector<4x8x32xbf16>, vector<4x8x32xf32> -> vector<4x8x32xf32>
    "tpu.trace_stop"() : () -> ()
    %102 = tpu.transpose %101, [1, 0, 2] : vector<4x8x32xf32> -> vector<8x4x32xf32>
    %103 = vector.shape_cast %102 : vector<8x4x32xf32> to vector<8x128xf32>
    %104 = arith.truncf %103 : vector<8x128xf32> to vector<8x128xbf16>
    %c0_49 = arith.constant 0 : index
    %c0_50 = arith.constant 0 : index
    %105 = vector.load %arg20[%c0_49, %c0_50] : memref<128x128xbf16, #tpu.memory_space<vmem>>, vector<128x128xbf16>
    %cst_51 = arith.constant dense<0.000000e+00> : vector<8x128xf32>
    %106 = tpu.matmul %104, %105, %cst_51 {dimension_numbers = #tpu.dot_dimension_numbers<[1], [0], [0], [1], [0, 0, 1, 1], [], []>} : vector<8x128xbf16>, vector<128x128xbf16>, vector<8x128xf32> -> vector<8x128xf32>
    %c0_52 = arith.constant 0 : index
    %c0_53 = arith.constant 0 : index
    %107 = vector.load %arg21[%c0_52, %c0_53] : memref<1x128xf32, #tpu.memory_space<vmem>>, vector<1x128xf32>
    %108 = vector.broadcast %107 : vector<1x128xf32> to vector<8x128xf32>
    %109 = arith.addf %106, %108 : vector<8x128xf32>
    %110 = arith.addf %75, %109 : vector<8x128xf32>
    %c0_54 = arith.constant 0 : index
    %c0_55 = arith.constant 0 : index
    %111 = vector.load %arg22[%c0_54, %c0_55] : memref<1x128xf32, #tpu.memory_space<vmem>>, vector<1x128xf32>
    %c0_56 = arith.constant 0 : index
    %c0_57 = arith.constant 0 : index
    %112 = vector.load %arg23[%c0_56, %c0_57] : memref<1x128xf32, #tpu.memory_space<vmem>>, vector<1x128xf32>
    %cst_58 = arith.constant dense<0.000000e+00> : vector<8xf32>
    %113 = vector.multi_reduction <add>, %110, %cst_58 [1] : vector<8x128xf32> to vector<8xf32>
    %114 = vector.shape_cast %113 : vector<8xf32> to vector<8x1xf32>
    %cst_59 = arith.constant 1.280000e+02 : f32
    %115 = vector.broadcast %cst_59 : f32 to vector<8x1xf32>
    %116 = arith.divf %114, %115 : vector<8x1xf32>
    %117 = vector.broadcast %116 : vector<8x1xf32> to vector<8x128xf32>
    %118 = arith.subf %110, %117 : vector<8x128xf32>
    %119 = arith.mulf %118, %118 : vector<8x128xf32>
    %cst_60 = arith.constant dense<0.000000e+00> : vector<8xf32>
    %120 = vector.multi_reduction <add>, %119, %cst_60 [1] : vector<8x128xf32> to vector<8xf32>
    %121 = vector.shape_cast %120 : vector<8xf32> to vector<8x1xf32>
    %cst_61 = arith.constant 1.280000e+02 : f32
    %122 = vector.broadcast %cst_61 : f32 to vector<8x1xf32>
    %123 = arith.divf %121, %122 : vector<8x1xf32>
    %cst_62 = arith.constant 9.99999974E-6 : f32
    %124 = vector.broadcast %cst_62 : f32 to vector<8x1xf32>
    %125 = arith.addf %123, %124 : vector<8x1xf32>
    %126 = math.rsqrt %125 : vector<8x1xf32>
    %127 = vector.broadcast %126 : vector<8x1xf32> to vector<8x128xf32>
    %128 = arith.mulf %118, %127 : vector<8x128xf32>
    %129 = vector.broadcast %111 : vector<1x128xf32> to vector<8x128xf32>
    %130 = arith.mulf %129, %128 : vector<8x128xf32>
    %131 = vector.broadcast %112 : vector<1x128xf32> to vector<8x128xf32>
    %132 = arith.addf %130, %131 : vector<8x128xf32>
    %133 = arith.truncf %132 : vector<8x128xf32> to vector<8x128xbf16>
    %c0_63 = arith.constant 0 : index
    %c0_64 = arith.constant 0 : index
    %134 = vector.load %arg24[%c0_63, %c0_64] : memref<128x256xbf16, #tpu.memory_space<vmem>>, vector<128x256xbf16>
    %cst_65 = arith.constant dense<0.000000e+00> : vector<8x256xf32>
    %135 = tpu.matmul %133, %134, %cst_65 {dimension_numbers = #tpu.dot_dimension_numbers<[1], [0], [0], [1], [0, 0, 1, 1], [], []>} : vector<8x128xbf16>, vector<128x256xbf16>, vector<8x256xf32> -> vector<8x256xf32>
    %c0_66 = arith.constant 0 : index
    %c0_67 = arith.constant 0 : index
    %136 = vector.load %arg25[%c0_66, %c0_67] : memref<1x256xf32, #tpu.memory_space<vmem>>, vector<1x256xf32>
    %137 = vector.broadcast %136 : vector<1x256xf32> to vector<8x256xf32>
    %138 = arith.addf %135, %137 : vector<8x256xf32>
    %cst_68 = arith.constant 0.000000e+00 : f32
    %139 = vector.broadcast %cst_68 : f32 to vector<8x256xf32>
    %140 = arith.maximumf %138, %139 : vector<8x256xf32>
    %141 = arith.truncf %140 : vector<8x256xf32> to vector<8x256xbf16>
    %c0_69 = arith.constant 0 : index
    %c0_70 = arith.constant 0 : index
    %142 = vector.load %arg26[%c0_69, %c0_70] : memref<256x128xbf16, #tpu.memory_space<vmem>>, vector<256x128xbf16>
    %cst_71 = arith.constant dense<0.000000e+00> : vector<8x128xf32>
    %143 = tpu.matmul %141, %142, %cst_71 {dimension_numbers = #tpu.dot_dimension_numbers<[1], [0], [0], [1], [0, 0, 1, 1], [], []>} : vector<8x256xbf16>, vector<256x128xbf16>, vector<8x128xf32> -> vector<8x128xf32>
    %c0_72 = arith.constant 0 : index
    %c0_73 = arith.constant 0 : index
    %144 = vector.load %arg27[%c0_72, %c0_73] : memref<1x128xf32, #tpu.memory_space<vmem>>, vector<1x128xf32>
    %145 = vector.broadcast %144 : vector<1x128xf32> to vector<8x128xf32>
    %146 = arith.addf %143, %145 : vector<8x128xf32>
    %147 = arith.addf %132, %146 : vector<8x128xf32>
    %c0_74 = arith.constant 0 : index
    %c0_75 = arith.constant 0 : index
    %148 = vector.load %arg28[%c0_74, %c0_75] : memref<1x128xf32, #tpu.memory_space<vmem>>, vector<1x128xf32>
    %c0_76 = arith.constant 0 : index
    %c0_77 = arith.constant 0 : index
    %149 = vector.load %arg29[%c0_76, %c0_77] : memref<1x128xf32, #tpu.memory_space<vmem>>, vector<1x128xf32>
    %cst_78 = arith.constant dense<0.000000e+00> : vector<8xf32>
    %150 = vector.multi_reduction <add>, %147, %cst_78 [1] : vector<8x128xf32> to vector<8xf32>
    %151 = vector.shape_cast %150 : vector<8xf32> to vector<8x1xf32>
    %cst_79 = arith.constant 1.280000e+02 : f32
    %152 = vector.broadcast %cst_79 : f32 to vector<8x1xf32>
    %153 = arith.divf %151, %152 : vector<8x1xf32>
    %154 = vector.broadcast %153 : vector<8x1xf32> to vector<8x128xf32>
    %155 = arith.subf %147, %154 : vector<8x128xf32>
    %156 = arith.mulf %155, %155 : vector<8x128xf32>
    %cst_80 = arith.constant dense<0.000000e+00> : vector<8xf32>
    %157 = vector.multi_reduction <add>, %156, %cst_80 [1] : vector<8x128xf32> to vector<8xf32>
    %158 = vector.shape_cast %157 : vector<8xf32> to vector<8x1xf32>
    %cst_81 = arith.constant 1.280000e+02 : f32
    %159 = vector.broadcast %cst_81 : f32 to vector<8x1xf32>
    %160 = arith.divf %158, %159 : vector<8x1xf32>
    %cst_82 = arith.constant 9.99999974E-6 : f32
    %161 = vector.broadcast %cst_82 : f32 to vector<8x1xf32>
    %162 = arith.addf %160, %161 : vector<8x1xf32>
    %163 = math.rsqrt %162 : vector<8x1xf32>
    %164 = vector.broadcast %163 : vector<8x1xf32> to vector<8x128xf32>
    %165 = arith.mulf %155, %164 : vector<8x128xf32>
    %166 = vector.broadcast %148 : vector<1x128xf32> to vector<8x128xf32>
    %167 = arith.mulf %166, %165 : vector<8x128xf32>
    %168 = vector.broadcast %149 : vector<1x128xf32> to vector<8x128xf32>
    %169 = arith.addf %167, %168 : vector<8x128xf32>
    %c0_83 = arith.constant 0 : index
    %c0_84 = arith.constant 0 : index
    %c0_85 = arith.constant 0 : index
    %170 = vector.load %arg30[%c0_83, %c0_84, %c0_85] : memref<1x8x128xf32, #tpu.memory_space<vmem>>, vector<1x8x128xf32>
    %171 = vector.shape_cast %170 : vector<1x8x128xf32> to vector<8x128xf32>
    %172 = vector.shape_cast %169 : vector<8x128xf32> to vector<1x8x128xf32>
    tpu.vector_store %arg30[%c0_83, %c0_84, %c0_85], %172 {strides = array<i32>} : memref<1x8x128xf32, #tpu.memory_space<vmem>>, vector<1x8x128xf32>,
    return
  }
  func.func @transform_0(%arg0: i32, %arg1: i32) -> (i32, i32, i32) {
    %c0_i32 = arith.constant 0 : i32
    %c0_i32_0 = arith.constant 0 : i32
    %c0_i32_1 = arith.constant 0 : i32
    return %arg0, %c0_i32, %c0_i32_0 : i32, i32, i32
  }
  func.func @transform_1(%arg0: i32, %arg1: i32) -> (i32, i32, i32) {
    %c0_i32 = arith.constant 0 : i32
    %c0_i32_0 = arith.constant 0 : i32
    %c0_i32_1 = arith.constant 0 : i32
    return %arg0, %c0_i32, %c0_i32_0 : i32, i32, i32
  }
  func.func @transform_2(%arg0: i32, %arg1: i32) -> (i32, i32) {
    %c0_i32 = arith.constant 0 : i32
    %c0_i32_0 = arith.constant 0 : i32
    %c0_i32_1 = arith.constant 0 : i32
    return %c0_i32, %c0_i32_0 : i32, i32
  }
  func.func @transform_3(%arg0: i32, %arg1: i32) -> (i32, i32) {
    %c0_i32 = arith.constant 0 : i32
    %c0_i32_0 = arith.constant 0 : i32
    %c0_i32_1 = arith.constant 0 : i32
    return %c0_i32, %c0_i32_0 : i32, i32
  }
  func.func @transform_4(%arg0: i32, %arg1: i32) -> (i32, i32) {
    %c0_i32 = arith.constant 0 : i32
    %c0_i32_0 = arith.constant 0 : i32
    %c0_i32_1 = arith.constant 0 : i32
    return %c0_i32, %c0_i32_0 : i32, i32
  }
  func.func @transform_5(%arg0: i32, %arg1: i32) -> (i32, i32) {
    %c0_i32 = arith.constant 0 : i32
    %c0_i32_0 = arith.constant 0 : i32
    %c0_i32_1 = arith.constant 0 : i32
    return %c0_i32, %c0_i32_0 : i32, i32
  }
  func.func @transform_6(%arg0: i32, %arg1: i32) -> (i32, i32) {
    %c0_i32 = arith.constant 0 : i32
    %c0_i32_0 = arith.constant 0 : i32
    %c0_i32_1 = arith.constant 0 : i32
    return %c0_i32, %c0_i32_0 : i32, i32
  }
  func.func @transform_7(%arg0: i32, %arg1: i32) -> (i32, i32) {
    %c0_i32 = arith.constant 0 : i32
    %c0_i32_0 = arith.constant 0 : i32
    %c0_i32_1 = arith.constant 0 : i32
    return %c0_i32, %c0_i32_0 : i32, i32
  }
  func.func @transform_8(%arg0: i32, %arg1: i32) -> (i32, i32) {
    %c0_i32 = arith.constant 0 : i32
    %c0_i32_0 = arith.constant 0 : i32
    %c0_i32_1 = arith.constant 0 : i32
    return %c0_i32, %c0_i32_0 : i32, i32
  }
  func.func @transform_9(%arg0: i32, %arg1: i32) -> (i32, i32) {
    %c0_i32 = arith.constant 0 : i32
    %c0_i32_0 = arith.constant 0 : i32
    %c0_i32_1 = arith.constant 0 : i32
    return %c0_i32, %c0_i32_0 : i32, i32
  }
  func.func @transform_10(%arg0: i32, %arg1: i32) -> (i32, i32) {
    %c0_i32 = arith.constant 0 : i32
    %c0_i32_0 = arith.constant 0 : i32
    %c0_i32_1 = arith.constant 0 : i32
    return %c0_i32, %c0_i32_0 : i32, i32
  }
  func.func @transform_11(%arg0: i32, %arg1: i32) -> (i32, i32) {
    %c0_i32 = arith.constant 0 : i32
    %c0_i32_0 = arith.constant 0 : i32
    %c0_i32_1 = arith.constant 0 : i32
    return %c0_i32, %c0_i32_0 : i32, i32
  }
  func.func @transform_12(%arg0: i32, %arg1: i32) -> (i32, i32) {
    %c0_i32 = arith.constant 0 : i32
    %c0_i32_0 = arith.constant 0 : i32
    %c0_i32_1 = arith.constant 0 : i32
    return %c0_i32, %c0_i32_0 : i32, i32
  }
  func.func @transform_13(%arg0: i32, %arg1: i32) -> (i32, i32) {
    %c0_i32 = arith.constant 0 : i32
    %c0_i32_0 = arith.constant 0 : i32
    %c0_i32_1 = arith.constant 0 : i32
    return %c0_i32, %c0_i32_0 : i32, i32
  }
  func.func @transform_14(%arg0: i32, %arg1: i32) -> (i32, i32) {
    %c0_i32 = arith.constant 0 : i32
    %c0_i32_0 = arith.constant 0 : i32
    %c0_i32_1 = arith.constant 0 : i32
    return %c0_i32, %c0_i32_0 : i32, i32
  }
  func.func @transform_15(%arg0: i32, %arg1: i32) -> (i32, i32) {
    %c0_i32 = arith.constant 0 : i32
    %c0_i32_0 = arith.constant 0 : i32
    %c0_i32_1 = arith.constant 0 : i32
    return %c0_i32, %c0_i32_0 : i32, i32
  }
  func.func @transform_16(%arg0: i32, %arg1: i32) -> (i32, i32) {
    %c0_i32 = arith.constant 0 : i32
    %c0_i32_0 = arith.constant 0 : i32
    %c0_i32_1 = arith.constant 0 : i32
    return %c0_i32, %c0_i32_0 : i32, i32
  }
  func.func @transform_17(%arg0: i32, %arg1: i32) -> (i32, i32) {
    %c0_i32 = arith.constant 0 : i32
    %c0_i32_0 = arith.constant 0 : i32
    %c0_i32_1 = arith.constant 0 : i32
    return %c0_i32, %c0_i32_0 : i32, i32
  }
  func.func @transform_18(%arg0: i32, %arg1: i32) -> (i32, i32) {
    %c0_i32 = arith.constant 0 : i32
    %c0_i32_0 = arith.constant 0 : i32
    %c0_i32_1 = arith.constant 0 : i32
    return %c0_i32, %c0_i32_0 : i32, i32
  }
  func.func @transform_19(%arg0: i32, %arg1: i32) -> (i32, i32) {
    %c0_i32 = arith.constant 0 : i32
    %c0_i32_0 = arith.constant 0 : i32
    %c0_i32_1 = arith.constant 0 : i32
    return %c0_i32, %c0_i32_0 : i32, i32
  }
  func.func @transform_20(%arg0: i32, %arg1: i32) -> (i32, i32) {
    %c0_i32 = arith.constant 0 : i32
    %c0_i32_0 = arith.constant 0 : i32
    %c0_i32_1 = arith.constant 0 : i32
    return %c0_i32, %c0_i32_0 : i32, i32
  }
  func.func @transform_21(%arg0: i32, %arg1: i32) -> (i32, i32) {
    %c0_i32 = arith.constant 0 : i32
    %c0_i32_0 = arith.constant 0 : i32
    %c0_i32_1 = arith.constant 0 : i32
    return %c0_i32, %c0_i32_0 : i32, i32
  }
  func.func @transform_22(%arg0: i32, %arg1: i32) -> (i32, i32) {
    %c0_i32 = arith.constant 0 : i32
    %c0_i32_0 = arith.constant 0 : i32
    %c0_i32_1 = arith.constant 0 : i32
    return %c0_i32, %c0_i32_0 : i32, i32
  }
  func.func @transform_23(%arg0: i32, %arg1: i32) -> (i32, i32) {
    %c0_i32 = arith.constant 0 : i32
    %c0_i32_0 = arith.constant 0 : i32
    %c0_i32_1 = arith.constant 0 : i32
    return %c0_i32, %c0_i32_0 : i32, i32
  }
  func.func @transform_24(%arg0: i32, %arg1: i32) -> (i32, i32) {
    %c0_i32 = arith.constant 0 : i32
    %c0_i32_0 = arith.constant 0 : i32
    %c0_i32_1 = arith.constant 0 : i32
    return %c0_i32, %c0_i32_0 : i32, i32
  }
  func.func @transform_25(%arg0: i32, %arg1: i32) -> (i32, i32) {
    %c0_i32 = arith.constant 0 : i32
    %c0_i32_0 = arith.constant 0 : i32
    %c0_i32_1 = arith.constant 0 : i32
    return %c0_i32, %c0_i32_0 : i32, i32
  }
  func.func @transform_26(%arg0: i32, %arg1: i32) -> (i32, i32) {
    %c0_i32 = arith.constant 0 : i32
    %c0_i32_0 = arith.constant 0 : i32
    %c0_i32_1 = arith.constant 0 : i32
    return %c0_i32, %c0_i32_0 : i32, i32
  }
  func.func @transform_27(%arg0: i32, %arg1: i32) -> (i32, i32) {
    %c0_i32 = arith.constant 0 : i32
    %c0_i32_0 = arith.constant 0 : i32
    %c0_i32_1 = arith.constant 0 : i32
    return %c0_i32, %c0_i32_0 : i32, i32
  }
  func.func @transform_28(%arg0: i32, %arg1: i32) -> (i32, i32, i32) {
    %c0_i32 = arith.constant 0 : i32
    %c0_i32_0 = arith.constant 0 : i32
    return %arg0, %arg1, %c0_i32 : i32, i32, i32
  }
}

</mosaic_0001>

<bundles_post_ra>
// kernel: tpu_custom_call.1
= control target key start
LH: loop header
LB: loop body
LE: loop exit
PB: predicated region body
PF: predicated region fallthrough
CT: control target
= control target key end

     0   :  { %s7662_s0 = inlined_call_operand.hbm [shape: bf16[2,8,128], index: 0, kind: input, shape index: {}]   ;;  %s7663_s1 = inlined_call_operand.hbm [shape: f32[2,8,128], index: 1, kind: input, shape index: {}]   ;;  %s7664_s2 = inlined_call_operand.hbm [shape: bf16[128,128], index: 2, kind: input, shape index: {}]   ;;  %s7665_s3 = inlined_call_operand.vmem [shape: f32[1,128], index: 3, kind: input, shape index: {}]   ;;  %s7666_s4 = inlined_call_operand.hbm [shape: bf16[128,128], index: 4, kind: input, shape index: {}]   ;;  %s7667_s5 = inlined_call_operand.vmem [shape: f32[1,128], index: 5, kind: input, shape index: {}]   ;;  %s7668_s6 = inlined_call_operand.hbm [shape: bf16[128,128], index: 6, kind: input, shape index: {}]   ;;  %s7669_s7 = inlined_call_operand.hbm [shape: f32[1,128], index: 7, kind: input, shape index: {}]   ;;  %s7670_s8 = inlined_call_operand.hbm [shape: bf16[128,128], index: 8, kind: input, shape index: {}]   ;;  %s7671_s9 = inlined_call_operand.hbm [shape: f32[1,128], index: 9, kind: input, shape index: {}]   ;;  %s7672_s10 = inlined_call_operand.hbm [shape: f32[1,128], index: 10, kind: input, shape index: {}]   ;;  %s7673_s11 = inlined_call_operand.hbm [shape: f32[1,128], index: 11, kind: input, shape index: {}]   ;;  %s7674_s12 = inlined_call_operand.hbm [shape: bf16[128,128], index: 12, kind: input, shape index: {}]   ;;  %s7675_s13 = inlined_call_operand.hbm [shape: f32[1,128], index: 13, kind: input, shape index: {}]   ;;  %s7676_s14 = inlined_call_operand.hbm [shape: bf16[128,128], index: 14, kind: input, shape index: {}]   ;;  %s7677_s15 = inlined_call_operand.hbm [shape: f32[1,128], index: 15, kind: input, shape index: {}]   ;;  %s7678_s16 = inlined_call_operand.hbm [shape: bf16[128,128], index: 16, kind: input, shape index: {}]   ;;  %s7679_s17 = inlined_call_operand.hbm [shape: f32[1,128], index: 17, kind: input, shape index: {}]   ;;  %s7680_s18 = inlined_call_operand.vmem [shape: bf16[128,128], index: 18, kind: input, shape index: {}]   ;;  %s7681_s19 = inlined_call_operand.vmem [shape: f32[1,128], index: 19, kind: input, shape index: {}]   ;;  %s7682_s20 = inlined_call_operand.vmem [shape: f32[1,128], index: 20, kind: input, shape index: {}]   ;;  %s7683_s21 = inlined_call_operand.vmem [shape: f32[1,128], index: 21, kind: input, shape index: {}]   ;;  %s7684_s22 = inlined_call_operand.hbm [shape: bf16[128,256], index: 22, kind: input, shape index: {}]   ;;  %s7685_s23 = inlined_call_operand.vmem [shape: f32[1,256], index: 23, kind: input, shape index: {}]   ;;  %s7686_s24 = inlined_call_operand.hbm [shape: bf16[256,128], index: 24, kind: input, shape index: {}]   ;;  %s7687_s25 = inlined_call_operand.vmem [shape: f32[1,128], index: 25, kind: input, shape index: {}]   ;;  %s7688_s26 = inlined_call_operand.vmem [shape: f32[1,128], index: 26, kind: input, shape index: {}]   ;;  %s7689_s27 = inlined_call_operand.vmem [shape: f32[1,128], index: 27, kind: input, shape index: {}]   ;;  %s7690_s28 = inlined_call_operand.hbm [shape: f32[2,8,128], index: 28, kind: output, shape index: {}]  }
   0x1   :  { %7721 = sst [smem:[#allocation50_spill]] %s7662_s0 }
   0x2   :  { %7722 = sst [smem:[#allocation51_spill]] %s7663_s1 }
   0x3   :  { %7723 = sst [smem:[#allocation52_spill]] %s7664_s2 }
   0x4   :  { %7724 = sst [smem:[#allocation53_spill]] %s7665_s3 }
   0x5   :  { %7725 = sst [smem:[#allocation54_spill]] %s7666_s4 }
   0x6   :  { %7726 = sst [smem:[#allocation55_spill]] %s7667_s5 }
   0x7   :  { %7727 = sst [smem:[#allocation56_spill]] %s7668_s6 }
   0x8   :  { %7728 = sst [smem:[#allocation57_spill]] %s7669_s7 }
   0x9   :  { %7729 = sst [smem:[#allocation58_spill]] %s7670_s8 }
   0xa   :  { %7730 = sst [smem:[#allocation59_spill]] %s7671_s9 }
   0xb   :  { %7731 = sst [smem:[#allocation60_spill]] %s7672_s10 }
   0xc   :  { %7732 = sst [smem:[#allocation61_spill]] %s7673_s11 }
   0xd   :  { %7733 = sst [smem:[#allocation62_spill]] %s7674_s12 }
   0xe   :  { %7734 = sst [smem:[#allocation63_spill]] %s7675_s13 }
   0xf   :  { %7735 = sst [smem:[#allocation64_spill]] %s7676_s14 }
  0x10   :  { %7736 = sst [smem:[#allocation65_spill]] %s7677_s15 }
  0x11   :  { %7737 = sst [smem:[#allocation66_spill]] %s7678_s16 }
  0x12   :  { %7738 = sst [smem:[#allocation67_spill]] %s7679_s17 }
  0x13   :  { %7739 = sst [smem:[#allocation68_spill]] %s7680_s18 }
  0x14   :  { %7740 = sst [smem:[#allocation69_spill]] %s7681_s19 }
  0x15   :  { %7741 = sst [smem:[#allocation70_spill]] %s7682_s20 }
  0x16   :  { %7742 = sst [smem:[#allocation71_spill]] %s7683_s21 }
  0x17   :  { %7743 = sst [smem:[#allocation72_spill]] %s7685_s23 }
  0x18   :  { %7744 = sst [smem:[#allocation73_spill]] %s7687_s25 }
  0x19   :  { %7745 = sst [smem:[#allocation74_spill]] %s7688_s26 }
  0x1a   :  { %7746 = sst [smem:[#allocation75_spill]] %s7689_s27 }
  0x1b   :  { %7747 = sst [smem:[#allocation76_spill]] %s7690_s28 }
  0x1c   :  { %33 = vsyncpa [#allocation7], 0 }
  0x1d   :  { %35 = vsyncpa [#allocation7 + $0x1], 0 }
  0x1e   :  { %36 = vsyncpa [#allocation10], 0 }
  0x1f   :  { %38 = vsyncpa [#allocation10 + $0x1], 0 }
  0x20   :  { %39 = vsyncpa [#allocation13], 0 }
  0x21   :  { %40 = vsyncpa [#allocation16], 0 }
  0x22   :  { %41 = vsyncpa [#allocation19], 0 }
  0x23   :  { %42 = vsyncpa [#allocation22], 0 }
  0x24   :  { %43 = vsyncpa [#allocation25], 0 }
  0x25   :  { %44 = vsyncpa [#allocation28], 0 }
  0x26   :  { %45 = vsyncpa [#allocation31], 0 }
  0x27   :  { %46 = vsyncpa [#allocation34], 0 }
  0x28   :  { %47 = vsyncpa [#allocation8], 0 }
  0x29   :  { %49 = vsyncpa [#allocation8 + $0x1], 0  ;;  %s6577_s8 = smov 0   ;;  %s6579_s5 = smov 0  }
  0x2a   :  { %s6581_s9 = smov 0   ;;  %s6583_s30 = smov 0  }
  0x2b   :  { %s6585_s3 = smov 0   ;;  %s6587_s6 = smov 0  }
  0x2c LB: > { %7748 = sst [smem:[#allocation48_spill]] %s6390_s30  ;;  %s6608_s10 = sadd.s32 4294967295, %s6398_s6   ;;  %s6398_s6 = sphi %s6587_s6, %s55_s6   ;;  %s6394_s3 = sphi %s6585_s3, %s7819_s3   ;;  %s6390_s30 = sphi %s6583_s30, %s7818_s30   ;;  %s6386_s9 = sphi %s6581_s9, %s7817_s9   ;;  %s6382_s5 = sphi %s6579_s5, %s7816_s5   ;;  %s6378_s8 = sphi %s6577_s8, %s7815_s8  }
  0x2d   : > { %p4813_p0 = scmp.ge.s32.totalorder %s6398_s6, 1  ;;  %p7706_p1 = scmp.eq.s32.totalorder %s6608_s10, 0 }
  0x2e   : > { %p698_p2 = scmp.lt.s32.totalorder %s6398_s6, 3  ;;  %s6400_s11 = smov [#allocation11]  }
  0x2f   : > { %s710_s29 = sshll.u32 %s6400_s11, 4  ;;  %s6401_s7 = smov [#allocation12]   ;;  %s6617_s29 = int_to_ptr.vmem [resolvable:$true] %s710_s29 }
  0x30   : > { %p6613_p3 = pnand %p4813_p0, %p698_p2  ;;  %s726_s12 = sshll.u32 %s6401_s7, 4  ;;  %s6628_s12 = int_to_ptr.vmem [resolvable:$true] %s726_s12 }
  0x31   : > { %s6402_s1 = smov [#allocation15]   ;;  %s7752_s27 = sld [smem:[#allocation52_spill]] }
  0x32   : > { %s7749_s0 = scalar_select %p6613_p3, 1, 0 }
  0x33   : > { %p5454_p4 = pneg %p6613_p3  ;;  %s6630_s4 = sshll.u32 %s6402_s1, 4  ;;  %s757_s4 = int_to_ptr.vmem [resolvable:$true] %s6630_s4 }
  0x34   : > { %7750 = sst [smem:[#allocation49_spill]] %s7749_s0 }
  0x35   : > { %p6624_p6 = pnand %p5454_p4, %p7706_p1 }
  0x37   : > { %s5768_s26 = scalar_lea.hbm %s7752_s27, 1024  ;;  %p6640_p8 = pneg %p6624_p6 }
  0x38   : > { %p5769_p7 = scmp.ne.s32.totalorder %s7752_s27, %s5768_s26  ;;  %p5775_p11 = scmp.lt.u32.totalorder %s5768_s26, %s7752_s27 }
  0x3a   : > { %p5771_p9 = pnand %p6640_p8, %p5769_p7 }
  0x3c   : > { %p5772_p10 = pneg %p5771_p9 }
  0x3e   : > { %p5777_p12 = pnand %p5775_p11, %p5772_p10 }
  0x40   : > { %5780 = shalt.err (!%p5777_p12)
}
  0x41   : > { %s5781_s25 = scalar_lea.vmem %s6617_s29, 1024  ;;  %p5789_p4 = scmp.lt.s32.totalorder %s6617_s29, %s6617_s29 }
  0x42   : > { %p5782_p13 = scmp.ne.s32.totalorder %s6617_s29, %s5781_s25  ;;  %p5790_p5 = scmp.lt.s32.totalorder %s5781_s25, %s5781_s25 }
  0x44   : > { %p5784_p0 = pnand %p5782_p13, %p6640_p8  ;;  %p5791_p7 = por %p5790_p5, %p5789_p4 }
  0x46   : > { %p5785_p2 = pneg %p5784_p0 }
  0x48   : > { %p5792_p9 = pnand %p5791_p7, %p5785_p2 }
  0x4a   : > { %5795 = shalt.err (!%p5792_p9)
}
  0x4b   : > { %s7708_s28 = smov 64   ;;  %s7710_s26 = smov 4  }
  0x4c   : > { %5457 = dma.hbm_to_vmem [thread:$0]  (!%p6624_p6), %s7752_s27, 1024, %s6617_s29, [#allocation10], %s7708_s28, %s7708_s28, %s7710_s26  }
  0x4d   : > { %s7754_s21 = sld [smem:[#allocation54_spill]] }
  0x53   : > { %s5796_s25 = scalar_lea.hbm %s7754_s21, 1024 }
  0x54   : > { %p5797_p5 = scmp.ne.s32.totalorder %s7754_s21, %s5796_s25  ;;  %p5803_p12 = scmp.lt.u32.totalorder %s5796_s25, %s7754_s21 }
  0x56   : > { %p5799_p10 = pnand %p5797_p5, %p6640_p8 }
  0x58   : > { %p5800_p11 = pneg %p5799_p10 }
  0x5a   : > { %p5805_p13 = pnand %p5803_p12, %p5800_p11 }
  0x5c   : > { %5808 = shalt.err (!%p5805_p13)
}
  0x5d   : > { %s5809_s29 = scalar_lea.vmem %s6628_s12, 1024  ;;  %p5817_p7 = scmp.lt.s32.totalorder %s6628_s12, %s6628_s12 }
  0x5e   : > { %p5810_p0 = scmp.ne.s32.totalorder %s6628_s12, %s5809_s29  ;;  %p5818_p9 = scmp.lt.s32.totalorder %s5809_s29, %s5809_s29 }
  0x60   : > { %p5812_p2 = pnand %p5810_p0, %p6640_p8  ;;  %p5819_p5 = por %p5818_p9, %p5817_p7 }
  0x62   : > { %p5813_p4 = pneg %p5812_p2 }
  0x64   : > { %p5820_p10 = pnand %p5819_p5, %p5813_p4 }
  0x66   : > { %5823 = shalt.err (!%p5820_p10)
}
  0x67   : > { %5460 = dma.hbm_to_vmem [thread:$0]  (!%p6624_p6), %s7754_s21, 1024, %s6628_s12, [#allocation13], %s7708_s28, %s7708_s28, %s7710_s26  }
  0x68   : > { %s7755_s30 = sld [smem:[#allocation57_spill]] }
  0x6e   : > { %s7756_s11 = smov %s7755_s30  ;;  %s5824_s7 = scalar_lea.hbm %s7755_s30, 16 }
  0x6f   : > { %p5825_p11 = scmp.ne.s32.totalorder %s7756_s11, %s5824_s7  ;;  %p5831_p0 = scmp.lt.u32.totalorder %s5824_s7, %s7756_s11 }
  0x71   : > { %p5827_p12 = pnand %p5825_p11, %p6640_p8 }
  0x73   : > { %p5828_p13 = pneg %p5827_p12 }
  0x75   : > { %p5833_p2 = pnand %p5831_p0, %p5828_p13 }
  0x77   : > { %5836 = shalt.err (!%p5833_p2)
}
  0x78   : > { %s5837_s18 = scalar_lea.vmem %s757_s4, 16  ;;  %s5844_s12 = scalar_lea.vmem %s757_s4, 32 }
  0x79   : > { %p5838_p4 = scmp.ne.s32.totalorder %s757_s4, %s5837_s18  ;;  %p5845_p5 = scmp.lt.s32.totalorder %s757_s4, %s757_s4 }
  0x7a   : > { %p5846_p10 = scmp.lt.s32.totalorder %s5844_s12, %s5837_s18 }
  0x7b   : > { %p5840_p7 = pnand %p5838_p4, %p6640_p8 }
  0x7c   : > { %p5847_p1 = por %p5846_p10, %p5845_p5 }
  0x7d   : > { %p5841_p9 = pneg %p5840_p7 }
  0x7f   : > { %p5848_p3 = pnand %p5847_p1, %p5841_p9 }
  0x81   : > { %5851 = shalt.err (!%p5848_p3)
}
  0x82   : > { %5466 = dma.hbm_to_vmem [thread:$0]  (!%p6624_p6), %s7756_s11, 16, %s757_s4, [#allocation16]  }
  0x83   : > { %s6405_s27 = smov [#allocation18]   ;;  %s6406_s30 = smov [#allocation21]  }
  0x84   : > { %s780_s0 = sshll.u32 %s6405_s27, 4  ;;  %s802_s7 = sshll.u32 %s6406_s30, 4  ;;  %s781_s0 = int_to_ptr.vmem [resolvable:$true] %s780_s0  ;;  %s803_s7 = int_to_ptr.vmem [resolvable:$true] %s802_s7 }
  0x85   : > { %s7757_s29 = sld [smem:[#allocation59_spill]] }
  0x8b   : > { %s5852_s28 = scalar_lea.hbm %s7757_s29, 16 }
  0x8c   : > { %p5853_p1 = scmp.ne.s32.totalorder %s7757_s29, %s5852_s28  ;;  %p5859_p12 = scmp.lt.u32.totalorder %s5852_s28, %s7757_s29 }
  0x8e   : > { %p5855_p3 = pnand %p5853_p1, %p6640_p8 }
  0x90   : > { %p5856_p11 = pneg %p5855_p3 }
  0x92   : > { %p5861_p13 = pnand %p5859_p12, %p5856_p11 }
  0x94   : > { %5864 = shalt.err (!%p5861_p13)
}
  0x95   : > { %s5865_s4 = scalar_lea.vmem %s781_s0, 16  ;;  %s5872_s20 = scalar_lea.vmem %s781_s0, 32 }
  0x96   : > { %p5866_p0 = scmp.ne.s32.totalorder %s781_s0, %s5865_s4  ;;  %p5873_p7 = scmp.lt.s32.totalorder %s781_s0, %s781_s0 }
  0x97   : > { %p5874_p9 = scmp.lt.s32.totalorder %s5872_s20, %s5865_s4 }
  0x98   : > { %p5868_p2 = pnand %p5866_p0, %p6640_p8 }
  0x99   : > { %p5875_p5 = por %p5874_p9, %p5873_p7 }
  0x9a   : > { %p5869_p4 = pneg %p5868_p2 }
  0x9c   : > { %p5876_p10 = pnand %p5875_p5, %p5869_p4 }
  0x9e   : > { %5879 = shalt.err (!%p5876_p10)
}
  0x9f   : > { %5472 = dma.hbm_to_vmem [thread:$0]  (!%p6624_p6), %s7757_s29, 16, %s781_s0, [#allocation19]  }
  0xa0   : > { %s7758_s1 = sld [smem:[#allocation61_spill]] }
  0xa6   : > { %s5880_s25 = scalar_lea.hbm %s7758_s1, 16 }
  0xa7   : > { %p5881_p1 = scmp.ne.s32.totalorder %s7758_s1, %s5880_s25  ;;  %p5887_p12 = scmp.lt.u32.totalorder %s5880_s25, %s7758_s1 }
  0xa9   : > { %p5883_p3 = pnand %p5881_p1, %p6640_p8 }
  0xab   : > { %p5884_p11 = pneg %p5883_p3 }
  0xad   : > { %p5889_p13 = pnand %p5887_p12, %p5884_p11 }
  0xaf   : > { %5892 = shalt.err (!%p5889_p13)
}
  0xb0   : > { %s5893_s20 = scalar_lea.vmem %s803_s7, 16  ;;  %s5900_s0 = scalar_lea.vmem %s803_s7, 32 }
  0xb1   : > { %p5894_p0 = scmp.ne.s32.totalorder %s803_s7, %s5893_s20  ;;  %p5901_p7 = scmp.lt.s32.totalorder %s803_s7, %s803_s7 }
  0xb2   : > { %p5902_p9 = scmp.lt.s32.totalorder %s5900_s0, %s5893_s20 }
  0xb3   : > { %p5896_p2 = pnand %p5894_p0, %p6640_p8 }
  0xb4   : > { %p5903_p5 = por %p5902_p9, %p5901_p7 }
  0xb5   : > { %p5897_p4 = pneg %p5896_p2 }
  0xb7   : > { %p5904_p10 = pnand %p5903_p5, %p5897_p4 }
  0xb9   : > { %5907 = shalt.err (!%p5904_p10)
}
  0xba   : > { %5478 = dma.hbm_to_vmem [thread:$0]  (!%p6624_p6), %s7758_s1, 16, %s803_s7, [#allocation22]  }
  0xbb   : > { %s6407_s28 = smov [#allocation24]   ;;  %s6408_s25 = smov [#allocation27]  }
  0xbc   : > { %s826_s26 = sshll.u32 %s6407_s28, 4  ;;  %s850_s18 = sshll.u32 %s6408_s25, 4  ;;  %s827_s26 = int_to_ptr.vmem [resolvable:$true] %s826_s26  ;;  %s851_s18 = int_to_ptr.vmem [resolvable:$true] %s850_s18 }
  0xbd   : > { %s7759_s13 = sld [smem:[#allocation63_spill]] }
  0xc3   : > { %s5908_s4 = scalar_lea.hbm %s7759_s13, 16 }
  0xc4   : > { %p5909_p1 = scmp.ne.s32.totalorder %s7759_s13, %s5908_s4  ;;  %p5915_p12 = scmp.lt.u32.totalorder %s5908_s4, %s7759_s13 }
  0xc6   : > { %p5911_p3 = pnand %p5909_p1, %p6640_p8 }
  0xc8   : > { %p5912_p11 = pneg %p5911_p3 }
  0xca   : > { %p5917_p13 = pnand %p5915_p12, %p5912_p11 }
  0xcc   : > { %5920 = shalt.err (!%p5917_p13)
}
  0xcd   : > { %s5921_s7 = scalar_lea.vmem %s827_s26, 16  ;;  %s5928_s30 = scalar_lea.vmem %s827_s26, 32 }
  0xce   : > { %p5922_p0 = scmp.ne.s32.totalorder %s827_s26, %s5921_s7  ;;  %p5929_p7 = scmp.lt.s32.totalorder %s827_s26, %s827_s26 }
  0xcf   : > { %p5930_p9 = scmp.lt.s32.totalorder %s5928_s30, %s5921_s7 }
  0xd0   : > { %p5924_p2 = pnand %p5922_p0, %p6640_p8 }
  0xd1   : > { %p5931_p5 = por %p5930_p9, %p5929_p7 }
  0xd2   : > { %p5925_p4 = pneg %p5924_p2 }
  0xd4   : > { %p5932_p10 = pnand %p5931_p5, %p5925_p4 }
  0xd6   : > { %5935 = shalt.err (!%p5932_p10)
}
  0xd7   : > { %5484 = dma.hbm_to_vmem [thread:$0]  (!%p6624_p6), %s7759_s13, 16, %s827_s26, [#allocation25]  }
  0xd8   : > { %s7760_s15 = sld [smem:[#allocation65_spill]] }
  0xde   : > { %s5936_s19 = scalar_lea.hbm %s7760_s15, 16 }
  0xdf   : > { %p5937_p1 = scmp.ne.s32.totalorder %s7760_s15, %s5936_s19  ;;  %p5943_p12 = scmp.lt.u32.totalorder %s5936_s19, %s7760_s15 }
  0xe1   : > { %p5939_p3 = pnand %p5937_p1, %p6640_p8 }
  0xe3   : > { %p5940_p11 = pneg %p5939_p3 }
  0xe5   : > { %p5945_p13 = pnand %p5943_p12, %p5940_p11 }
  0xe7   : > { %5948 = shalt.err (!%p5945_p13)
}
  0xe8   : > { %s5949_s7 = scalar_lea.vmem %s851_s18, 16  ;;  %s5956_s26 = scalar_lea.vmem %s851_s18, 32 }
  0xe9   : > { %p5950_p0 = scmp.ne.s32.totalorder %s851_s18, %s5949_s7  ;;  %p5957_p7 = scmp.lt.s32.totalorder %s851_s18, %s851_s18 }
  0xea   : > { %p5958_p9 = scmp.lt.s32.totalorder %s5956_s26, %s5949_s7 }
  0xeb   : > { %p5952_p2 = pnand %p5950_p0, %p6640_p8 }
  0xec   : > { %p5959_p5 = por %p5958_p9, %p5957_p7 }
  0xed   : > { %p5953_p4 = pneg %p5952_p2 }
  0xef   : > { %p5960_p10 = pnand %p5959_p5, %p5953_p4 }
  0xf1   : > { %5963 = shalt.err (!%p5960_p10)
}
  0xf2   : > { %5490 = dma.hbm_to_vmem [thread:$0]  (!%p6624_p6), %s7760_s15, 16, %s851_s18, [#allocation28]  }
  0xf3   : > { %s6409_s25 = smov [#allocation30]   ;;  %s6410_s12 = smov [#allocation14]  }
  0xf4   : > { %s874_s11 = sshll.u32 %s6409_s25, 4  ;;  %s742_s19 = sshll.u32 %s6410_s12, 4  ;;  %s875_s11 = int_to_ptr.vmem [resolvable:$true] %s874_s11  ;;  %s743_s19 = int_to_ptr.vmem [resolvable:$true] %s742_s19 }
  0xf5   : > { %s7761_s17 = sld [smem:[#allocation67_spill]] }
  0xfb   : > { %s5964_s0 = scalar_lea.hbm %s7761_s17, 16 }
  0xfc   : > { %p5965_p1 = scmp.ne.s32.totalorder %s7761_s17, %s5964_s0  ;;  %p5971_p12 = scmp.lt.u32.totalorder %s5964_s0, %s7761_s17 }
  0xfe   : > { %p5967_p3 = pnand %p5965_p1, %p6640_p8 }
 0x100   : > { %p5968_p11 = pneg %p5967_p3 }
 0x102   : > { %p5973_p13 = pnand %p5971_p12, %p5968_p11 }
 0x104   : > { %5976 = shalt.err (!%p5973_p13)
}
 0x105   : > { %s5977_s18 = scalar_lea.vmem %s875_s11, 16  ;;  %s5984_s28 = scalar_lea.vmem %s875_s11, 32 }
 0x106   : > { %p5978_p0 = scmp.ne.s32.totalorder %s875_s11, %s5977_s18  ;;  %p5985_p7 = scmp.lt.s32.totalorder %s875_s11, %s875_s11 }
 0x107   : > { %p5986_p9 = scmp.lt.s32.totalorder %s5984_s28, %s5977_s18 }
 0x108   : > { %p5980_p2 = pnand %p5978_p0, %p6640_p8 }
 0x109   : > { %p5987_p5 = por %p5986_p9, %p5985_p7 }
 0x10a   : > { %p5981_p4 = pneg %p5980_p2 }
 0x10c   : > { %p5988_p10 = pnand %p5987_p5, %p5981_p4 }
 0x10e   : > { %5991 = shalt.err (!%p5988_p10)
}
 0x10f   : > { %5496 = dma.hbm_to_vmem [thread:$0]  (!%p6624_p6), %s7761_s17, 16, %s875_s11, [#allocation31]  }
 0x110   : > { %s7762_s0 = sld [smem:[#allocation56_spill]] }
 0x116   : > { %s5992_s27 = scalar_lea.hbm %s7762_s0, 1024 }
 0x117   : > { %p5993_p1 = scmp.ne.s32.totalorder %s7762_s0, %s5992_s27  ;;  %p5999_p12 = scmp.lt.u32.totalorder %s5992_s27, %s7762_s0 }
 0x119   : > { %p5995_p3 = pnand %p5993_p1, %p6640_p8 }
 0x11b   : > { %p5996_p11 = pneg %p5995_p3 }
 0x11d   : > { %p6001_p13 = pnand %p5999_p12, %p5996_p11 }
 0x11f   : > { %6004 = shalt.err (!%p6001_p13)
}
 0x120   : > { %s6005_s28 = scalar_lea.vmem %s743_s19, 1024  ;;  %p6013_p7 = scmp.lt.s32.totalorder %s743_s19, %s743_s19 }
 0x121   : > { %p6006_p0 = scmp.ne.s32.totalorder %s743_s19, %s6005_s28  ;;  %p6014_p9 = scmp.lt.s32.totalorder %s6005_s28, %s6005_s28 }
 0x123   : > { %p6008_p2 = pnand %p6006_p0, %p6640_p8  ;;  %p6015_p5 = por %p6014_p9, %p6013_p7 }
 0x125   : > { %p6009_p4 = pneg %p6008_p2 }
 0x127   : > { %p6016_p10 = pnand %p6015_p5, %p6009_p4 }
 0x129   : > { %6019 = shalt.err (!%p6016_p10)
}
 0x12a   : > { %s7763_s11 = smov 4   ;;  %s7764_s25 = smov 64  }
 0x12b   : > { %5463 = dma.hbm_to_vmem [thread:$0]  (!%p6624_p6), %s7762_s0, 1024, %s743_s19, [#allocation13], %s7764_s25, %s7764_s25, %s7763_s11  }
 0x12c   : > { %s6411_s20 = smov [#allocation17]   ;;  %s6412_s7 = smov [#allocation20]  }
 0x12d   : > { %s766_s27 = sshll.u32 %s6411_s20, 4  ;;  %s791_s26 = sshll.u32 %s6412_s7, 4  ;;  %s767_s27 = int_to_ptr.vmem [resolvable:$true] %s766_s27  ;;  %s792_s26 = int_to_ptr.vmem [resolvable:$true] %s791_s26 }
 0x12e   : > { %s7765_s28 = sld [smem:[#allocation58_spill]] }
 0x134   : > { %s6020_s1 = scalar_lea.hbm %s7765_s28, 1024 }
 0x135   : > { %p6021_p1 = scmp.ne.s32.totalorder %s7765_s28, %s6020_s1  ;;  %p6027_p12 = scmp.lt.u32.totalorder %s6020_s1, %s7765_s28 }
 0x137   : > { %p6023_p3 = pnand %p6021_p1, %p6640_p8 }
 0x139   : > { %p6024_p11 = pneg %p6023_p3 }
 0x13b   : > { %p6029_p13 = pnand %p6027_p12, %p6024_p11 }
 0x13d   : > { %6032 = shalt.err (!%p6029_p13)
}
 0x13e   : > { %s6033_s19 = scalar_lea.vmem %s767_s27, 1024  ;;  %p6041_p7 = scmp.lt.s32.totalorder %s767_s27, %s767_s27 }
 0x13f   : > { %p6034_p0 = scmp.ne.s32.totalorder %s767_s27, %s6033_s19  ;;  %p6042_p9 = scmp.lt.s32.totalorder %s6033_s19, %s6033_s19 }
 0x141   : > { %p6036_p2 = pnand %p6034_p0, %p6640_p8  ;;  %p6043_p5 = por %p6042_p9, %p6041_p7 }
 0x143   : > { %p6037_p4 = pneg %p6036_p2 }
 0x145   : > { %p6044_p10 = pnand %p6043_p5, %p6037_p4 }
 0x147   : > { %6047 = shalt.err (!%p6044_p10)
}
 0x148   : > { %5469 = dma.hbm_to_vmem [thread:$0]  (!%p6624_p6), %s7765_s28, 1024, %s767_s27, [#allocation16], %s7764_s25, %s7764_s25, %s7763_s11  }
 0x149   : > { %s7766_s4 = sld [smem:[#allocation60_spill]] }
 0x14f   : > { %s6048_s20 = scalar_lea.hbm %s7766_s4, 16 }
 0x150   : > { %p6049_p1 = scmp.ne.s32.totalorder %s7766_s4, %s6048_s20  ;;  %p6055_p12 = scmp.lt.u32.totalorder %s6048_s20, %s7766_s4 }
 0x152   : > { %p6051_p3 = pnand %p6049_p1, %p6640_p8 }
 0x154   : > { %p6052_p11 = pneg %p6051_p3 }
 0x156   : > { %p6057_p13 = pnand %p6055_p12, %p6052_p11 }
 0x158   : > { %6060 = shalt.err (!%p6057_p13)
}
 0x159   : > { %s6061_s19 = scalar_lea.vmem %s792_s26, 16  ;;  %s6068_s27 = scalar_lea.vmem %s792_s26, 32 }
 0x15a   : > { %p6062_p0 = scmp.ne.s32.totalorder %s792_s26, %s6061_s19  ;;  %p6069_p7 = scmp.lt.s32.totalorder %s792_s26, %s792_s26 }
 0x15b   : > { %p6070_p9 = scmp.lt.s32.totalorder %s6068_s27, %s6061_s19 }
 0x15c   : > { %p6064_p2 = pnand %p6062_p0, %p6640_p8 }
 0x15d   : > { %p6071_p5 = por %p6070_p9, %p6069_p7 }
 0x15e   : > { %p6065_p4 = pneg %p6064_p2 }
 0x160   : > { %p6072_p10 = pnand %p6071_p5, %p6065_p4 }
 0x162   : > { %6075 = shalt.err (!%p6072_p10)
}
 0x163   : > { %5475 = dma.hbm_to_vmem [thread:$0]  (!%p6624_p6), %s7766_s4, 16, %s792_s26, [#allocation19]  }
 0x164   : > { %s6413_s17 = smov [#allocation23]   ;;  %s6414_s20 = smov [#allocation26]  }
 0x165   : > { %s812_s1 = sshll.u32 %s6413_s17, 4  ;;  %s836_s7 = sshll.u32 %s6414_s20, 4  ;;  %s813_s1 = int_to_ptr.vmem [resolvable:$true] %s812_s1  ;;  %s837_s7 = int_to_ptr.vmem [resolvable:$true] %s836_s7 }
 0x166   : > { %s7767_s12 = sld [smem:[#allocation62_spill]] }
 0x16c   : > { %s6076_s0 = scalar_lea.hbm %s7767_s12, 1024 }
 0x16d   : > { %p6077_p1 = scmp.ne.s32.totalorder %s7767_s12, %s6076_s0  ;;  %p6083_p12 = scmp.lt.u32.totalorder %s6076_s0, %s7767_s12 }
 0x16f   : > { %p6079_p3 = pnand %p6077_p1, %p6640_p8 }
 0x171   : > { %p6080_p11 = pneg %p6079_p3 }
 0x173   : > { %p6085_p13 = pnand %p6083_p12, %p6080_p11 }
 0x175   : > { %6088 = shalt.err (!%p6085_p13)
}
 0x176   : > { %s6089_s26 = scalar_lea.vmem %s813_s1, 1024  ;;  %p6097_p7 = scmp.lt.s32.totalorder %s813_s1, %s813_s1 }
 0x177   : > { %p6090_p0 = scmp.ne.s32.totalorder %s813_s1, %s6089_s26  ;;  %p6098_p9 = scmp.lt.s32.totalorder %s6089_s26, %s6089_s26 }
 0x179   : > { %p6092_p2 = pnand %p6090_p0, %p6640_p8  ;;  %p6099_p5 = por %p6098_p9, %p6097_p7 }
 0x17b   : > { %p6093_p4 = pneg %p6092_p2 }
 0x17d   : > { %p6100_p10 = pnand %p6099_p5, %p6093_p4 }
 0x17f   : > { %6103 = shalt.err (!%p6100_p10)
}
 0x180   : > { %5481 = dma.hbm_to_vmem [thread:$0]  (!%p6624_p6), %s7767_s12, 1024, %s813_s1, [#allocation22], %s7764_s25, %s7764_s25, %s7763_s11  }
 0x181   : > { %s7768_s14 = sld [smem:[#allocation64_spill]] }
 0x187   : > { %s6104_s20 = scalar_lea.hbm %s7768_s14, 1024 }
 0x188   : > { %p6105_p1 = scmp.ne.s32.totalorder %s7768_s14, %s6104_s20  ;;  %p6111_p12 = scmp.lt.u32.totalorder %s6104_s20, %s7768_s14 }
 0x18a   : > { %p6107_p3 = pnand %p6105_p1, %p6640_p8 }
 0x18c   : > { %p6108_p11 = pneg %p6107_p3 }
 0x18e   : > { %p6113_p13 = pnand %p6111_p12, %p6108_p11 }
 0x190   : > { %6116 = shalt.err (!%p6113_p13)
}
 0x191   : > { %s6117_s13 = scalar_lea.vmem %s837_s7, 1024  ;;  %p6125_p7 = scmp.lt.s32.totalorder %s837_s7, %s837_s7 }
 0x192   : > { %p6118_p0 = scmp.ne.s32.totalorder %s837_s7, %s6117_s13  ;;  %p6126_p9 = scmp.lt.s32.totalorder %s6117_s13, %s6117_s13 }
 0x194   : > { %p6120_p2 = pnand %p6118_p0, %p6640_p8  ;;  %p6127_p5 = por %p6126_p9, %p6125_p7 }
 0x196   : > { %p6121_p4 = pneg %p6120_p2 }
 0x198   : > { %p6128_p10 = pnand %p6127_p5, %p6121_p4 }
 0x19a   : > { %6131 = shalt.err (!%p6128_p10)
}
 0x19b   : > { %5487 = dma.hbm_to_vmem [thread:$0]  (!%p6624_p6), %s7768_s14, 1024, %s837_s7, [#allocation25], %s7764_s25, %s7764_s25, %s7763_s11  }
 0x19c   : > { %s6415_s21 = smov [#allocation29]   ;;  %s6416_s15 = smov [#allocation32]  }
 0x19d   : > { %s860_s0 = sshll.u32 %s6415_s21, 4  ;;  %s896_s17 = sshll.u32 %s6416_s15, 4  ;;  %s861_s0 = int_to_ptr.vmem [resolvable:$true] %s860_s0  ;;  %s897_s17 = int_to_ptr.vmem [resolvable:$true] %s896_s17 }
 0x19e   : > { %s7769_s16 = sld [smem:[#allocation66_spill]] }
 0x1a4   : > { %s6132_s18 = scalar_lea.hbm %s7769_s16, 1024 }
 0x1a5   : > { %p6133_p1 = scmp.ne.s32.totalorder %s7769_s16, %s6132_s18  ;;  %p6139_p12 = scmp.lt.u32.totalorder %s6132_s18, %s7769_s16 }
 0x1a7   : > { %p6135_p3 = pnand %p6133_p1, %p6640_p8 }
 0x1a9   : > { %p6136_p11 = pneg %p6135_p3 }
 0x1ab   : > { %p6141_p13 = pnand %p6139_p12, %p6136_p11 }
 0x1ad   : > { %6144 = shalt.err (!%p6141_p13)
}
 0x1ae   : > { %s6145_s7 = scalar_lea.vmem %s861_s0, 1024  ;;  %p6153_p7 = scmp.lt.s32.totalorder %s861_s0, %s861_s0 }
 0x1af   : > { %p6146_p0 = scmp.ne.s32.totalorder %s861_s0, %s6145_s7  ;;  %p6154_p9 = scmp.lt.s32.totalorder %s6145_s7, %s6145_s7 }
 0x1b1   : > { %p6148_p2 = pnand %p6146_p0, %p6640_p8  ;;  %p6155_p5 = por %p6154_p9, %p6153_p7 }
 0x1b3   : > { %p6149_p4 = pneg %p6148_p2 }
 0x1b5   : > { %p6156_p10 = pnand %p6155_p5, %p6149_p4 }
 0x1b7   : > { %6159 = shalt.err (!%p6156_p10)
}
 0x1b8   : > { %5493 = dma.hbm_to_vmem [thread:$0]  (!%p6624_p6), %s7769_s16, 1024, %s861_s0, [#allocation28], %s7764_s25, %s7764_s25, %s7763_s11  }
 0x1b9   : > { %s6160_s30 = scalar_lea.hbm %s7684_s22, 2048 }
 0x1ba   : > { %p6161_p1 = scmp.ne.s32.totalorder %s7684_s22, %s6160_s30  ;;  %p6167_p12 = scmp.lt.u32.totalorder %s6160_s30, %s7684_s22 }
 0x1bc   : > { %p6163_p3 = pnand %p6161_p1, %p6640_p8 }
 0x1be   : > { %p6164_p11 = pneg %p6163_p3 }
 0x1c0   : > { %p6169_p13 = pnand %p6167_p12, %p6164_p11 }
 0x1c2   : > { %6172 = shalt.err (!%p6169_p13)
}
 0x1c3   : > { %s6173_s1 = scalar_lea.vmem %s897_s17, 2048  ;;  %p6181_p7 = scmp.lt.s32.totalorder %s897_s17, %s897_s17 }
 0x1c4   : > { %p6174_p0 = scmp.ne.s32.totalorder %s897_s17, %s6173_s1  ;;  %p6182_p9 = scmp.lt.s32.totalorder %s6173_s1, %s6173_s1 }
 0x1c6   : > { %p6176_p2 = pnand %p6174_p0, %p6640_p8  ;;  %p6183_p5 = por %p6182_p9, %p6181_p7 }
 0x1c8   : > { %p6177_p4 = pneg %p6176_p2 }
 0x1ca   : > { %p6184_p10 = pnand %p6183_p5, %p6177_p4 }
 0x1cc   : > { %6187 = shalt.err (!%p6184_p10)
}
 0x1cd   : > { %s6417_s0 = smov 128   ;;  %s6418_s7 = smov 8  }
 0x1ce   : > { %5499 = dma.hbm_to_vmem [thread:$0]  (!%p6624_p6), %s7684_s22, 2048, %s897_s17, [#allocation31], %s6417_s0, %s6417_s0, %s6418_s7  }
 0x1cf   : > { %s6419_s15 = smov [#allocation33]   ;;  %s6188_s19 = scalar_lea.hbm %s7686_s24, 2048 }
 0x1d0   : > { %s912_s20 = sshll.u32 %s6419_s15, 4  ;;  %p6189_p1 = scmp.ne.s32.totalorder %s7686_s24, %s6188_s19  ;;  %s913_s20 = int_to_ptr.vmem [resolvable:$true] %s912_s20 }
 0x1d1   : > { %p6195_p12 = scmp.lt.u32.totalorder %s6188_s19, %s7686_s24 }
 0x1d2   : > { %p6191_p3 = pnand %p6189_p1, %p6640_p8 }
 0x1d4   : > { %p6192_p11 = pneg %p6191_p3 }
 0x1d6   : > { %p6197_p13 = pnand %p6195_p12, %p6192_p11 }
 0x1d8   : > { %6200 = shalt.err (!%p6197_p13)
}
 0x1d9   : > { %s6201_s17 = scalar_lea.vmem %s913_s20, 2048  ;;  %p6209_p7 = scmp.lt.s32.totalorder %s913_s20, %s913_s20 }
 0x1da   : > { %p6202_p0 = scmp.ne.s32.totalorder %s913_s20, %s6201_s17  ;;  %p6210_p9 = scmp.lt.s32.totalorder %s6201_s17, %s6201_s17 }
 0x1dc   : > { %p6204_p2 = pnand %p6202_p0, %p6640_p8  ;;  %p6211_p5 = por %p6210_p9, %p6209_p7 }
 0x1de   : > { %p6205_p4 = pneg %p6204_p2 }
 0x1e0   : > { %p6212_p10 = pnand %p6211_p5, %p6205_p4 }
 0x1e2   : > { %6215 = shalt.err (!%p6212_p10)
}
 0x1e3   : > { %5502 = dma.hbm_to_vmem [thread:$0]  (!%p6624_p6), %s7686_s24, 2048, %s913_s20, [#allocation34], %s7764_s25, %s7764_s25, %s7763_s11  }
 0x1e4   : > { %s4812_s23 = sadd.s32 4294967294, %s6398_s6   ;;  %s67_s2 = sadd.s32 1, %s6394_s3 }
 0x1e5   : > { %p69_p8 = scmp.ge.s32.totalorder %s67_s2, 2  ;;  %s74_s7 = sadd.s32 1, %s6386_s9 }
 0x1e6   : > { %p81_p1 = scmp.ne.s32.totalorder %s6386_s9, %s6382_s5  ;;  %p82_p3 = scmp.eq.s32.totalorder %s6398_s6, 0 }
 0x1e7   : > { %s7821_s2 = smov (%p69_p8, %s67_s2), 0  ;;  %p87_p12 = scmp.ne.s32.totalorder %s6382_s5, %s6378_s8 }
 0x1e8   : > { %p6969_p11 = por %p82_p3, %p81_p1  ;;  %s71_s11 = ssub.s32 %s6394_s3, %s7821_s2 }
 0x1e9   : > { %p685_p6 = scmp.eq.s32.totalorder %s6608_s10, 1  ;;  %p72_p13 = scmp.eq.s32.totalorder %s71_s11, 0 }
 0x1ea   : > { %p7771_p0 = scmp.eq.s32.totalorder %s6608_s10, 0  ;;  %p691_p7 = scmp.eq.s32.totalorder %s4812_s23, 1 }
 0x1eb   : > { %p6984_p4 = por %p685_p6, %p81_p1  ;;  %p5530_p5 = scmp.lt.s32.totalorder %s6398_s6, 2 }
 0x1ec   : > { %p6980_p2 = por %p7771_p0, %p87_p12  ;;  %p6991_p9 = por %p691_p7, %p87_p12 }
 0x1ed   : > { %s7773_s21 = scalar_select %p6984_p4, 1, 0 }
 0x1ee   : > { %s7772_s25 = scalar_select %p6980_p2, 1, 0 }
 0x1ef   : > { %s6989_s15 = scalar_select %p72_p13, %s6386_s9, %s74_s7  }
 0x1f0   : > { %s7774_s20 = scalar_select %p6991_p9, 1, 0 }
 0x1f1   : > { %s6997_s30 = sand.u32 1, %s6386_s9   ;;  %s4832_s18 = sshll.u32 %s6394_s3, 6 }
 0x1f2   : > { %s4831_s19 = sshll.u32 %s6997_s30, 2  ;;  %s7775_s1 = sld [smem:[#allocation50_spill]] }
 0x1f3   : > { %s939_s4 = scalar_lea.vmem [#allocation6], %s4831_s19  ;;  %p7008_p10 = pnand %p5530_p5, %p6969_p11 }
 0x1f4   : > { %s946_s0 = sshll.u32 %s939_s4, 4  ;;  %s936_s11 = scalar_lea.sflag [#allocation7], %s6997_s30  ;;  %s7012_s0 = int_to_ptr.vmem [resolvable:$true] %s946_s0 }
 0x1f5   : > { %p6218_p1 = pneg %p7008_p10 }
 0x1f8   : > { %s7004_s17 = scalar_lea.hbm %s7775_s1, %s4832_s18  ;;  %s6221_s19 = scalar_lea.hbm %s7775_s1, 128 }
 0x1f9   : > { %s6216_s27 = scalar_lea.hbm %s7004_s17, 64  ;;  %p6222_p11 = scmp.lt.u32.totalorder %s7004_s17, %s7775_s1 }
 0x1fa   : > { %p6217_p8 = scmp.ne.s32.totalorder %s7004_s17, %s6216_s27  ;;  %p6223_p6 = scmp.lt.u32.totalorder %s6221_s19, %s6216_s27 }
 0x1fb   : > { %p6225_p0 = scmp.lt.u32.totalorder %s6216_s27, %s7004_s17 }
 0x1fc   : > { %p6219_p3 = pnand %p6218_p1, %p6217_p8  ;;  %p6224_p13 = por %p6223_p6, %p6222_p11 }
 0x1fe   : > { %p6220_p12 = pneg %p6219_p3  ;;  %p6226_p7 = por %p6225_p0, %p6224_p13 }
 0x200   : > { %p6227_p5 = pnand %p6226_p7, %p6220_p12 }
 0x202   : > { %6230 = shalt.err (!%p6227_p5)
}
 0x203   : > { %s6231_s7 = scalar_lea.vmem %s7012_s0, 64  ;;  %s6420_s18 = smov [#allocation6]  }
 0x204   : > { %p6232_p8 = scmp.ne.s32.totalorder %s7012_s0, %s6231_s7  ;;  %s6236_s26 = sshll.u32 %s6420_s18, 4  ;;  %s6237_s26 = int_to_ptr.vmem [resolvable:$false] %s6236_s26 }
 0x205   : > { %s6238_s13 = scalar_lea.vmem %s6237_s26, 128  ;;  %p6239_p4 = scmp.lt.s32.totalorder %s7012_s0, %s6237_s26 }
 0x206   : > { %p6234_p3 = pnand %p6232_p8, %p6218_p1  ;;  %p6240_p11 = scmp.lt.s32.totalorder %s6238_s13, %s6231_s7 }
 0x208   : > { %p6235_p9 = pneg %p6234_p3  ;;  %p6241_p6 = por %p6240_p11, %p6239_p4 }
 0x20a   : > { %p6242_p13 = pnand %p6241_p6, %p6235_p9 }
 0x20c   : > { %6245 = shalt.err (!%p6242_p13)
}
 0x20d   : > { %5506 = dma.hbm_to_vmem [thread:$0]  (!%p7008_p10), %s7004_s17, 64, %s7012_s0, %s936_s11  }
 0x20e   : > { %s4833_s27 = sshll.u32 %s6997_s30, 3  ;;  %s4834_s19 = sshll.u32 %s6394_s3, 7 }
 0x20f   : > { %s7777_s1 = sld [smem:[#allocation51_spill]]  ;;  %s957_s7 = scalar_lea.vmem [#allocation9], %s4833_s27 }
 0x210   : > { %s964_s26 = sshll.u32 %s957_s7, 4  ;;  %s7778_s13 = sand.u32 1, %s6398_s6   ;;  %s965_s26 = int_to_ptr.vmem [resolvable:$true] %s964_s26 }
 0x211   : > { %s954_s14 = scalar_lea.sflag [#allocation10], %s7778_s13 }
 0x215   : > { %s7046_s12 = scalar_lea.hbm %s7777_s1, %s4834_s19  ;;  %s6251_s0 = scalar_lea.hbm %s7777_s1, 256 }
 0x216   : > { %s6246_s16 = scalar_lea.hbm %s7046_s12, 128  ;;  %p6252_p0 = scmp.lt.u32.totalorder %s7046_s12, %s7777_s1 }
 0x217   : > { %p6247_p4 = scmp.ne.s32.totalorder %s7046_s12, %s6246_s16  ;;  %p6253_p7 = scmp.lt.u32.totalorder %s6251_s0, %s6246_s16 }
 0x218   : > { %p6255_p8 = scmp.lt.u32.totalorder %s6246_s16, %s7046_s12 }
 0x219   : > { %p6249_p9 = pnand %p6247_p4, %p6218_p1  ;;  %p6254_p5 = por %p6253_p7, %p6252_p0 }
 0x21b   : > { %p6250_p12 = pneg %p6249_p9  ;;  %p6256_p3 = por %p6255_p8, %p6254_p5 }
 0x21d   : > { %p6257_p11 = pnand %p6256_p3, %p6250_p12 }
 0x21f   : > { %6260 = shalt.err (!%p6257_p11)
}
 0x220   : > { %s6261_s27 = scalar_lea.vmem %s965_s26, 128  ;;  %s6421_s4 = smov [#allocation9]  }
 0x221   : > { %p6262_p6 = scmp.ne.s32.totalorder %s965_s26, %s6261_s27  ;;  %s6266_s18 = sshll.u32 %s6421_s4, 4  ;;  %s6267_s18 = int_to_ptr.vmem [resolvable:$false] %s6266_s18 }
 0x222   : > { %s6268_s7 = scalar_lea.vmem %s6267_s18, 256  ;;  %p6269_p9 = scmp.lt.s32.totalorder %s965_s26, %s6267_s18 }
 0x223   : > { %p6264_p13 = pnand %p6262_p6, %p6218_p1  ;;  %p6270_p2 = scmp.lt.s32.totalorder %s6268_s7, %s6261_s27 }
 0x225   : > { %p6265_p4 = pneg %p6264_p13  ;;  %p6271_p0 = por %p6270_p2, %p6269_p9 }
 0x227   : > { %p6272_p7 = pnand %p6271_p0, %p6265_p4 }
 0x229   : > { %6275 = shalt.err (!%p6272_p7)
}
 0x22a   : > { %5509 = dma.hbm_to_vmem [thread:$0]  (!%p7008_p10), %s7046_s12, 128, %s965_s26, %s954_s14  }
 0x22b   : > { %s7779_s16 = sld [smem:[#allocation49_spill]] }
 0x231   : > { %p7780_p12 = scmp.ne.s32.totalorder %s7779_s16, 0 }
 0x232   : > { %s7072_s13 = sand.u32 (!%p7780_p12), 1, %s6382_s5   ;;  %p7781_p2 = scmp.ne.s32.totalorder (!%p7780_p12), %s7772_s25, 0 }
 0x233   : > { %973 = sbr.rel (%p7780_p12) target bundleno = 5030 (0x13a6), region = 132  ;;  %s4836_s30 = sshll.u32 (!%p7780_p12), %s7072_s13, 2 }
 0x234   : > { %s976_s17 = scalar_lea.sflag (!%p7780_p12), [#allocation7], %s7072_s13  ;;  %s7076_s0 = scalar_lea.vmem (!%p7780_p12), [#allocation6], %s4836_s30 }
 0x23a   : > { %6329 = dma.done.wait (%p7781_p2), %s976_s17, 64  }
 0x23b   : > { %6331 = vsyncadd (%p7781_p2), %s976_s17, 4294967232  ;;  %s984_s14 = sand.u32 1, %s6608_s10   ;;  %s4837_s12 = sshll.u32 %s7072_s13, 3 }
 0x23c   : > { %s985_s23 = scalar_lea.sflag [#allocation10], %s984_s14  ;;  %s7086_s26 = scalar_lea.vmem [#allocation9], %s4837_s12 }
 0x23d   : > { %6333 = dma.done.wait (%p7781_p2), %s985_s23, 128  }
 0x23e   : > { %6335 = vsyncadd (%p7781_p2), %s985_s23, 4294967168  ;;  %p7782_p10 = scmp.eq.s32.totalorder %s6608_s10, 0 }
 0x240   : > { %6337 = dma.done.wait (%p7782_p10), [#allocation10], 1024   ;;  %p7783_p1 = pmov %p7782_p10 }
 0x242   : > { %6339 = vsyncadd (%p7783_p1), [#allocation10], 4294966272  ;;  %p7784_p5 = pmov %p7783_p1 }
 0x243   : > { %p7785_p8 = pmov %p7783_p1 }
 0x244   : > { %6341 = dma.done.wait (%p7784_p5), [#allocation13], 2048  }
 0x245   : > { %6343 = vsyncadd (%p7785_p8), [#allocation13], 4294965248  ;;  %p7786_p3 = pmov %p7783_p1 }
 0x246   : > { %p7787_p11 = pmov %p7783_p1 }
 0x247   : > { %6345 = dma.done.wait (%p7786_p3), [#allocation16], 1040  }
 0x248   : > { %6347 = vsyncadd (%p7787_p11), [#allocation16], 4294966256  ;;  %p7788_p6 = pmov %p7783_p1 }
 0x249   : > { %p7789_p13 = pmov %p7783_p1 }
 0x24a   : > { %6349 = dma.done.wait (%p7788_p6), [#allocation19], 32  }
 0x24b   : > { %6351 = vsyncadd (%p7789_p13), [#allocation19], 4294967264  ;;  %p7790_p4 = pmov %p7783_p1 }
 0x24c   : > { %p7791_p9 = pmov %p7783_p1 }
 0x24d   : > { %6353 = dma.done.wait (%p7790_p4), [#allocation22], 1040  }
 0x24e   : > { %6355 = vsyncadd (%p7791_p9), [#allocation22], 4294966256  ;;  %p7792_p0 = pmov %p7783_p1 }
 0x250   : > { %6357 = dma.done.wait (%p7792_p0), [#allocation25], 1040   ;;  %p7793_p7 = pmov %p7792_p0 }
 0x251   : > { %p7794_p12 = pmov %p7792_p0 }
 0x252   : > { %6359 = vsyncadd (%p7793_p7), [#allocation25], 4294966256 }
 0x253   : > { %6361 = dma.done.wait (%p7794_p12), [#allocation28], 1040   ;;  %p7795_p2 = pmov %p7792_p0 }
 0x254   : > { %p7796_p10 = pmov %p7792_p0 }
 0x255   : > { %6363 = vsyncadd (%p7795_p2), [#allocation28], 4294966256 }
 0x256   : > { %6365 = dma.done.wait (%p7796_p10), [#allocation31], 2064   ;;  %p7797_p1 = pmov %p7792_p0 }
 0x257   : > { %p7798_p5 = pmov %p7792_p0 }
 0x258   : > { %6367 = vsyncadd (%p7797_p1), [#allocation31], 4294965232 }
 0x259   : > { %6369 = dma.done.wait (%p7798_p5), [#allocation34], 2048   ;;  %p7799_p8 = pmov %p7792_p0 }
 0x25a   : > { %v6422_v0 = vmov 0.0   ;;  %vm6423_vm0 = vmmov 0   ;;  %v5625_v1 = vld [vmem:[#allocation12] sm:$0xff]   ;;  %v5626_v2 = vld [vmem:[#allocation12 + $0x8] sm:$0xff]   ;;  %v5627_v3 = vld [vmem:[#allocation12 + $0x10] sm:$0xff]   ;;  %s7800_s11 = sld [smem:[#allocation55_spill]]  ;;  %v1263_v62 = vlaneseq }
 0x25b   : > { %6371 = vsyncadd (%p7799_p8), [#allocation34], 4294965248  ;;  %5128 = vmatprep.subr.bf16.mxu0 %v6422_v0  ;;  %5144 = vmatprep.mubr.msk.bf16.mxu0 %vm6423_vm0, %v6422_v0  ;;  %v5628_v4 = vld [vmem:[#allocation12 + $0x18] sm:$0xff]   ;;  %v5629_v5 = vld [vmem:[#allocation12 + $0x20] sm:$0xff]   ;;  %s6424_s19 = smov 96   ;;  %s6425_s27 = smov 32  }
 0x25c   : > { %5148 = vmatprep.subr.bf16.mxu1 %v6422_v0  ;;  %5164 = vmatprep.mubr.msk.bf16.mxu1 %vm6423_vm0, %v6422_v0  ;;  %v5630_v6 = vld [vmem:[#allocation12 + $0x28] sm:$0xff]   ;;  %v5631_v7 = vld [vmem:[#allocation12 + $0x30] sm:$0xff]   ;;  %v5632_v8 = vld [vmem:[#allocation12 + $0x38] sm:$0xff]   ;;  %s6426_s4 = smov 64   ;;  %s7801_s16 = sld [smem:[#allocation53_spill]]  ;;  %vm1398_vm1 = vcmask 257024  }
 0x25d   : > { %5129 = vmatpush3.bf16.msra.mxu0 %v5625_v1  ;;  %v1135_v9 = vld [vmem:[%s7086_s26] sm:$0xff]  ;;  %v5636_v14 = vld [vmem:[#allocation26 + $0x18] sm:$0xff]   ;;  %v6427_v60 = vmov 1983009808   ;;  %v6428_v63 = vmov 1934713408  }
 0x25e   : > { %5130 = vmatprep.subr.bf16.mxu0 %v6422_v0  ;;  %v5633_v10 = vld [vmem:[#allocation26] sm:$0xff]   ;;  %v7142_v11 = vpack.c.bf16 %v1135_v9, %v1135_v9  ;;  %v5634_v12 = vld [vmem:[#allocation26 + $0x8] sm:$0xff]   ;;  %v5635_v13 = vld [vmem:[#allocation26 + $0x10] sm:$0xff]   ;;  %v1261_v61 = vunpack.c.l.s4 %v6427_v60  ;;  %v1293_v1 = vunpack.c.l.s4 %v6428_v63  ;;  %vm2476_vm2 = vcmask 261120   ;;  %s7806_s14 = sld [smem:[#allocation72_spill]]  ;;  %s7807_s10 = sld [smem:[#allocation73_spill]] }
 0x25f   : > { %v5637_v15 = vld [vmem:[#allocation26 + $0x20] sm:$0xff]   ;;  %v5638_v16 = vld [vmem:[#allocation26 + $0x28] sm:$0xff]   ;;  %v5639_v17 = vld [vmem:[#allocation26 + $0x30] sm:$0xff]   ;;  %vm2669_vm4 = vcmask 64512   ;;  %vm2725_vm5 = vcmask 1043456   ;;  %vm3056_vm6 = vcmask 523264  }
 0x260   : > { %v5640_v18 = vld [vmem:[#allocation26 + $0x38] sm:$0xff]   ;;  %v5643_v22 = vld [vmem:[#allocation11 + $0x10] sm:$0xff]   ;;  %v5644_v23 = vld [vmem:[#allocation11 + $0x18] sm:$0xff]   ;;  %vm3058_vm7 = vcmask 785408   ;;  %s7808_s25 = sld [smem:[#allocation48_spill]]  ;;  %s7810_s7 = sld [smem:[#allocation75_spill]] }
 0x261   : > { %5131 = vmatpush3.bf16.msra.mxu0 %v5626_v2  ;;  %v7156_v19 = vld [vmem:[%s7076_s0] sm:$0xf]  ;;  %v5641_v20 = vld [vmem:[#allocation11] sm:$0xff]   ;;  %v5647_v26 = vld [vmem:[#allocation11 + $0x30] sm:$0xff]   ;;  %v1262_v2 = vunpack.c.0.s8 %v1261_v61  ;;  %s7802_s0 = sld [smem:[#allocation68_spill]]  ;;  %s1129_s30 = scalar_lea.vmem [#allocation35], %s4837_s12 }
 0x262   : > { %5132 = vmatprep.subr.bf16.mxu0 %v6422_v0  ;;  %v5642_v21 = vld [vmem:[#allocation11 + $0x8] sm:$0xff]   ;;  %v5645_v24 = vld [vmem:[#allocation11 + $0x20] sm:$0xff]   ;;  %v5648_v27 = vld [vmem:[#allocation11 + $0x38] sm:$0xff]   ;;  %s4555_s17 = sshll.u32 %s1129_s30, 4  ;;  %p7812_p11 = scmp.ne.s32.totalorder %s7773_s21, 0  ;;  %s7615_s17 = int_to_ptr.vmem [resolvable:$true] %s4555_s17 }
 0x263   : > { %v5646_v25 = vld [vmem:[#allocation11 + $0x28] sm:$0xff]   ;;  %v5649_v28 = vld [vmem:[#allocation14] sm:$0xff]   ;;  %v5651_v30 = vld [vmem:[#allocation14 + $0x10] sm:$0xff]   ;;  %s6431_s12 = smov [#allocation35]  }
 0x264   : > { %5149 = vmatpush3.bf16.msra.mxu1 %v5649_v28  ;;  %v5650_v29 = vld [vmem:[#allocation14 + $0x8] sm:$0xff]   ;;  %v5652_v31 = vld [vmem:[#allocation14 + $0x18] sm:$0xff]   ;;  %v5653_v32 = vld [vmem:[#allocation14 + $0x20] sm:$0xff]  }
 0x265   : > { %5133 = vmatpush3.bf16.msra.mxu0 %v5627_v3  ;;  %5150 = vmatprep.subr.bf16.mxu1 %v6422_v0  ;;  %v5654_v33 = vld [vmem:[#allocation14 + $0x28] sm:$0xff]   ;;  %v5655_v34 = vld [vmem:[#allocation14 + $0x30] sm:$0xff]   ;;  %v5656_v35 = vld [vmem:[#allocation14 + $0x38] sm:$0xff]   ;;  %v7215_v3 = vshrl.u32 %v1263_v62, 7 }
 0x266   : > { %5134 = vmatprep.subr.bf16.mxu0 %v6422_v0  ;;  %v5657_v36 = vld [vmem:[#allocation29] sm:$0xff]   ;;  %v5658_v37 = vld [vmem:[#allocation29 + $0x8] sm:$0xff]   ;;  %v5659_v38 = vld [vmem:[#allocation29 + $0x10] sm:$0xff]  }
 0x267   : > { %v5660_v39 = vld [vmem:[#allocation29 + $0x18] sm:$0xff]   ;;  %v5661_v42 = vld [vmem:[#allocation29 + $0x20] sm:$0xff]   ;;  %v5662_v47 = vld [vmem:[#allocation29 + $0x28] sm:$0xff]  }
 0x268   : > { %5151 = vmatpush3.bf16.msra.mxu1 %v5650_v29  ;;  %v4855_v40 = vld [vmem:[%s7800_s11] ss:$0 sm:$0xff]  ;;  %v5663_v48 = vld [vmem:[#allocation29 + $0x30] sm:$0xff]   ;;  %s7803_s11 = sld [smem:[#allocation69_spill]] }
 0x269   : > { %5135 = vmatpush3.bf16.msra.mxu0 %v5628_v4  ;;  %5152 = vmatprep.subr.bf16.mxu1 %v6422_v0  ;;  %v5664_v49 = vld [vmem:[#allocation29 + $0x38] sm:$0xff]  }
 0x26a   : > { %5136 = vmatprep.subr.bf16.mxu0 %v6422_v0  ;;  %v4899_v54 = vld [vmem:[%s7801_s16] ss:$0 sm:$0xff]  ;;  %s7805_s16 = sld [smem:[#allocation71_spill]] }
 0x26c   : > { %5153 = vmatpush3.bf16.msra.mxu1 %v5651_v30 }
 0x26d   : > { %5137 = vmatpush3.bf16.msra.mxu0 %v5629_v5  ;;  %5154 = vmatprep.subr.bf16.mxu1 %v6422_v0 }
 0x26e   : > { %5138 = vmatprep.subr.bf16.mxu0 %v6422_v0 }
 0x270   : > { %5155 = vmatpush3.bf16.msra.mxu1 %v5652_v31 }
 0x271   : > { %5139 = vmatpush3.bf16.msra.mxu0 %v5630_v6  ;;  %5156 = vmatprep.subr.bf16.mxu1 %v6422_v0  ;;  %v1294_v6 = vunpack.c.0.s8 %v1293_v1 }
 0x272   : > { %5140 = vmatprep.subr.bf16.mxu0 %v6422_v0 }
 0x274   : > { %5157 = vmatpush3.bf16.msra.mxu1 %v5653_v32 }
 0x275   : > { %5141 = vmatpush3.bf16.msra.mxu0 %v5631_v7  ;;  %5158 = vmatprep.subr.bf16.mxu1 %v6422_v0  ;;  %v7218_v7 = vsub.s32 %v1262_v2, %v7215_v3 }
 0x276   : > { %5142 = vmatprep.subr.bf16.mxu0 %v6422_v0 }
 0x278   : > { %5159 = vmatpush3.bf16.msra.mxu1 %v5654_v33 }
 0x279   : > { %5143 = vmatpush3.bf16.msra.mxu0 %v5632_v8  ;;  %5160 = vmatprep.subr.bf16.mxu1 %v6422_v0 }
 0x27a   : > { %5168 = vmatprep.subr.bf16.mxu0 %v6422_v0 }
 0x27c   : > { %5145 = vmatmul.mubr.bf16.vlgmr.msra.gmra.mrb[0].mxu0 %v7142_v11  ;;  %5161 = vmatpush3.bf16.msra.mxu1 %v5655_v34 }
 0x27d   : > { %5169 = vmatpush3.bf16.msra.mxu0 %v5633_v10  ;;  %5184 = vmatprep.mubr.msk.bf16.mxu0 %vm6423_vm0, %v6422_v0 }
 0x27e   : > { %5170 = vmatprep.subr.bf16.mxu0 %v6422_v0  ;;  %5162 = vmatprep.subr.bf16.mxu1 %v6422_v0 }
 0x280   : > { %5163 = vmatpush3.bf16.msra.mxu1 %v5656_v35 }
 0x281   : > { %5171 = vmatpush3.bf16.msra.mxu0 %v5634_v12  ;;  %5188 = vmatprep.subr.bf16.mxu1 %v6422_v0 }
 0x282   : > { %5172 = vmatprep.subr.bf16.mxu0 %v6422_v0 }
 0x283   : > { %5165 = vmatmul.mubr.bf16.vlgmr.msra.gmra.mrb[0].mxu1 %v7142_v11 }
 0x284   : > { %5189 = vmatpush3.bf16.msra.mxu1 %v5657_v36  ;;  %5204 = vmatprep.mubr.msk.bf16.mxu1 %vm6423_vm0, %v6422_v0 }
 0x285   : > { %5173 = vmatpush3.bf16.msra.mxu0 %v5635_v13  ;;  %5190 = vmatprep.subr.bf16.mxu1 %v6422_v0  ;;  %v7221_v13 = vsub.s32 %v1294_v6, %v7215_v3 }
 0x286   : > { %5174 = vmatprep.subr.bf16.mxu0 %v6422_v0 }
 0x288   : > { %5191 = vmatpush3.bf16.msra.mxu1 %v5658_v37 }
 0x289   : > { %5175 = vmatpush3.bf16.msra.mxu0 %v5636_v14  ;;  %5192 = vmatprep.subr.bf16.mxu1 %v6422_v0 }
 0x28a   : > { %5176 = vmatprep.subr.bf16.mxu0 %v6422_v0 }
 0x28c   : > { %5193 = vmatpush3.bf16.msra.mxu1 %v5659_v38 }
 0x28d   : > { %5177 = vmatpush3.bf16.msra.mxu0 %v5637_v15  ;;  %5194 = vmatprep.subr.bf16.mxu1 %v6422_v0 }
 0x28e   : > { %5178 = vmatprep.subr.bf16.mxu0 %v6422_v0 }
 0x290   : > { %5195 = vmatpush3.bf16.msra.mxu1 %v5660_v39 }
 0x291   : > { %5179 = vmatpush3.bf16.msra.mxu0 %v5638_v16  ;;  %5196 = vmatprep.subr.bf16.mxu1 %v6422_v0 }
 0x292   : > { %5180 = vmatprep.subr.bf16.mxu0 %v6422_v0 }
 0x294   : > { %5197 = vmatpush3.bf16.msra.mxu1 %v5661_v42 }
 0x295   : > { %5181 = vmatpush3.bf16.msra.mxu0 %v5639_v17  ;;  %5198 = vmatprep.subr.bf16.mxu1 %v6422_v0 }
 0x296   : > { %5182 = vmatprep.subr.bf16.mxu0 %v6422_v0 }
 0x298   : > { %5199 = vmatpush3.bf16.msra.mxu1 %v5662_v47 }
 0x299   : > { %5183 = vmatpush3.bf16.msra.mxu0 %v5640_v18  ;;  %5200 = vmatprep.subr.bf16.mxu1 %v6422_v0 }
 0x29a   : > { %5208 = vmatprep.subr.bf16.mxu0 %v6422_v0 }
 0x29c   : > { %5185 = vmatmul.mubr.bf16.vlgmr.msra.gmra.mrb[4].mxu0 %v7156_v19  ;;  %5201 = vmatpush3.bf16.msra.mxu1 %v5663_v48 }
 0x29d   : > { %5209 = vmatpush3.bf16.msra.mxu0 %v5641_v20  ;;  %5224 = vmatprep.mubr.msk.bf16.mxu0 %vm6423_vm0, %v6422_v0 }
 0x29e   : > { %5210 = vmatprep.subr.bf16.mxu0 %v6422_v0  ;;  %5202 = vmatprep.subr.bf16.mxu1 %v6422_v0 }
 0x2a0   : > { %5203 = vmatpush3.bf16.msra.mxu1 %v5664_v49 }
 0x2a1   : > { %5211 = vmatpush3.bf16.msra.mxu0 %v5642_v21  ;;  %5228 = vmatprep.subr.bf16.mxu1 %v6422_v0 }
 0x2a2   : > { %5212 = vmatprep.subr.bf16.mxu0 %v6422_v0 }
 0x2a3   : > { %5205 = vmatmul.mubr.bf16.vlgmr.msra.gmra.mrb[4].mxu1 %v7156_v19 }
 0x2a4   : > { %5230 = vmatprep.mubr.msk.bf16.mxu1 %vm6423_vm0, %v6422_v0 }
 0x2a5   : > { %5213 = vmatpush3.bf16.msra.mxu0 %v5643_v22 }
 0x2a6   : > { %5214 = vmatprep.subr.bf16.mxu0 %v6422_v0 }
 0x2a9   : > { %5215 = vmatpush3.bf16.msra.mxu0 %v5644_v23 }
 0x2aa   : > { %5216 = vmatprep.subr.bf16.mxu0 %v6422_v0 }
 0x2ad   : > { %5217 = vmatpush3.bf16.msra.mxu0 %v5645_v24 }
 0x2ae   : > { %5218 = vmatprep.subr.bf16.mxu0 %v6422_v0 }
 0x2b1   : > { %5219 = vmatpush3.bf16.msra.mxu0 %v5646_v25 }
 0x2b2   : > { %5220 = vmatprep.subr.bf16.mxu0 %v6422_v0 }
 0x2b5   : > { %5221 = vmatpush3.bf16.msra.mxu0 %v5647_v26 }
 0x2b6   : > { %5222 = vmatprep.subr.bf16.mxu0 %v6422_v0 }
 0x2b9   : > { %5223 = vmatpush3.bf16.msra.mxu0 %v5648_v27 }
 0x2ba   : > { %5276 = vmatprep.subr.bf16.mxu0 %v6422_v0 }
 0x2bc   : > { %5225 = vmatmul.mubr.bf16.vlgmr.msra.gmra.mrb[8].mxu0 %v7142_v11 }
 0x2bd   : > { %5292 = vmatprep.mubr.msk.bf16.mxu0 %vm6423_vm0, %v6422_v0 }
 0x34f   : > { %v1242_v41 = vpop.f32.mrb[0].mxu0 }
 0x350   : > { %v1243_v43 = vadd.f32 %v4855_v40, %v1242_v41  ;;  %v5146_v44 = vpop.f32.mrb[1].mxu0 }
 0x351   : > { %v1245_v45 = vpop.f32.mrb[2].mxu0 }
 0x352   : > { %1249 = vrot.lane.b32.xlu0 %v1243_v43, %s6424_s19  ;;  %v5147_v46 = vpop.f32.mrb[3].mxu0  ;;  %1255 = vrot.lane.b32.xlu1 %v1243_v43, %s6425_s27 }
 0x356   : > { %1252 = vrot.lane.b32.xlu0 %v1243_v43, %s6426_s4  ;;  %v7247_v61 = vpop.f32.mrb[0].mxu1 }
 0x36f   : > { %v7201_v50 = vpop.f32.mrb[4].mxu0 }
 0x370   : > { %v5186_v51 = vpop.f32.mrb[5].mxu0 }
 0x371   : > { %v1777_v52 = vpop.f32.mrb[6].mxu0 }
 0x372   : > { %v5187_v53 = vpop.f32.mrb[7].mxu0 }
 0x38f   : > { %v2316_v55 = vpop.f32.mrb[8].mxu0 }
 0x390   : > { %v7206_v56 = vadd.f32 %v4899_v54, %v2316_v55  ;;  %v5226_v57 = vpop.f32.mrb[9].mxu0 }
 0x391   : > { %v2319_v58 = vpop.f32.mrb[10].mxu0 }
 0x392   : > { %2326 = vrot.lane.b32.xlu0 %v7206_v56, %s6426_s4  ;;  %2323 = vrot.lane.b32.xlu1 %v7206_v56, %s6424_s19  ;;  %v5227_v59 = vpop.f32.mrb[11].mxu0 }
 0x396   : > { %2329 = vrot.lane.b32.xlu1 %v7206_v56, %s6425_s27 }
 0x3c4   : > { %v1250_v4 = vpop.permute.xlu0 %1249  ;;  %v1256_v5 = vpop.permute.xlu1 %1255 }
 0x3c5   : > { %v1274_v8 = vcombine.low %v1250_v4, %v1256_v5  ;;  %v1275_v9 = vcombine.high %v1250_v4, %v1256_v5  ;;  %v5166_v5 = vpop.f32.mrb[1].mxu1 }
 0x3c6   : > { %v1511_v6 = vpop.f32.mrb[2].mxu1 }
 0x3c7   : > { %v1282_v14 = vrot.slane %v1274_v8, %v7218_v7  ;;  %v1289_v15 = vrot.slane %v1275_v9, %v7218_v7 }
 0x3c8   : > { %v1253_v10 = vpop.permute.xlu0 %1252 }
 0x3c9   : > { %v1258_v11 = vcombine.low %v1243_v43, %v1253_v10  ;;  %v1259_v12 = vcombine.high %v1243_v43, %v1253_v10 }
 0x3cb   : > { %v1266_v16 = vrot.slane %v1258_v11, %v7218_v7  ;;  %v1273_v17 = vrot.slane %v1259_v12, %v7218_v7 }
 0x3cd   : > { %v1290_v18 = vcombine.low %v1266_v16, %v1282_v14  ;;  %v1291_v19 = vcombine.high %v1266_v16, %v1282_v14  ;;  %v1306_v20 = vcombine.low %v1273_v17, %v1289_v15  ;;  %v1307_v21 = vcombine.high %v1273_v17, %v1289_v15 }
 0x3cf   : > { %v1298_v22 = vrot.slane %v1290_v18, %v7221_v13  ;;  %v1305_v23 = vrot.slane %v1291_v19, %v7221_v13  ;;  %v1314_v24 = vrot.slane %v1306_v20, %v7221_v13  ;;  %v1321_v25 = vrot.slane %v1307_v21, %v7221_v13 }
 0x3d1   : > { %v1326_v26 = vcombine.low %v1298_v22, %v1305_v23  ;;  %v4864_v27 = vcombine.high %v1298_v22, %v1305_v23  ;;  %v1342_v28 = vcombine.low %v1314_v24, %v1321_v25  ;;  %v4865_v29 = vcombine.high %v1314_v24, %v1321_v25 }
 0x3d3   : > { %v1333_v30 = vrot.slane %v1326_v26, %v7218_v7  ;;  %v1341_v31 = vrot.slane %v4864_v27, %v7218_v7  ;;  %v1349_v32 = vrot.slane %v1342_v28, %v7218_v7  ;;  %v1357_v33 = vrot.slane %v4865_v29, %v7218_v7 }
 0x3d5   : > { %v1358_v34 = vcombine.low %v1333_v30, %v1341_v31  ;;  %v1359_v35 = vcombine.high %v1333_v30, %v1341_v31  ;;  %v1374_v36 = vcombine.low %v1349_v32, %v1357_v33  ;;  %v1375_v37 = vcombine.high %v1349_v32, %v1357_v33 }
 0x3d7   : > { %v1366_v38 = vrot.slane %v1358_v34, %v7221_v13  ;;  %v1373_v39 = vrot.slane %v1359_v35, %v7221_v13  ;;  %v1382_v40 = vrot.slane %v1374_v36, %v7221_v13  ;;  %v1389_v41 = vrot.slane %v1375_v37, %v7221_v13 }
 0x3d9   : > { %v1390_v42 = vcombine.low %v1366_v38, %v1382_v40  ;;  %v1391_v43 = vcombine.high %v1366_v38, %v1382_v40  ;;  %v1392_v44 = vcombine.low %v1373_v39, %v1389_v41  ;;  %v1393_v45 = vcombine.high %v1373_v39, %v1389_v41 }
 0x3db   : > { %v1394_v46 = vpack.c.bf16 %v1390_v42, %v1390_v42  ;;  %v1395_v47 = vpack.c.bf16 %v1391_v43, %v1391_v43  ;;  %v1396_v48 = vpack.c.bf16 %v1392_v44, %v1392_v44  ;;  %v1397_v49 = vpack.c.bf16 %v1393_v45, %v1393_v45 }
 0x3dd   : > { %1399 = vst.msk [vmem:[#allocation2] sm:$0xf] %vm1398_vm1, %v1394_v46  ;;  %1400 = vst.msk [vmem:[#allocation2 + $0x4] sm:$0xf] %vm1398_vm1, %v1395_v47 }
 0x3de   : > { %1401 = vst.msk [vmem:[#allocation2 + $0x8] sm:$0xf] %vm1398_vm1, %v1396_v48  ;;  %1402 = vst.msk [vmem:[#allocation2 + $0xc] sm:$0xf] %vm1398_vm1, %v1397_v49 }
 0x3e4   : > { %v2472_v51 = vld [vmem:[#allocation2] sm:$0xf]  ;;  %v2473_v30 = vld [vmem:[#allocation2 + $0x4] sm:$0xf] }
 0x3e5   : > { %v2481_v52 = vsel %vm2476_vm2, %v2472_v51, 0  ;;  %v2527_v32 = vsel %vm2476_vm2, %v2473_v30, 0  ;;  %v2474_v36 = vld [vmem:[#allocation2 + $0x8] sm:$0xf]  ;;  %v2475_v42 = vld [vmem:[#allocation2 + $0xc] sm:$0xf] }
 0x3e6   : > { %5229 = vmatpush3.bf16.xpose.msra.mxu1 %v2481_v52  ;;  %v2573_v40 = vsel %vm2476_vm2, %v2474_v36, 0  ;;  %v2619_v44 = vsel %vm2476_vm2, %v2475_v42, 0  ;;  %v2207_v52 = vand.u32 127, %v1263_v62 }
 0x3e7   : > { %5234 = vmatprep.subr.bf16.mxu1 %v6422_v0 }
 0x3e8   : > { %vm2208_vm3 = vcmp.le.s32.totalorder %v2207_v52, %v7215_v3 }
 0x404   : > { %v2327_v53 = vpop.permute.xlu0 %2326  ;;  %v2324_v54 = vpop.permute.xlu1 %2323 }
 0x405   : > { %v2332_v55 = vcombine.low %v7206_v56, %v2327_v53  ;;  %v2333_v57 = vcombine.high %v7206_v56, %v2327_v53  ;;  %v5167_v56 = vpop.f32.mrb[3].mxu1 }
 0x406   : > { %v7280_v47 = vpop.f32.mrb[4].mxu1 }
 0x407   : > { %v2340_v63 = vrot.slane %v2332_v55, %v7218_v7  ;;  %v2347_v1 = vrot.slane %v2333_v57, %v7218_v7  ;;  %v5206_v48 = vpop.f32.mrb[5].mxu1 }
 0x408   : > { %v2330_v58 = vpop.permute.xlu1 %2329  ;;  %v2042_v49 = vpop.f32.mrb[6].mxu1 }
 0x409   : > { %v2348_v59 = vcombine.low %v2324_v54, %v2330_v58  ;;  %v2349_v60 = vcombine.high %v2324_v54, %v2330_v58  ;;  %v5207_v51 = vpop.f32.mrb[7].mxu1  ;;  %v6429_v54 = vmov -1e+30  }
 0x40a   : > { %v2209_v55 = vsel %vm2208_vm3, 0.0, %v6429_v54 }
 0x40b   : > { %v2356_v2 = vrot.slane %v2348_v59, %v7218_v7  ;;  %v2363_v4 = vrot.slane %v2349_v60, %v7218_v7 }
 0x40d   : > { %v2364_v8 = vcombine.low %v2340_v63, %v2356_v2  ;;  %v2365_v9 = vcombine.high %v2340_v63, %v2356_v2  ;;  %v2380_v10 = vcombine.low %v2347_v1, %v2363_v4  ;;  %v2381_v11 = vcombine.high %v2347_v1, %v2363_v4 }
 0x40f   : > { %v2372_v12 = vrot.slane %v2364_v8, %v7221_v13  ;;  %v2379_v14 = vrot.slane %v2365_v9, %v7221_v13  ;;  %v2388_v15 = vrot.slane %v2380_v10, %v7221_v13  ;;  %v2395_v16 = vrot.slane %v2381_v11, %v7221_v13 }
 0x411   : > { %v2400_v17 = vcombine.low %v2372_v12, %v2379_v14  ;;  %v4908_v18 = vcombine.high %v2372_v12, %v2379_v14  ;;  %v2416_v19 = vcombine.low %v2388_v15, %v2395_v16  ;;  %v4909_v20 = vcombine.high %v2388_v15, %v2395_v16 }
 0x413   : > { %v2407_v21 = vrot.slane %v2400_v17, %v7218_v7  ;;  %v2415_v22 = vrot.slane %v4908_v18, %v7218_v7  ;;  %v2423_v23 = vrot.slane %v2416_v19, %v7218_v7  ;;  %v2431_v24 = vrot.slane %v4909_v20, %v7218_v7  ;;  %v4866_v20 = vld [vmem:[#allocation15] ss:$0 sm:$0xff] }
 0x415   : > { %v2432_v25 = vcombine.low %v2407_v21, %v2415_v22  ;;  %v2448_v26 = vcombine.low %v2423_v23, %v2431_v24  ;;  %v2433_v33 = vcombine.high %v2407_v21, %v2415_v22  ;;  %v2449_v34 = vcombine.high %v2423_v23, %v2431_v24 }
 0x416   : > { %v1509_v24 = vadd.f32 %v4866_v20, %v7247_v61 }
 0x417   : > { %v2440_v27 = vrot.slane %v2432_v25, %v7221_v13  ;;  %v2456_v28 = vrot.slane %v2448_v26, %v7221_v13  ;;  %v2447_v38 = vrot.slane %v2433_v33, %v7221_v13  ;;  %v2463_v39 = vrot.slane %v2449_v34, %v7221_v13 }
 0x419   : > { %v2464_v29 = vcombine.low %v2440_v27, %v2456_v28  ;;  %v2465_v35 = vcombine.high %v2440_v27, %v2456_v28  ;;  %v2466_v41 = vcombine.low %v2447_v38, %v2463_v39  ;;  %v2467_v45 = vcombine.high %v2447_v38, %v2463_v39 }
 0x41b   : > { %v2468_v31 = vpack.c.bf16 %v2464_v29, %v2464_v29  ;;  %v2469_v37 = vpack.c.bf16 %v2465_v35, %v2465_v35  ;;  %v2470_v43 = vpack.c.bf16 %v2466_v41, %v2466_v41  ;;  %v2471_v46 = vpack.c.bf16 %v2467_v45, %v2467_v45 }
 0x41d   : > { %5231 = vmatmul.mubr.msk.bf16.vlgmr.msra.gmra.mrb[8].mxu1 %vm2476_vm2, %v2468_v31 }
 0x41e   : > { %5235 = vmatpush3.bf16.xpose.msra.mxu1 %v2527_v32  ;;  %5236 = vmatprep.mubr.msk.bf16.mxu1 %vm6423_vm0, %v6422_v0 }
 0x41f   : > { %5240 = vmatprep.subr.bf16.mxu1 %v6422_v0 }
 0x425   : > { %5237 = vmatmul.mubr.msk.bf16.vlgmr.msra.gmra.mrb[12].mxu1 %vm2476_vm2, %v2469_v37 }
 0x426   : > { %5241 = vmatpush3.bf16.xpose.msra.mxu1 %v2573_v40  ;;  %5242 = vmatprep.mubr.msk.bf16.mxu1 %vm6423_vm0, %v6422_v0 }
 0x427   : > { %5246 = vmatprep.subr.bf16.mxu1 %v6422_v0 }
 0x42d   : > { %5243 = vmatmul.mubr.msk.bf16.vlgmr.msra.gmra.mrb[16].mxu1 %vm2476_vm2, %v2470_v43 }
 0x42e   : > { %5247 = vmatpush3.bf16.xpose.msra.mxu1 %v2619_v44  ;;  %5248 = vmatprep.mubr.msk.bf16.mxu1 %vm6423_vm0, %v6422_v0 }
 0x42f   : > { %5252 = vmatprep.subr.bf16.mxu1 %v6422_v0 }
 0x435   : > { %5249 = vmatmul.mubr.msk.bf16.vlgmr.msra.gmra.mrb[20].mxu1 %vm2476_vm2, %v2471_v46 }
 0x436   : > { %5254 = vmatprep.mubr.msk.bf16.mxu1 %vm6423_vm0, %v6422_v0 }
 0x4f0   : > { %v2517_v53 = vpop.f32.mrb[8].mxu1 }
 0x4f1   : > { %v2661_v57 = vmul.f32 0.17677669, %v2517_v53  ;;  %v5232_v58 = vpop.f32.mrb[9].mxu1 }
 0x4f2   : > { %v2520_v59 = vpop.f32.mrb[10].mxu1 }
 0x4f3   : > { %v5233_v60 = vpop.f32.mrb[11].mxu1  ;;  %v2665_v63 = vadd.f32 %v2661_v57, %v2209_v55 }
 0x4f5   : > { %v2670_v1 = vsel %vm2669_vm4, %v2665_v63, -inf }
 0x4f6   : > { %2671 = vmax.xlane.f32.xlu0 %v2670_v1 }
 0x4f8   : > { %v2563_v2 = vpop.f32.mrb[12].mxu1 }
 0x4f9   : > { %v2662_v4 = vmul.f32 0.17677669, %v2563_v2  ;;  %v5238_v5 = vpop.f32.mrb[13].mxu1 }
 0x4fa   : > { %v2566_v6 = vpop.f32.mrb[14].mxu1 }
 0x4fb   : > { %v5239_v8 = vpop.f32.mrb[15].mxu1  ;;  %v2666_v62 = vadd.f32 %v2662_v4, %v2209_v55 }
 0x4fd   : > { %v2673_v9 = vsel %vm2669_vm4, %v2666_v62, -inf }
 0x4fe   : > { %2674 = vmax.xlane.f32.xlu1 %v2673_v9 }
 0x500   : > { %v2609_v10 = vpop.f32.mrb[16].mxu1 }
 0x501   : > { %v2663_v11 = vmul.f32 0.17677669, %v2609_v10  ;;  %v5244_v56 = vpop.f32.mrb[17].mxu1 }
 0x502   : > { %v2612_v12 = vpop.f32.mrb[18].mxu1 }
 0x503   : > { %v5245_v14 = vpop.f32.mrb[19].mxu1  ;;  %v2667_v15 = vadd.f32 %v2663_v11, %v2209_v55 }
 0x505   : > { %v2676_v16 = vsel %vm2669_vm4, %v2667_v15, -inf }
 0x506   : > { %2677 = vmax.xlane.f32.xlu0 %v2676_v16 }
 0x508   : > { %v2655_v17 = vpop.f32.mrb[20].mxu1 }
 0x509   : > { %v2664_v18 = vmul.f32 0.17677669, %v2655_v17  ;;  %v5250_v19 = vpop.f32.mrb[21].mxu1 }
 0x50a   : > { %v2658_v21 = vpop.f32.mrb[22].mxu1 }
 0x50b   : > { %v5251_v22 = vpop.f32.mrb[23].mxu1  ;;  %v2668_v23 = vadd.f32 %v2664_v18, %v2209_v55 }
 0x50d   : > { %v2679_v25 = vsel %vm2669_vm4, %v2668_v23, -inf }
 0x50e   : > { %2680 = vmax.xlane.f32.xlu0 %v2679_v25 }
 0x50f   : > { %1515 = vrot.lane.b32.xlu1 %v1509_v24, %s6424_s19 }
 0x513   : > { %1521 = vrot.lane.b32.xlu1 %v1509_v24, %s6425_s27 }
 0x524   : > { %1518 = vrot.lane.b32.xlu0 %v1509_v24, %s6426_s4 }
 0x583   : > { %v2672_v26 = vpop.xlane.xlu0 %2671 }
 0x584   : > { %v2682_v27 = vsub.f32 %v2665_v63, %v2672_v26 }
 0x586   : > { %v2686_v28 = vmul.f32 1.442695, %v2682_v27 }
 0x588   : > { %5729 = vpow2.f32 %v2686_v28 }
 0x58b   : > { %v2675_v29 = vpop.xlane.xlu1 %2674 }
 0x58c   : > { %v2683_v30 = vsub.f32 %v2666_v62, %v2675_v29 }
 0x58e   : > { %v2688_v31 = vmul.f32 1.442695, %v2683_v30 }
 0x58f   : > { %v1516_v35 = vpop.permute.xlu1 %1515 }
 0x590   : > { %5731 = vpow2.f32 %v2688_v31 }
 0x592   : > { %v7295_v32 = vpop.eup %5729 }
 0x593   : > { %v2678_v61 = vpop.xlane.xlu0 %2677  ;;  %v2694_v33 = vsel %vm2669_vm4, %v7295_v32, 0.0  ;;  %v1522_v38 = vpop.permute.xlu1 %1521 }
 0x594   : > { %v2684_v34 = vsub.f32 %v2667_v15, %v2678_v61  ;;  %2695 = vadd.xlane.f32.xlu1 %v2694_v33  ;;  %v1540_v42 = vcombine.low %v1516_v35, %v1522_v38  ;;  %v1541_v43 = vcombine.high %v1516_v35, %v1522_v38 }
 0x596   : > { %v2690_v36 = vmul.f32 1.442695, %v2684_v34  ;;  %v1548_v51 = vrot.slane %v1540_v42, %v7218_v7  ;;  %v1555_v52 = vrot.slane %v1541_v43, %v7218_v7 }
 0x598   : > { %5733 = vpow2.f32 %v2690_v36 }
 0x59a   : > { %v7299_v37 = vpop.eup %5731 }
 0x59b   : > { %v2681_v39 = vpop.xlane.xlu0 %2680  ;;  %v2697_v40 = vsel %vm2669_vm4, %v7299_v37, 0.0 }
 0x59c   : > { %v2685_v41 = vsub.f32 %v2668_v23, %v2681_v39  ;;  %2698 = vadd.xlane.f32.xlu0 %v2697_v40 }
 0x59e   : > { %v2692_v44 = vmul.f32 1.442695, %v2685_v41 }
 0x59f   : > { %v1519_v45 = vpop.permute.xlu0 %1518 }
 0x5a0   : > { %5735 = vpow2.f32 %v2692_v44  ;;  %v1524_v46 = vcombine.low %v1509_v24, %v1519_v45  ;;  %v1525_v48 = vcombine.high %v1509_v24, %v1519_v45 }
 0x5a2   : > { %v7303_v49 = vpop.eup %5733  ;;  %v1532_v53 = vrot.slane %v1524_v46, %v7218_v7  ;;  %v1539_v54 = vrot.slane %v1525_v48, %v7218_v7 }
 0x5a3   : > { %v2700_v55 = vsel %vm2669_vm4, %v7303_v49, 0.0 }
 0x5a4   : > { %v1556_v57 = vcombine.low %v1532_v53, %v1548_v51  ;;  %v1557_v58 = vcombine.high %v1532_v53, %v1548_v51  ;;  %v1572_v59 = vcombine.low %v1539_v54, %v1555_v52  ;;  %v1573_v60 = vcombine.high %v1539_v54, %v1555_v52  ;;  %2701 = vadd.xlane.f32.xlu0 %v2700_v55 }
 0x5a6   : > { %v1564_v63 = vrot.slane %v1556_v57, %v7221_v13  ;;  %v1571_v1 = vrot.slane %v1557_v58, %v7221_v13  ;;  %v1580_v2 = vrot.slane %v1572_v59, %v7221_v13  ;;  %v1587_v4 = vrot.slane %v1573_v60, %v7221_v13  ;;  %v5666_v58 = vld [vmem:[#allocation17 + $0x8] sm:$0xff]   ;;  %v5667_v59 = vld [vmem:[#allocation17 + $0x10] sm:$0xff]   ;;  %v5668_v60 = vld [vmem:[#allocation17 + $0x18] sm:$0xff]  }
 0x5a8   : > { %v1592_v5 = vcombine.low %v1564_v63, %v1571_v1  ;;  %v4875_v6 = vcombine.high %v1564_v63, %v1571_v1  ;;  %v1608_v8 = vcombine.low %v1580_v2, %v1587_v4  ;;  %v4876_v62 = vcombine.high %v1580_v2, %v1587_v4  ;;  %v5669_v63 = vld [vmem:[#allocation17 + $0x20] sm:$0xff]   ;;  %v5670_v1 = vld [vmem:[#allocation17 + $0x28] sm:$0xff]  }
 0x5aa   : > { %v7315_v9 = vpop.eup %5735  ;;  %v1599_v10 = vrot.slane %v1592_v5, %v7218_v7  ;;  %v1607_v11 = vrot.slane %v4875_v6, %v7218_v7  ;;  %v1615_v56 = vrot.slane %v1608_v8, %v7218_v7  ;;  %v1623_v12 = vrot.slane %v4876_v62, %v7218_v7 }
 0x5ab   : > { %v2703_v14 = vsel %vm2669_vm4, %v7315_v9, 0.0 }
 0x5ac   : > { %v1624_v15 = vcombine.low %v1599_v10, %v1607_v11  ;;  %v1625_v16 = vcombine.high %v1599_v10, %v1607_v11  ;;  %v1640_v17 = vcombine.low %v1615_v56, %v1623_v12  ;;  %v1641_v18 = vcombine.high %v1615_v56, %v1623_v12  ;;  %2704 = vadd.xlane.f32.xlu1 %v2703_v14 }
 0x5ae   : > { %v1632_v19 = vrot.slane %v1624_v15, %v7221_v13  ;;  %v1639_v20 = vrot.slane %v1625_v16, %v7221_v13  ;;  %v1648_v21 = vrot.slane %v1640_v17, %v7221_v13  ;;  %v1655_v22 = vrot.slane %v1641_v18, %v7221_v13 }
 0x5b0   : > { %v1656_v23 = vcombine.low %v1632_v19, %v1648_v21  ;;  %v1657_v24 = vcombine.high %v1632_v19, %v1648_v21  ;;  %v1658_v25 = vcombine.low %v1639_v20, %v1655_v22  ;;  %v1659_v26 = vcombine.high %v1639_v20, %v1655_v22 }
 0x5b2   : > { %v1660_v27 = vpack.c.bf16 %v1656_v23, %v1656_v23  ;;  %v1661_v28 = vpack.c.bf16 %v1657_v24, %v1657_v24  ;;  %v1662_v29 = vpack.c.bf16 %v1658_v25, %v1658_v25  ;;  %v1663_v30 = vpack.c.bf16 %v1659_v26, %v1659_v26 }
 0x5b4   : > { %1664 = vst.msk [vmem:[#allocation3] sm:$0xf] %vm1398_vm1, %v1660_v27  ;;  %1665 = vst.msk [vmem:[#allocation3 + $0x4] sm:$0xf] %vm1398_vm1, %v1661_v28 }
 0x5b5   : > { %1666 = vst.msk [vmem:[#allocation3 + $0x8] sm:$0xf] %vm1398_vm1, %v1662_v29  ;;  %1667 = vst.msk [vmem:[#allocation3 + $0xc] sm:$0xf] %vm1398_vm1, %v1663_v30 }
 0x5bb   : > { %v2718_v31 = vld [vmem:[#allocation3] sm:$0xf]  ;;  %v2719_v38 = vld [vmem:[#allocation3 + $0x4] sm:$0xf] }
 0x5bc   : > { %v2727_v61 = vsel %vm2725_vm5, %v2718_v31, 0  ;;  %v2773_v40 = vsel %vm2725_vm5, %v2719_v38, 0  ;;  %v2720_v44 = vld [vmem:[#allocation3 + $0x8] sm:$0xf]  ;;  %v2721_v52 = vld [vmem:[#allocation3 + $0xc] sm:$0xf] }
 0x5bd   : > { %5253 = vmatpush3.bf16.msra.mxu1 %v2727_v61  ;;  %v2819_v46 = vsel %vm2725_vm5, %v2720_v44, 0  ;;  %v5671_v31 = vld [vmem:[#allocation17 + $0x30] sm:$0xff]  }
 0x5be   : > { %5258 = vmatprep.subr.bf16.mxu1 %v6422_v0 }
 0x621   : > { %v2696_v33 = vpop.xlane.xlu1 %2695 }
 0x622   : > { %5737 = vrcp.f32 %v2696_v33 }
 0x629   : > { %v2699_v34 = vpop.xlane.xlu0 %2698 }
 0x62a   : > { %5739 = vrcp.f32 %v2699_v34 }
 0x62c   : > { %v5738_v35 = vpop.eup %5737 }
 0x62d   : > { %v2710_v36 = vmul.f32 %v5738_v35, %v7295_v32 }
 0x62f   : > { %v2714_v39 = vpack.c.bf16 %v2710_v36, %v2710_v36 }
 0x631   : > { %5255 = vmatmul.mubr.msk.bf16.vlgmr.msra.gmra.mrb[24].mxu1 %vm2669_vm4, %v2714_v39  ;;  %v2702_v41 = vpop.xlane.xlu0 %2701 }
 0x632   : > { %5259 = vmatpush3.bf16.msra.mxu1 %v2773_v40  ;;  %5741 = vrcp.f32 %v2702_v41  ;;  %5260 = vmatprep.mubr.msk.bf16.mxu1 %vm6423_vm0, %v6422_v0  ;;  %v5672_v41 = vld [vmem:[#allocation17 + $0x38] sm:$0xff]  }
 0x633   : > { %5264 = vmatprep.subr.bf16.mxu1 %v6422_v0 }
 0x634   : > { %v5740_v42 = vpop.eup %5739 }
 0x635   : > { %v2711_v43 = vmul.f32 %v5740_v42, %v7299_v37  ;;  %v2865_v37 = vsel %vm2725_vm5, %v2721_v52, 0 }
 0x637   : > { %v2715_v45 = vpack.c.bf16 %v2711_v43, %v2711_v43 }
 0x639   : > { %v2705_v32 = vpop.xlane.xlu1 %2704  ;;  %5261 = vmatmul.mubr.msk.bf16.vlgmr.msra.gmra.mrb[28].mxu1 %vm2669_vm4, %v2715_v45 }
 0x63a   : > { %5743 = vrcp.f32 %v2705_v32  ;;  %5265 = vmatpush3.bf16.msra.mxu1 %v2819_v46  ;;  %5266 = vmatprep.mubr.msk.bf16.mxu1 %vm6423_vm0, %v6422_v0 }
 0x63b   : > { %5270 = vmatprep.subr.bf16.mxu1 %v6422_v0 }
 0x63c   : > { %v5742_v48 = vpop.eup %5741 }
 0x63d   : > { %v2712_v51 = vmul.f32 %v5742_v48, %v7303_v49  ;;  %v5665_v49 = vld [vmem:[#allocation17] sm:$0xff]  }
 0x63e   : > { %5277 = vmatpush3.bf16.msra.mxu0 %v5665_v49 }
 0x63f   : > { %v2716_v53 = vpack.c.bf16 %v2712_v51, %v2712_v51  ;;  %5278 = vmatprep.subr.bf16.mxu0 %v6422_v0 }
 0x641   : > { %5267 = vmatmul.mubr.msk.bf16.vlgmr.msra.gmra.mrb[32].mxu1 %vm2669_vm4, %v2716_v53 }
 0x642   : > { %5271 = vmatpush3.bf16.msra.mxu1 %v2865_v37  ;;  %5272 = vmatprep.mubr.msk.bf16.mxu1 %vm6423_vm0, %v6422_v0 }
 0x643   : > { %5296 = vmatprep.subr.bf16.mxu1 %v6422_v0  ;;  %5279 = vmatpush3.bf16.msra.mxu0 %v5666_v58 }
 0x644   : > { %v5744_v54 = vpop.eup %5743  ;;  %5280 = vmatprep.subr.bf16.mxu0 %v6422_v0 }
 0x645   : > { %v2713_v55 = vmul.f32 %v5744_v54, %v7315_v9 }
 0x647   : > { %v2717_v57 = vpack.c.bf16 %v2713_v55, %v2713_v55  ;;  %5281 = vmatpush3.bf16.msra.mxu0 %v5667_v59 }
 0x648   : > { %5282 = vmatprep.subr.bf16.mxu0 %v6422_v0 }
 0x649   : > { %5273 = vmatmul.mubr.msk.bf16.vlgmr.msra.gmra.mrb[36].mxu1 %vm2669_vm4, %v2717_v57 }
 0x64a   : > { %5312 = vmatprep.mubr.msk.bf16.mxu1 %vm6423_vm0, %v6422_v0 }
 0x64b   : > { %5283 = vmatpush3.bf16.msra.mxu0 %v5668_v60 }
 0x64c   : > { %5284 = vmatprep.subr.bf16.mxu0 %v6422_v0 }
 0x64f   : > { %5285 = vmatpush3.bf16.msra.mxu0 %v5669_v63 }
 0x650   : > { %5286 = vmatprep.subr.bf16.mxu0 %v6422_v0 }
 0x653   : > { %5287 = vmatpush3.bf16.msra.mxu0 %v5670_v1 }
 0x654   : > { %5288 = vmatprep.subr.bf16.mxu0 %v6422_v0 }
 0x657   : > { %5289 = vmatpush3.bf16.msra.mxu0 %v5671_v31 }
 0x658   : > { %5290 = vmatprep.subr.bf16.mxu0 %v6422_v0 }
 0x65b   : > { %5291 = vmatpush3.bf16.msra.mxu0 %v5672_v41 }
 0x65c   : > { %5316 = vmatprep.subr.bf16.mxu0 %v6422_v0 }
 0x704   : > { %v2763_v2 = vpop.f32.mrb[24].mxu1 }
 0x705   : > { %v5256_v4 = vpop.f32.mrb[25].mxu1 }
 0x706   : > { %v2766_v5 = vpop.f32.mrb[26].mxu1 }
 0x707   : > { %v5257_v6 = vpop.f32.mrb[27].mxu1 }
 0x708   : > { %v4920_v6 = vld [vmem:[#allocation18] ss:$0 sm:$0xff] }
 0x70c   : > { %v2809_v8 = vpop.f32.mrb[28].mxu1 }
 0x70d   : > { %v5262_v62 = vpop.f32.mrb[29].mxu1 }
 0x70e   : > { %v2812_v9 = vpop.f32.mrb[30].mxu1 }
 0x70f   : > { %v5263_v10 = vpop.f32.mrb[31].mxu1 }
 0x714   : > { %v2855_v11 = vpop.f32.mrb[32].mxu1 }
 0x715   : > { %v2907_v56 = vcombine.low %v2763_v2, %v2855_v11  ;;  %v2908_v12 = vcombine.high %v2763_v2, %v2855_v11  ;;  %v5268_v14 = vpop.f32.mrb[33].mxu1 }
 0x716   : > { %v2858_v15 = vpop.f32.mrb[34].mxu1  ;;  %v4877_v14 = vld [vmem:[#allocation27] ss:$0 sm:$0xff] }
 0x717   : > { %v5269_v16 = vpop.f32.mrb[35].mxu1  ;;  %v2915_v22 = vrot.slane %v2907_v56, %v7218_v7  ;;  %v2922_v23 = vrot.slane %v2908_v12, %v7218_v7  ;;  %v5767_v56 = vld [vmem:[%s7086_s26] sm:$0xff]  ;;  %v1775_v15 = vadd.f32 %v4877_v14, %v7201_v50  ;;  %v5676_v50 = vld [vmem:[#allocation23 + $0x18] sm:$0xff]   ;;  %s7811_s26 = sld [smem:[#allocation76_spill]] }
 0x718   : > { %v5673_v16 = vld [vmem:[#allocation23] sm:$0xff]  }
 0x719   : > { %5297 = vmatpush3.bf16.msra.mxu1 %v5673_v16 }
 0x71a   : > { %5298 = vmatprep.subr.bf16.mxu1 %v6422_v0 }
 0x71c   : > { %v2901_v17 = vpop.f32.mrb[36].mxu1 }
 0x71d   : > { %v2923_v18 = vcombine.low %v2809_v8, %v2901_v17  ;;  %v2924_v19 = vcombine.high %v2809_v8, %v2901_v17  ;;  %v5274_v20 = vpop.f32.mrb[37].mxu1  ;;  %v5674_v17 = vld [vmem:[#allocation23 + $0x8] sm:$0xff]  }
 0x71e   : > { %v2904_v21 = vpop.f32.mrb[38].mxu1  ;;  %5299 = vmatpush3.bf16.msra.mxu1 %v5674_v17 }
 0x71f   : > { %v2931_v24 = vrot.slane %v2923_v18, %v7218_v7  ;;  %v2938_v25 = vrot.slane %v2924_v19, %v7218_v7  ;;  %v5275_v26 = vpop.f32.mrb[39].mxu1  ;;  %5300 = vmatprep.subr.bf16.mxu1 %v6422_v0 }
 0x720   : > { %v5680_v26 = vld [vmem:[#allocation23 + $0x38] sm:$0xff]  }
 0x721   : > { %v2939_v27 = vcombine.low %v2915_v22, %v2931_v24  ;;  %v2940_v28 = vcombine.high %v2915_v22, %v2931_v24  ;;  %v2955_v29 = vcombine.low %v2922_v23, %v2938_v25  ;;  %v2956_v30 = vcombine.high %v2922_v23, %v2938_v25  ;;  %v5675_v22 = vld [vmem:[#allocation23 + $0x10] sm:$0xff]   ;;  %v5677_v23 = vld [vmem:[#allocation23 + $0x20] sm:$0xff]   ;;  %v5678_v24 = vld [vmem:[#allocation23 + $0x28] sm:$0xff]  }
 0x722   : > { %5301 = vmatpush3.bf16.msra.mxu1 %v5675_v22  ;;  %v5679_v25 = vld [vmem:[#allocation23 + $0x30] sm:$0xff]  }
 0x723   : > { %v2947_v61 = vrot.slane %v2939_v27, %v7221_v13  ;;  %v2954_v33 = vrot.slane %v2940_v28, %v7221_v13  ;;  %v2963_v34 = vrot.slane %v2955_v29, %v7221_v13  ;;  %v2970_v35 = vrot.slane %v2956_v30, %v7221_v13  ;;  %5302 = vmatprep.subr.bf16.mxu1 %v6422_v0 }
 0x725   : > { %v2975_v36 = vcombine.low %v2947_v61, %v2954_v33  ;;  %v4918_v38 = vcombine.high %v2947_v61, %v2954_v33  ;;  %v2991_v39 = vcombine.low %v2963_v34, %v2970_v35  ;;  %v4919_v40 = vcombine.high %v2963_v34, %v2970_v35 }
 0x726   : > { %5303 = vmatpush3.bf16.msra.mxu1 %v5676_v50 }
 0x727   : > { %v2982_v42 = vrot.slane %v2975_v36, %v7218_v7  ;;  %v2990_v43 = vrot.slane %v4918_v38, %v7218_v7  ;;  %v2998_v44 = vrot.slane %v2991_v39, %v7218_v7  ;;  %v3006_v45 = vrot.slane %v4919_v40, %v7218_v7  ;;  %5304 = vmatprep.subr.bf16.mxu1 %v6422_v0 }
 0x729   : > { %v3008_v32 = vcombine.high %v2982_v42, %v2990_v43  ;;  %v3024_v46 = vcombine.high %v2998_v44, %v3006_v45  ;;  %v3007_v48 = vcombine.low %v2982_v42, %v2990_v43  ;;  %v3023_v51 = vcombine.low %v2998_v44, %v3006_v45 }
 0x72a   : > { %5305 = vmatpush3.bf16.msra.mxu1 %v5677_v23 }
 0x72b   : > { %v3022_v52 = vrot.slane %v3008_v32, %v7221_v13  ;;  %v3038_v53 = vrot.slane %v3024_v46, %v7221_v13  ;;  %v3015_v37 = vrot.slane %v3007_v48, %v7221_v13  ;;  %v3031_v54 = vrot.slane %v3023_v51, %v7221_v13  ;;  %5306 = vmatprep.subr.bf16.mxu1 %v6422_v0 }
 0x72d   : > { %v3041_v55 = vcombine.low %v3022_v52, %v3038_v53  ;;  %v3040_v57 = vcombine.high %v3015_v37, %v3031_v54  ;;  %v3042_v49 = vcombine.high %v3022_v52, %v3038_v53  ;;  %v3039_v58 = vcombine.low %v3015_v37, %v3031_v54 }
 0x72e   : > { %5307 = vmatpush3.bf16.msra.mxu1 %v5678_v24 }
 0x72f   : > { %3048 = vrot.lane.b32.xlu1 %v3041_v55, %s6426_s4  ;;  %3044 = vrot.lane.b32.xlu0 %v3040_v57, %s6425_s27 }
 0x730   : > { %5308 = vmatprep.subr.bf16.mxu1 %v6422_v0 }
 0x732   : > { %5309 = vmatpush3.bf16.msra.mxu1 %v5679_v25  ;;  %v4931_v25 = vld [vmem:[#allocation24] ss:$0 sm:$0xff] }
 0x733   : > { %3052 = vrot.lane.b32.xlu1 %v3042_v49, %s6424_s19  ;;  %5310 = vmatprep.subr.bf16.mxu1 %v6422_v0 }
 0x736   : > { %5311 = vmatpush3.bf16.msra.mxu1 %v5680_v26 }
 0x737   : > { %5322 = vmatprep.subr.bf16.mxu1 %v6422_v0 }
 0x7a1   : > { %v3049_v59 = vpop.permute.xlu1 %3048  ;;  %v3045_v60 = vpop.permute.xlu0 %3044 }
 0x7a2   : > { %v3055_v63 = vsel %vm2476_vm2, %v3039_v58, %v3045_v60  ;;  %v4929_v60 = vld [vmem:[#allocation20] ss:$0 sm:$0xff] }
 0x7a3   : > { %v3057_v2 = vsel %vm3056_vm6, %v3055_v63, %v3049_v59 }
 0x7a5   : > { %v3053_v1 = vpop.permute.xlu1 %3052 }
 0x7a6   : > { %v3059_v4 = vsel %vm3058_vm7, %v3057_v2, %v3053_v1 }
 0x7a7   : > { %v3060_v5 = vpack.c.bf16 %v3059_v4, %v3059_v4 }
 0x7a9   : > { %5293 = vmatmul.mubr.bf16.vlgmr.msra.gmra.mrb[12].mxu0 %v3060_v5 }
 0x7aa   : > { %5318 = vmatprep.mubr.msk.bf16.mxu0 %vm6423_vm0, %v6422_v0 }
 0x87c   : > { %v3166_v8 = vpop.f32.mrb[12].mxu0 }
 0x87d   : > { %v3167_v62 = vadd.f32 %v4920_v6, %v3166_v8  ;;  %v5294_v9 = vpop.f32.mrb[13].mxu0  ;;  %v4930_v6 = vld [vmem:[#allocation21] ss:$0 sm:$0xff] }
 0x87e   : > { %v3169_v10 = vpop.f32.mrb[14].mxu0 }
 0x87f   : > { %v5295_v11 = vpop.f32.mrb[15].mxu0  ;;  %v3172_v12 = vadd.f32 %v5767_v56, %v3167_v62 }
 0x881   : > { %3175 = vadd.xlane.f32.xlu0 %v3172_v12 }
 0x897   : > { %1781 = vrot.lane.b32.xlu0 %v1775_v15, %s6424_s19 }
 0x89b   : > { %1787 = vrot.lane.b32.xlu0 %v1775_v15, %s6425_s27 }
 0x90e   : > { %v3176_v18 = vpop.xlane.xlu0 %3175 }
 0x90f   : > { %v3178_v19 = vmul.f32 0.0078125, %v3176_v18 }
 0x911   : > { %v3179_v20 = vsub.f32 %v3172_v12, %v3178_v19 }
 0x912   : > { %v1782_v27 = vpop.permute.xlu0 %1781 }
 0x913   : > { %v3180_v21 = vmul.f32 %v3179_v20, %v3179_v20 }
 0x915   : > { %3181 = vadd.xlane.f32.xlu1 %v3180_v21 }
 0x916   : > { %v1788_v28 = vpop.permute.xlu0 %1787 }
 0x917   : > { %v1806_v31 = vcombine.low %v1782_v27, %v1788_v28  ;;  %v1807_v61 = vcombine.high %v1782_v27, %v1788_v28 }
 0x919   : > { %v1814_v38 = vrot.slane %v1806_v31, %v7218_v7  ;;  %v1821_v39 = vrot.slane %v1807_v61, %v7218_v7 }
 0x926   : > { %1784 = vrot.lane.b32.xlu1 %v1775_v15, %s6426_s4 }
 0x9a2   : > { %v3182_v29 = vpop.xlane.xlu1 %3181 }
 0x9a3   : > { %v3183_v30 = vmul.f32 0.0078125, %v3182_v29 }
 0x9a5   : > { %v3184_v33 = vadd.f32 1e-05, %v3183_v30 }
 0x9a6   : > { %v1785_v34 = vpop.permute.xlu1 %1784 }
 0x9a7   : > { %5745 = vrsqrt.f32 %v3184_v33  ;;  %v1790_v35 = vcombine.low %v1775_v15, %v1785_v34  ;;  %v1791_v36 = vcombine.high %v1775_v15, %v1785_v34 }
 0x9a9   : > { %v1798_v40 = vrot.slane %v1790_v35, %v7218_v7  ;;  %v1805_v41 = vrot.slane %v1791_v36, %v7218_v7 }
 0x9ab   : > { %v1822_v42 = vcombine.low %v1798_v40, %v1814_v38  ;;  %v1823_v43 = vcombine.high %v1798_v40, %v1814_v38  ;;  %v1838_v44 = vcombine.low %v1805_v41, %v1821_v39  ;;  %v1839_v45 = vcombine.high %v1805_v41, %v1821_v39 }
 0x9ad   : > { %v1830_v32 = vrot.slane %v1822_v42, %v7221_v13  ;;  %v1837_v46 = vrot.slane %v1823_v43, %v7221_v13  ;;  %v1846_v48 = vrot.slane %v1838_v44, %v7221_v13  ;;  %v1853_v51 = vrot.slane %v1839_v45, %v7221_v13 }
 0x9af   : > { %v1858_v52 = vcombine.low %v1830_v32, %v1837_v46  ;;  %v4886_v53 = vcombine.high %v1830_v32, %v1837_v46  ;;  %v1874_v37 = vcombine.low %v1846_v48, %v1853_v51  ;;  %v4887_v54 = vcombine.high %v1846_v48, %v1853_v51 }
 0x9b1   : > { %v5746_v55 = vpop.eup %5745  ;;  %v1865_v57 = vrot.slane %v1858_v52, %v7218_v7  ;;  %v1873_v49 = vrot.slane %v4886_v53, %v7218_v7  ;;  %v1881_v58 = vrot.slane %v1874_v37, %v7218_v7  ;;  %v1889_v59 = vrot.slane %v4887_v54, %v7218_v7 }
 0x9b2   : > { %v3186_v63 = vmul.f32 %v5746_v55, %v3179_v20 }
 0x9b3   : > { %v1890_v1 = vcombine.low %v1865_v57, %v1873_v49  ;;  %v1891_v2 = vcombine.high %v1865_v57, %v1873_v49  ;;  %v1906_v4 = vcombine.low %v1881_v58, %v1889_v59  ;;  %v1907_v5 = vcombine.high %v1881_v58, %v1889_v59 }
 0x9b4   : > { %v3193_v8 = vmul.f32 %v4929_v60, %v3186_v63 }
 0x9b5   : > { %v1898_v62 = vrot.slane %v1890_v1, %v7221_v13  ;;  %v1905_v9 = vrot.slane %v1891_v2, %v7221_v13  ;;  %v1914_v10 = vrot.slane %v1906_v4, %v7221_v13  ;;  %v1921_v11 = vrot.slane %v1907_v5, %v7221_v13 }
 0x9b6   : > { %v7416_v56 = vadd.f32 %v4930_v6, %v3193_v8 }
 0x9b7   : > { %v1922_v12 = vcombine.low %v1898_v62, %v1914_v10  ;;  %v1923_v14 = vcombine.high %v1898_v62, %v1914_v10  ;;  %v1924_v15 = vcombine.low %v1905_v9, %v1921_v11  ;;  %v1925_v16 = vcombine.high %v1905_v9, %v1921_v11 }
 0x9b8   : > { %v3201_v17 = vpack.c.bf16 %v7416_v56, %v7416_v56 }
 0x9b9   : > { %v1926_v18 = vpack.c.bf16 %v1922_v12, %v1922_v12  ;;  %v1927_v19 = vpack.c.bf16 %v1923_v14, %v1923_v14  ;;  %v1928_v20 = vpack.c.bf16 %v1924_v15, %v1924_v15  ;;  %v1929_v21 = vpack.c.bf16 %v1925_v16, %v1925_v16 }
 0x9ba   : > { %5313 = vmatmul.mubr.bf16.vlgmr.msra.gmra.mrb[40].mxu1 %v3201_v17 }
 0x9bb   : > { %1930 = vst.msk [vmem:[#allocation4] sm:$0xf] %vm1398_vm1, %v1926_v18  ;;  %1931 = vst.msk [vmem:[#allocation4 + $0x4] sm:$0xf] %vm1398_vm1, %v1927_v19  ;;  %5324 = vmatprep.mubr.msk.bf16.mxu1 %vm6423_vm0, %v6422_v0 }
 0x9bc   : > { %1932 = vst.msk [vmem:[#allocation4 + $0x8] sm:$0xf] %vm1398_vm1, %v1928_v20  ;;  %1933 = vst.msk [vmem:[#allocation4 + $0xc] sm:$0xf] %vm1398_vm1, %v1929_v21 }
 0x9c2   : > { %v3463_v22 = vld [vmem:[#allocation4] sm:$0xf]  ;;  %v3464_v50 = vld [vmem:[#allocation4 + $0x4] sm:$0xf] }
 0x9c3   : > { %v3471_v23 = vsel %vm2476_vm2, %v3463_v22, 0  ;;  %v3517_v24 = vsel %vm2476_vm2, %v3464_v50, 0  ;;  %v3465_v62 = vld [vmem:[#allocation4 + $0x8] sm:$0xf]  ;;  %v3466_v9 = vld [vmem:[#allocation4 + $0xc] sm:$0xf] }
 0x9c4   : > { %5317 = vmatpush3.bf16.xpose.msra.mxu0 %v3471_v23  ;;  %5323 = vmatpush3.bf16.xpose.msra.mxu1 %v3517_v24  ;;  %v3563_v15 = vsel %vm2476_vm2, %v3465_v62, 0  ;;  %v3609_v16 = vsel %vm2476_vm2, %v3466_v9, 0 }
 0x9c5   : > { %5328 = vmatprep.subr.bf16.mxu0 %v6422_v0  ;;  %5334 = vmatprep.subr.bf16.mxu1 %v6422_v0 }
 0xa8d   : > { %v3307_v26 = vpop.f32.mrb[40].mxu1 }
 0xa8e   : > { %v3308_v27 = vadd.f32 %v4931_v25, %v3307_v26  ;;  %v5314_v28 = vpop.f32.mrb[41].mxu1 }
 0xa8f   : > { %v3310_v29 = vpop.f32.mrb[42].mxu1 }
 0xa90   : > { %3317 = vrot.lane.b32.xlu0 %v3308_v27, %s6426_s4  ;;  %3314 = vrot.lane.b32.xlu1 %v3308_v27, %s6424_s19  ;;  %v5315_v30 = vpop.f32.mrb[43].mxu1 }
 0xa94   : > { %3320 = vrot.lane.b32.xlu1 %v3308_v27, %s6425_s27 }
 0xb02   : > { %v3315_v31 = vpop.permute.xlu1 %3314  ;;  %v3318_v61 = vpop.permute.xlu0 %3317 }
 0xb03   : > { %v3323_v33 = vcombine.low %v3308_v27, %v3318_v61  ;;  %v3324_v34 = vcombine.high %v3308_v27, %v3318_v61 }
 0xb05   : > { %v3331_v39 = vrot.slane %v3323_v33, %v7218_v7  ;;  %v3338_v40 = vrot.slane %v3324_v34, %v7218_v7 }
 0xb06   : > { %v3321_v35 = vpop.permute.xlu1 %3320 }
 0xb07   : > { %v3339_v36 = vcombine.low %v3315_v31, %v3321_v35  ;;  %v3340_v38 = vcombine.high %v3315_v31, %v3321_v35 }
 0xb09   : > { %v3347_v41 = vrot.slane %v3339_v36, %v7218_v7  ;;  %v3354_v42 = vrot.slane %v3340_v38, %v7218_v7 }
 0xb0b   : > { %v3355_v43 = vcombine.low %v3331_v39, %v3347_v41  ;;  %v3356_v44 = vcombine.high %v3331_v39, %v3347_v41  ;;  %v3371_v45 = vcombine.low %v3338_v40, %v3354_v42  ;;  %v3372_v32 = vcombine.high %v3338_v40, %v3354_v42 }
 0xb0d   : > { %v3363_v46 = vrot.slane %v3355_v43, %v7221_v13  ;;  %v3370_v48 = vrot.slane %v3356_v44, %v7221_v13  ;;  %v3379_v51 = vrot.slane %v3371_v45, %v7221_v13  ;;  %v3386_v52 = vrot.slane %v3372_v32, %v7221_v13  ;;  %v4888_v45 = vld [vmem:[#allocation30] ss:$0 sm:$0xff] }
 0xb0e   : > { %v2040_v32 = vadd.f32 %v4888_v45, %v7280_v47 }
 0xb0f   : > { %v3391_v53 = vcombine.low %v3363_v46, %v3370_v48  ;;  %v4940_v37 = vcombine.high %v3363_v46, %v3370_v48  ;;  %v3407_v54 = vcombine.low %v3379_v51, %v3386_v52  ;;  %v4941_v55 = vcombine.high %v3379_v51, %v3386_v52 }
 0xb11   : > { %v3398_v57 = vrot.slane %v3391_v53, %v7218_v7  ;;  %v3406_v49 = vrot.slane %v4940_v37, %v7218_v7  ;;  %v3414_v58 = vrot.slane %v3407_v54, %v7218_v7  ;;  %v3422_v59 = vrot.slane %v4941_v55, %v7218_v7 }
 0xb13   : > { %v3423_v60 = vcombine.low %v3398_v57, %v3406_v49  ;;  %v3439_v63 = vcombine.low %v3414_v58, %v3422_v59  ;;  %v3424_v1 = vcombine.high %v3398_v57, %v3406_v49  ;;  %v3440_v2 = vcombine.high %v3414_v58, %v3422_v59 }
 0xb15   : > { %v3431_v4 = vrot.slane %v3423_v60, %v7221_v13  ;;  %v3447_v5 = vrot.slane %v3439_v63, %v7221_v13  ;;  %v3438_v12 = vrot.slane %v3424_v1, %v7221_v13  ;;  %v3454_v14 = vrot.slane %v3440_v2, %v7221_v13 }
 0xb17   : > { %v3455_v6 = vcombine.low %v3431_v4, %v3447_v5  ;;  %v3456_v8 = vcombine.high %v3431_v4, %v3447_v5  ;;  %v3457_v17 = vcombine.low %v3438_v12, %v3454_v14  ;;  %v3458_v18 = vcombine.high %v3438_v12, %v3454_v14 }
 0xb19   : > { %v3459_v10 = vpack.c.bf16 %v3455_v6, %v3455_v6  ;;  %v3460_v11 = vpack.c.bf16 %v3456_v8, %v3456_v8  ;;  %v3461_v19 = vpack.c.bf16 %v3457_v17, %v3457_v17  ;;  %v3462_v20 = vpack.c.bf16 %v3458_v18, %v3458_v18 }
 0xb1b   : > { %5319 = vmatmul.mubr.msk.bf16.vlgmr.msra.gmra.mrb[16].mxu0 %vm2476_vm2, %v3459_v10  ;;  %5325 = vmatmul.mubr.msk.bf16.vlgmr.msra.gmra.mrb[44].mxu1 %vm2476_vm2, %v3460_v11 }
 0xb1c   : > { %5329 = vmatpush3.bf16.xpose.msra.mxu0 %v3563_v15  ;;  %5335 = vmatpush3.bf16.xpose.msra.mxu1 %v3609_v16 }
 0xb1d   : > { %5330 = vmatprep.mubr.msk.bf16.mxu0 %vm6423_vm0, %v6422_v0  ;;  %5336 = vmatprep.mubr.msk.bf16.mxu1 %vm6423_vm0, %v6422_v0 }
 0xb1e   : > { %5340 = vmatprep.subr.bf16.mxu0 %v6422_v0  ;;  %5346 = vmatprep.subr.bf16.mxu1 %v6422_v0 }
 0xb23   : > { %5331 = vmatmul.mubr.msk.bf16.vlgmr.msra.gmra.mrb[20].mxu0 %vm2476_vm2, %v3461_v19  ;;  %5337 = vmatmul.mubr.msk.bf16.vlgmr.msra.gmra.mrb[48].mxu1 %vm2476_vm2, %v3462_v20 }
 0xb24   : > { %5342 = vmatprep.mubr.msk.bf16.mxu0 %vm6423_vm0, %v6422_v0  ;;  %5348 = vmatprep.mubr.msk.bf16.mxu1 %vm6423_vm0, %v6422_v0 }
 0xbee   : > { %v3507_v21 = vpop.f32.mrb[16].mxu0  ;;  %v3553_v22 = vpop.f32.mrb[44].mxu1 }
 0xbef   : > { %v3651_v50 = vmul.f32 0.17677669, %v3507_v21  ;;  %v3652_v23 = vmul.f32 0.17677669, %v3553_v22  ;;  %v5320_v24 = vpop.f32.mrb[17].mxu0  ;;  %v5326_v25 = vpop.f32.mrb[45].mxu1 }
 0xbf0   : > { %v3510_v26 = vpop.f32.mrb[18].mxu0  ;;  %v3556_v27 = vpop.f32.mrb[46].mxu1 }
 0xbf1   : > { %v5321_v28 = vpop.f32.mrb[19].mxu0  ;;  %v5327_v29 = vpop.f32.mrb[47].mxu1  ;;  %v3658_v30 = vsel %vm2669_vm4, %v3652_v23, -inf  ;;  %v3655_v31 = vsel %vm2669_vm4, %v3651_v50, -inf }
 0xbf2   : > { %3659 = vmax.xlane.f32.xlu1 %v3658_v30  ;;  %3656 = vmax.xlane.f32.xlu0 %v3655_v31 }
 0xbf6   : > { %v3599_v61 = vpop.f32.mrb[20].mxu0  ;;  %v3645_v33 = vpop.f32.mrb[48].mxu1 }
 0xbf7   : > { %v3653_v34 = vmul.f32 0.17677669, %v3599_v61  ;;  %v5332_v35 = vpop.f32.mrb[21].mxu0  ;;  %v5338_v36 = vpop.f32.mrb[49].mxu1  ;;  %v3654_v40 = vmul.f32 0.17677669, %v3645_v33 }
 0xbf8   : > { %v3602_v38 = vpop.f32.mrb[22].mxu0  ;;  %v3648_v39 = vpop.f32.mrb[50].mxu1 }
 0xbf9   : > { %v5333_v41 = vpop.f32.mrb[23].mxu0  ;;  %v5339_v42 = vpop.f32.mrb[51].mxu1  ;;  %v3661_v43 = vsel %vm2669_vm4, %v3653_v34, -inf  ;;  %v3664_v44 = vsel %vm2669_vm4, %v3654_v40, -inf }
 0xbfa   : > { %3662 = vmax.xlane.f32.xlu0 %v3661_v43 }
 0xbfe   : > { %3665 = vmax.xlane.f32.xlu0 %v3664_v44 }
 0xc03   : > { %2046 = vrot.lane.b32.xlu1 %v2040_v32, %s6424_s19 }
 0xc07   : > { %2052 = vrot.lane.b32.xlu1 %v2040_v32, %s6425_s27 }
 0xc14   : > { %2049 = vrot.lane.b32.xlu0 %v2040_v32, %s6426_s4 }
 0xc7f   : > { %v3660_v46 = vpop.xlane.xlu1 %3659  ;;  %v3657_v48 = vpop.xlane.xlu0 %3656 }
 0xc80   : > { %v3668_v51 = vsub.f32 %v3652_v23, %v3660_v46  ;;  %v3667_v52 = vsub.f32 %v3651_v50, %v3657_v48 }
 0xc82   : > { %v3673_v53 = vmul.f32 1.442695, %v3668_v51  ;;  %v3671_v37 = vmul.f32 1.442695, %v3667_v52 }
 0xc83   : > { %v2047_v54 = vpop.permute.xlu1 %2046 }
 0xc84   : > { %5747 = vpow2.f32 %v3673_v53 }
 0xc85   : > { %5749 = vpow2.f32 %v3671_v37 }
 0xc87   : > { %v3663_v55 = vpop.xlane.xlu0 %3662  ;;  %v2053_v58 = vpop.permute.xlu1 %2052 }
 0xc88   : > { %v3669_v57 = vsub.f32 %v3653_v34, %v3663_v55  ;;  %v2071_v63 = vcombine.low %v2047_v54, %v2053_v58  ;;  %v2072_v1 = vcombine.high %v2047_v54, %v2053_v58 }
 0xc8a   : > { %v3675_v49 = vmul.f32 1.442695, %v3669_v57  ;;  %v2079_v10 = vrot.slane %v2071_v63, %v7218_v7  ;;  %v2086_v11 = vrot.slane %v2072_v1, %v7218_v7 }
 0xc8b   : > { %v3666_v47 = vpop.xlane.xlu0 %3665 }
 0xc8c   : > { %5751 = vpow2.f32 %v3675_v49  ;;  %v3670_v59 = vsub.f32 %v3654_v40, %v3666_v47 }
 0xc8e   : > { %v7473_v60 = vpop.eup %5747  ;;  %v3677_v2 = vmul.f32 1.442695, %v3670_v59 }
 0xc8f   : > { %v7475_v4 = vpop.eup %5749  ;;  %v2050_v5 = vpop.permute.xlu0 %2049  ;;  %v3682_v6 = vsel %vm2669_vm4, %v7473_v60, 0.0 }
 0xc90   : > { %5753 = vpow2.f32 %v3677_v2  ;;  %v2055_v8 = vcombine.low %v2040_v32, %v2050_v5  ;;  %v2056_v62 = vcombine.high %v2040_v32, %v2050_v5  ;;  %v3679_v9 = vsel %vm2669_vm4, %v7475_v4, 0.0  ;;  %3683 = vadd.xlane.f32.xlu0 %v3682_v6 }
 0xc91   : > { %3680 = vadd.xlane.f32.xlu1 %v3679_v9 }
 0xc92   : > { %v2063_v12 = vrot.slane %v2055_v8, %v7218_v7  ;;  %v2070_v14 = vrot.slane %v2056_v62, %v7218_v7 }
 0xc94   : > { %v2087_v15 = vcombine.low %v2063_v12, %v2079_v10  ;;  %v2088_v16 = vcombine.high %v2063_v12, %v2079_v10  ;;  %v2103_v17 = vcombine.low %v2070_v14, %v2086_v11  ;;  %v2104_v18 = vcombine.high %v2070_v14, %v2086_v11 }
 0xc96   : > { %v7485_v19 = vpop.eup %5751  ;;  %v2095_v20 = vrot.slane %v2087_v15, %v7221_v13  ;;  %v2102_v21 = vrot.slane %v2088_v16, %v7221_v13  ;;  %v2111_v22 = vrot.slane %v2103_v17, %v7221_v13  ;;  %v2118_v50 = vrot.slane %v2104_v18, %v7221_v13  ;;  %v5681_v16 = vld [vmem:[%s7802_s0] sm:$0xff]   ;;  %v5682_v17 = vld [vmem:[%s7802_s0 + $0x8] sm:$0xff]   ;;  %v5683_v18 = vld [vmem:[%s7802_s0 + $0x10] sm:$0xff]  }
 0xc97   : > { %v3685_v23 = vsel %vm2669_vm4, %v7485_v19, 0.0 }
 0xc98   : > { %v2123_v24 = vcombine.low %v2095_v20, %v2102_v21  ;;  %v4897_v25 = vcombine.high %v2095_v20, %v2102_v21  ;;  %v2139_v26 = vcombine.low %v2111_v22, %v2118_v50  ;;  %v4898_v27 = vcombine.high %v2111_v22, %v2118_v50  ;;  %3686 = vadd.xlane.f32.xlu0 %v3685_v23  ;;  %v5685_v20 = vld [vmem:[%s7802_s0 + $0x20] sm:$0xff]   ;;  %v5686_v21 = vld [vmem:[%s7802_s0 + $0x28] sm:$0xff]  }
 0xc9a   : > { %v7493_v28 = vpop.eup %5753  ;;  %v2130_v29 = vrot.slane %v2123_v24, %v7218_v7  ;;  %v2138_v30 = vrot.slane %v4897_v25, %v7218_v7  ;;  %v2146_v31 = vrot.slane %v2139_v26, %v7218_v7  ;;  %v2154_v61 = vrot.slane %v4898_v27, %v7218_v7 }
 0xc9b   : > { %v3688_v33 = vsel %vm2669_vm4, %v7493_v28, 0.0 }
 0xc9c   : > { %v2155_v34 = vcombine.low %v2130_v29, %v2138_v30  ;;  %v2156_v35 = vcombine.high %v2130_v29, %v2138_v30  ;;  %v2171_v36 = vcombine.low %v2146_v31, %v2154_v61  ;;  %v2172_v38 = vcombine.high %v2146_v31, %v2154_v61  ;;  %3689 = vadd.xlane.f32.xlu1 %v3688_v33 }
 0xc9e   : > { %v2163_v39 = vrot.slane %v2155_v34, %v7221_v13  ;;  %v2170_v40 = vrot.slane %v2156_v35, %v7221_v13  ;;  %v2179_v41 = vrot.slane %v2171_v36, %v7221_v13  ;;  %v2186_v42 = vrot.slane %v2172_v38, %v7221_v13 }
 0xca0   : > { %v2187_v43 = vcombine.low %v2163_v39, %v2179_v41  ;;  %v2188_v44 = vcombine.high %v2163_v39, %v2179_v41  ;;  %v2189_v45 = vcombine.low %v2170_v40, %v2186_v42  ;;  %v2190_v32 = vcombine.high %v2170_v40, %v2186_v42 }
 0xca2   : > { %v2191_v46 = vpack.c.bf16 %v2187_v43, %v2187_v43  ;;  %v2192_v48 = vpack.c.bf16 %v2188_v44, %v2188_v44  ;;  %v2193_v51 = vpack.c.bf16 %v2189_v45, %v2189_v45  ;;  %v2194_v52 = vpack.c.bf16 %v2190_v32, %v2190_v32 }
 0xca4   : > { %2195 = vst.msk [vmem:[#allocation5] sm:$0xf] %vm1398_vm1, %v2191_v46  ;;  %2196 = vst.msk [vmem:[#allocation5 + $0x4] sm:$0xf] %vm1398_vm1, %v2192_v48 }
 0xca5   : > { %2197 = vst.msk [vmem:[#allocation5 + $0x8] sm:$0xf] %vm1398_vm1, %v2193_v51  ;;  %2198 = vst.msk [vmem:[#allocation5 + $0xc] sm:$0xf] %vm1398_vm1, %v2194_v52  ;;  %v5687_v52 = vld [vmem:[%s7802_s0 + $0x30] sm:$0xff]  }
 0xcab   : > { %v3703_v53 = vld [vmem:[#allocation5] sm:$0xf]  ;;  %v3704_v37 = vld [vmem:[#allocation5 + $0x4] sm:$0xf] }
 0xcac   : > { %v3711_v54 = vsel %vm2725_vm5, %v3703_v53, 0  ;;  %v3757_v55 = vsel %vm2725_vm5, %v3704_v37, 0  ;;  %v3706_v5 = vld [vmem:[#allocation5 + $0xc] sm:$0xf]  ;;  %v3705_v8 = vld [vmem:[#allocation5 + $0x8] sm:$0xf] }
 0xcad   : > { %5341 = vmatpush3.bf16.msra.mxu0 %v3711_v54  ;;  %5347 = vmatpush3.bf16.msra.mxu1 %v3757_v55  ;;  %v3849_v9 = vsel %vm2725_vm5, %v3706_v5, 0  ;;  %v3803_v10 = vsel %vm2725_vm5, %v3705_v8, 0 }
 0xcae   : > { %5352 = vmatprep.subr.bf16.mxu0 %v6422_v0  ;;  %5358 = vmatprep.subr.bf16.mxu1 %v6422_v0 }
 0xd1d   : > { %v3684_v57 = vpop.xlane.xlu0 %3683 }
 0xd1e   : > { %v3681_v49 = vpop.xlane.xlu1 %3680  ;;  %5755 = vrcp.f32 %v3684_v57 }
 0xd1f   : > { %5757 = vrcp.f32 %v3681_v49 }
 0xd25   : > { %v3687_v58 = vpop.xlane.xlu0 %3686 }
 0xd26   : > { %5759 = vrcp.f32 %v3687_v58 }
 0xd28   : > { %v5756_v47 = vpop.eup %5755 }
 0xd29   : > { %v5758_v59 = vpop.eup %5757  ;;  %v3696_v63 = vmul.f32 %v5756_v47, %v7473_v60  ;;  %v3690_v1 = vpop.xlane.xlu1 %3689 }
 0xd2a   : > { %v3695_v2 = vmul.f32 %v5758_v59, %v7475_v4  ;;  %5761 = vrcp.f32 %v3690_v1  ;;  %v5688_v59 = vld [vmem:[%s7802_s0 + $0x38] sm:$0xff]  }
 0xd2b   : > { %v3700_v6 = vpack.c.bf16 %v3696_v63, %v3696_v63 }
 0xd2c   : > { %v3699_v62 = vpack.c.bf16 %v3695_v2, %v3695_v2 }
 0xd2d   : > { %5349 = vmatmul.mubr.msk.bf16.vlgmr.msra.gmra.mrb[52].mxu1 %vm2669_vm4, %v3700_v6 }
 0xd2e   : > { %5343 = vmatmul.mubr.msk.bf16.vlgmr.msra.gmra.mrb[24].mxu0 %vm2669_vm4, %v3699_v62  ;;  %5359 = vmatpush3.bf16.msra.mxu1 %v3849_v9 }
 0xd2f   : > { %5353 = vmatpush3.bf16.msra.mxu0 %v3803_v10  ;;  %5354 = vmatprep.mubr.msk.bf16.mxu0 %vm6423_vm0, %v6422_v0 }
 0xd30   : > { %v5760_v60 = vpop.eup %5759  ;;  %5360 = vmatprep.mubr.msk.bf16.mxu1 %vm6423_vm0, %v6422_v0  ;;  %5364 = vmatprep.subr.bf16.mxu0 %v6422_v0 }
 0xd31   : > { %v3697_v4 = vmul.f32 %v5760_v60, %v7485_v19  ;;  %v5684_v19 = vld [vmem:[%s7802_s0 + $0x18] sm:$0xff]  }
 0xd33   : > { %v3701_v11 = vpack.c.bf16 %v3697_v4, %v3697_v4 }
 0xd34   : > { %v5762_v12 = vpop.eup %5761 }
 0xd35   : > { %v3698_v14 = vmul.f32 %v5762_v12, %v7493_v28 }
 0xd36   : > { %5355 = vmatmul.mubr.msk.bf16.vlgmr.msra.gmra.mrb[28].mxu0 %vm2669_vm4, %v3701_v11 }
 0xd37   : > { %v3702_v15 = vpack.c.bf16 %v3698_v14, %v3698_v14  ;;  %5380 = vmatprep.mubr.msk.bf16.mxu0 %vm6423_vm0, %v6422_v0  ;;  %5365 = vmatpush3.bf16.msra.mxu0 %v5681_v16 }
 0xd38   : > { %5366 = vmatprep.subr.bf16.mxu0 %v6422_v0 }
 0xd39   : > { %5361 = vmatmul.mubr.msk.bf16.vlgmr.msra.gmra.mrb[56].mxu1 %vm2669_vm4, %v3702_v15 }
 0xd3b   : > { %5367 = vmatpush3.bf16.msra.mxu0 %v5682_v17 }
 0xd3c   : > { %5368 = vmatprep.subr.bf16.mxu0 %v6422_v0 }
 0xd3f   : > { %5369 = vmatpush3.bf16.msra.mxu0 %v5683_v18 }
 0xd40   : > { %5370 = vmatprep.subr.bf16.mxu0 %v6422_v0 }
 0xd43   : > { %5371 = vmatpush3.bf16.msra.mxu0 %v5684_v19 }
 0xd44   : > { %5372 = vmatprep.subr.bf16.mxu0 %v6422_v0 }
 0xd47   : > { %5373 = vmatpush3.bf16.msra.mxu0 %v5685_v20 }
 0xd48   : > { %5374 = vmatprep.subr.bf16.mxu0 %v6422_v0 }
 0xd4b   : > { %5375 = vmatpush3.bf16.msra.mxu0 %v5686_v21  ;;  %v4952_v21 = vld [vmem:[%s7803_s11] ss:$0 sm:$0xff]  ;;  %s4541_s11 = scalar_lea.sflag [#allocation8], %s7072_s13 }
 0xd4c   : > { %5376 = vmatprep.subr.bf16.mxu0 %v6422_v0 }
 0xd4f   : > { %5377 = vmatpush3.bf16.msra.mxu0 %v5687_v52  ;;  %v5715_v52 = vld [vmem:[#allocation33 + $0x48] sm:$0xff]  }
 0xd50   : > { %5378 = vmatprep.subr.bf16.mxu0 %v6422_v0 }
 0xd53   : > { %5379 = vmatpush3.bf16.msra.mxu0 %v5688_v59  ;;  %v5724_v59 = vld [vmem:[#allocation33 + $0x28] sm:$0xff]  }
 0xe00   : > { %v3793_v22 = vpop.f32.mrb[52].mxu1 }
 0xe01   : > { %v3747_v50 = vpop.f32.mrb[24].mxu0  ;;  %v5350_v23 = vpop.f32.mrb[53].mxu1 }
 0xe02   : > { %v5344_v24 = vpop.f32.mrb[25].mxu0  ;;  %v3796_v25 = vpop.f32.mrb[54].mxu1 }
 0xe03   : > { %v3750_v26 = vpop.f32.mrb[26].mxu0  ;;  %v5351_v27 = vpop.f32.mrb[55].mxu1 }
 0xe04   : > { %v5345_v28 = vpop.f32.mrb[27].mxu0  ;;  %v5689_v27 = vld [vmem:[#allocation32] ss:$8 sps:$4 sm:$0xff]  }
 0xe05   : > { %v5691_v28 = vld [vmem:[#allocation32 + $0x4] ss:$8 sps:$4 sm:$0xff]  }
 0xe06   : > { %4291 = vmatprep.subr.bf16.mxu1 %v5691_v28 }
 0xe07   : > { %4292 = vmatpush1.bf16.msra.mxu1 %v5689_v27  ;;  %v4979_v27 = vld [vmem:[%s7807_s10] ss:$0 sm:$0xff] }
 0xe09   : > { %v3839_v29 = vpop.f32.mrb[28].mxu0 }
 0xe0a   : > { %v3891_v30 = vcombine.low %v3747_v50, %v3839_v29  ;;  %v3892_v31 = vcombine.high %v3747_v50, %v3839_v29  ;;  %v5356_v61 = vpop.f32.mrb[29].mxu0  ;;  %v5694_v29 = vld [vmem:[#allocation32 + $0x14] ss:$8 sps:$4 sm:$0xff]  }
 0xe0b   : > { %v3842_v33 = vpop.f32.mrb[30].mxu0  ;;  %4293 = vmatprep.subr.bf16.mxu1 %v5694_v29  ;;  %v5695_v61 = vld [vmem:[#allocation32 + $0x20] ss:$8 sps:$4 sm:$0xff]  }
 0xe0c   : > { %v5357_v34 = vpop.f32.mrb[31].mxu0  ;;  %v3885_v35 = vpop.f32.mrb[56].mxu1  ;;  %v3899_v41 = vrot.slane %v3891_v30, %v7218_v7  ;;  %v3906_v42 = vrot.slane %v3892_v31, %v7218_v7  ;;  %v5692_v30 = vld [vmem:[#allocation32 + $0x10] ss:$8 sps:$4 sm:$0xff]   ;;  %v5697_v31 = vld [vmem:[#allocation32 + $0x24] ss:$8 sps:$4 sm:$0xff]  }
 0xe0d   : > { %v3907_v36 = vcombine.low %v3793_v22, %v3885_v35  ;;  %v3908_v38 = vcombine.high %v3793_v22, %v3885_v35  ;;  %v5362_v39 = vpop.f32.mrb[57].mxu1  ;;  %4294 = vmatpush1.bf16.msra.mxu1 %v5692_v30 }
 0xe0e   : > { %v3888_v40 = vpop.f32.mrb[58].mxu1  ;;  %4295 = vmatprep.subr.bf16.mxu1 %v5697_v31  ;;  %v5703_v39 = vld [vmem:[#allocation32 + $0x44] ss:$8 sps:$4 sm:$0xff]  }
 0xe0f   : > { %v3915_v43 = vrot.slane %v3907_v36, %v7218_v7  ;;  %v3922_v44 = vrot.slane %v3908_v38, %v7218_v7  ;;  %v5363_v45 = vpop.f32.mrb[59].mxu1  ;;  %v5700_v38 = vld [vmem:[#allocation32 + $0x34] ss:$8 sps:$4 sm:$0xff]   ;;  %v5701_v40 = vld [vmem:[#allocation32 + $0x40] ss:$8 sps:$4 sm:$0xff]  }
 0xe10   : > { %v5712_v45 = vld [vmem:[#allocation32 + $0x74] ss:$8 sps:$4 sm:$0xff]  }
 0xe11   : > { %v3923_v32 = vcombine.low %v3899_v41, %v3915_v43  ;;  %v3924_v46 = vcombine.high %v3899_v41, %v3915_v43  ;;  %v3939_v48 = vcombine.low %v3906_v42, %v3922_v44  ;;  %v3940_v51 = vcombine.high %v3906_v42, %v3922_v44  ;;  %4296 = vmatpush1.bf16.msra.mxu1 %v5695_v61  ;;  %v5706_v41 = vld [vmem:[#allocation32 + $0x54] ss:$8 sps:$4 sm:$0xff]   ;;  %v5704_v42 = vld [vmem:[#allocation32 + $0x50] ss:$8 sps:$4 sm:$0xff]   ;;  %v5707_v43 = vld [vmem:[#allocation32 + $0x60] ss:$8 sps:$4 sm:$0xff]  }
 0xe12   : > { %4297 = vmatprep.subr.bf16.mxu1 %v5700_v38  ;;  %v5709_v44 = vld [vmem:[#allocation32 + $0x64] ss:$8 sps:$4 sm:$0xff]  }
 0xe13   : > { %v3931_v53 = vrot.slane %v3923_v32, %v7221_v13  ;;  %v3938_v37 = vrot.slane %v3924_v46, %v7221_v13  ;;  %v3947_v54 = vrot.slane %v3939_v48, %v7221_v13  ;;  %v3954_v55 = vrot.slane %v3940_v51, %v7221_v13  ;;  %v5710_v46 = vld [vmem:[#allocation32 + $0x70] ss:$8 sps:$4 sm:$0xff]   ;;  %v5713_v48 = vld [vmem:[#allocation33 + $0x40] sm:$0xff]  }
 0xe14   : > { %v6430_v32 = vmov 0   ;;  %v5714_v51 = vld [vmem:[#allocation33] sm:$0xff]   ;;  %5106 = vmatprep.subr.bf16.mxu0 %v5713_v48 }
 0xe15   : > { %v3959_v57 = vcombine.low %v3931_v53, %v3938_v37  ;;  %v4950_v49 = vcombine.high %v3931_v53, %v3938_v37  ;;  %v3975_v58 = vcombine.low %v3947_v54, %v3954_v55  ;;  %v4951_v47 = vcombine.high %v3947_v54, %v3954_v55  ;;  %4323 = vmatprep.mubr.bf16.mxu1 %v6430_v32  ;;  %v5716_v53 = vld [vmem:[#allocation33 + $0x8] sm:$0xff]   ;;  %v5717_v37 = vld [vmem:[#allocation33 + $0x50] sm:$0xff]   ;;  %v5719_v55 = vld [vmem:[#allocation33 + $0x58] sm:$0xff]  }
 0xe16   : > { %v5718_v54 = vld [vmem:[#allocation33 + $0x10] sm:$0xff]  }
 0xe17   : > { %v3966_v63 = vrot.slane %v3959_v57, %v7218_v7  ;;  %v3974_v1 = vrot.slane %v4950_v49, %v7218_v7  ;;  %v3982_v2 = vrot.slane %v3975_v58, %v7218_v7  ;;  %v3990_v5 = vrot.slane %v4951_v47, %v7218_v7  ;;  %v5720_v57 = vld [vmem:[#allocation33 + $0x18] sm:$0xff]   ;;  %v5721_v49 = vld [vmem:[#allocation33 + $0x60] sm:$0xff]   ;;  %v5723_v47 = vld [vmem:[#allocation33 + $0x68] sm:$0xff]  }
 0xe18   : > { %v5722_v58 = vld [vmem:[#allocation33 + $0x20] sm:$0xff]  }
 0xe19   : > { %v3992_v6 = vcombine.high %v3966_v63, %v3974_v1  ;;  %v4008_v8 = vcombine.high %v3982_v2, %v3990_v5  ;;  %v3991_v62 = vcombine.low %v3966_v63, %v3974_v1  ;;  %v4007_v9 = vcombine.low %v3982_v2, %v3990_v5 }
 0xe1b   : > { %v4006_v10 = vrot.slane %v3992_v6, %v7221_v13  ;;  %v4022_v0 = vrot.slane %v4008_v8, %v7221_v13  ;;  %v3999_v60 = vrot.slane %v3991_v62, %v7221_v13  ;;  %v4015_v4 = vrot.slane %v4007_v9, %v7221_v13  ;;  %v4962_v62 = vld [vmem:[%s7805_s16] ss:$0 sm:$0xff]  ;;  %s4999_s16 = sshll.u32 %s7808_s25, 7  ;;  %s6280_s25 = sshll.u32 %s6431_s12, 4  ;;  %s6281_s25 = int_to_ptr.vmem [resolvable:$false] %s6280_s25 }
 0xe1c   : > { %s7613_s10 = scalar_lea.hbm %s7811_s26, %s4999_s16  ;;  %p6283_p4 = scmp.lt.s32.totalorder %s7615_s17, %s6281_s25 }
 0xe1d   : > { %v4025_v11 = vcombine.low %v4006_v10, %v4022_v0  ;;  %v4024_v12 = vcombine.high %v3999_v60, %v4015_v4  ;;  %v4026_v14 = vcombine.high %v4006_v10, %v4022_v0  ;;  %v4023_v15 = vcombine.low %v3999_v60, %v4015_v4  ;;  %v5725_v60 = vld [vmem:[#allocation33 + $0x70] sm:$0xff]  }
 0xe1e   : > { %v5726_v4 = vld [vmem:[#allocation33 + $0x30] sm:$0xff]  }
 0xe1f   : > { %4032 = vrot.lane.b32.xlu1 %v4025_v11, %s6426_s4  ;;  %4028 = vrot.lane.b32.xlu0 %v4024_v12, %s6425_s27  ;;  %s7804_s4 = sld [smem:[#allocation70_spill]]  ;;  %v5727_v11 = vld [vmem:[#allocation33 + $0x78] sm:$0xff]   ;;  %s7809_s27 = sld [smem:[#allocation74_spill]] }
 0xe20   : > { %v5728_v12 = vld [vmem:[#allocation33 + $0x38] sm:$0xff]  }
 0xe23   : > { %4036 = vrot.lane.b32.xlu1 %v4026_v14, %s6424_s19  ;;  %v4203_v14 = vsub.s32 0, %v7215_v3  ;;  %s6276_s19 = scalar_lea.vmem %s7615_s17, 128 }
 0xe24   : > { %p6277_p3 = scmp.ne.s32.totalorder %s7615_s17, %s6276_s19 }
 0xe25   : > { %v4961_v6 = vld [vmem:[%s7804_s4] ss:$0 sm:$0xff] }
 0xe26   : > { %p6278_p6 = pnand %p6277_p3, %p7812_p11 }
 0xe28   : > { %p6279_p13 = pneg %p6278_p6 }
 0xe91   : > { %v4033_v7 = vpop.permute.xlu1 %4032  ;;  %v4029_v16 = vpop.permute.xlu0 %4028 }
 0xe92   : > { %v4039_v17 = vsel %vm2476_vm2, %v4023_v15, %v4029_v16  ;;  %v4199_v15 = vld [vmem:[%s7806_s14] sm:$0x3] }
 0xe93   : > { %v4040_v19 = vsel %vm3056_vm6, %v4039_v17, %v4033_v7  ;;  %v4207_v7 = vsub.s32 1, %v7215_v3  ;;  %v4204_v16 = vrot.slane %v4199_v15, %v4203_v14 }
 0xe95   : > { %v4037_v18 = vpop.permute.xlu1 %4036  ;;  %v4208_v17 = vrot.slane %v4199_v15, %v4207_v7 }
 0xe96   : > { %v4041_v20 = vsel %vm3058_vm7, %v4040_v19, %v4037_v18 }
 0xe97   : > { %v4042_v13 = vpack.c.bf16 %v4041_v20, %v4041_v20 }
 0xe99   : > { %5381 = vmatmul.mubr.bf16.vlgmr.msra.gmra.mrb[32].mxu0 %v4042_v13 }
 0xe9a   : > { %5107 = vmatpush3.bf16.msra.mxu0 %v5714_v51 }
 0xe9b   : > { %5108 = vmatprep.subr.bf16.mxu0 %v5715_v52 }
 0xe9e   : > { %5109 = vmatpush3.bf16.msra.mxu0 %v5716_v53 }
 0xe9f   : > { %5110 = vmatprep.subr.bf16.mxu0 %v5717_v37 }
 0xea2   : > { %5111 = vmatpush3.bf16.msra.mxu0 %v5718_v54 }
 0xea3   : > { %5112 = vmatprep.subr.bf16.mxu0 %v5719_v55 }
 0xea6   : > { %5113 = vmatpush3.bf16.msra.mxu0 %v5720_v57 }
 0xea7   : > { %5114 = vmatprep.subr.bf16.mxu0 %v5721_v49 }
 0xeaa   : > { %5115 = vmatpush3.bf16.msra.mxu0 %v5722_v58 }
 0xeab   : > { %5116 = vmatprep.subr.bf16.mxu0 %v5723_v47 }
 0xeae   : > { %5117 = vmatpush3.bf16.msra.mxu0 %v5724_v59 }
 0xeaf   : > { %5118 = vmatprep.subr.bf16.mxu0 %v5725_v60 }
 0xeb2   : > { %5119 = vmatpush3.bf16.msra.mxu0 %v5726_v4 }
 0xeb3   : > { %5120 = vmatprep.subr.bf16.mxu0 %v5727_v11 }
 0xeb6   : > { %5121 = vmatpush3.bf16.msra.mxu0 %v5728_v12 }
 0xf6c   : > { %v4148_v22 = vpop.f32.mrb[32].mxu0 }
 0xf6d   : > { %v4149_v50 = vadd.f32 %v4952_v21, %v4148_v22  ;;  %v5382_v23 = vpop.f32.mrb[33].mxu0 }
 0xf6e   : > { %v4151_v24 = vpop.f32.mrb[34].mxu0 }
 0xf6f   : > { %v5383_v25 = vpop.f32.mrb[35].mxu0  ;;  %v4154_v26 = vadd.f32 %v4149_v50, %v7416_v56  ;;  %v5698_v56 = vld [vmem:[#allocation32 + $0x30] ss:$8 sps:$4 sm:$0xff]  }
 0xf70   : > { %4298 = vmatpush1.bf16.msra.mxu1 %v5698_v56 }
 0xf71   : > { %4157 = vadd.xlane.f32.xlu0 %v4154_v26  ;;  %4299 = vmatprep.subr.bf16.mxu1 %v5703_v39 }
 0xf74   : > { %4300 = vmatpush1.bf16.msra.mxu1 %v5701_v40 }
 0xf75   : > { %4301 = vmatprep.subr.bf16.mxu1 %v5706_v41  ;;  %v4996_v41 = vld [vmem:[%s7809_s27] ss:$0 sm:$0xff]  ;;  %s6282_s27 = scalar_lea.vmem %s6281_s25, 256 }
 0xf76   : > { %p6284_p9 = scmp.lt.s32.totalorder %s6282_s27, %s6276_s19 }
 0xf78   : > { %4302 = vmatpush1.bf16.msra.mxu1 %v5704_v42  ;;  %p6285_p0 = por %p6284_p9, %p6283_p4 }
 0xf79   : > { %4303 = vmatprep.subr.bf16.mxu1 %v5709_v44 }
 0xf7a   : > { %p6286_p7 = pnand %p6285_p0, %p6279_p13 }
 0xf7c   : > { %4304 = vmatpush1.bf16.msra.mxu1 %v5707_v43  ;;  %v4997_v43 = vld [vmem:[%s7810_s7] ss:$0 sm:$0xff] }
 0xf7d   : > { %4305 = vmatprep.subr.bf16.mxu1 %v5712_v45 }
 0xf80   : > { %4306 = vmatpush1.bf16.msra.mxu1 %v5710_v46 }
 0xffe   : > { %v4158_v33 = vpop.xlane.xlu0 %4157 }
 0xfff   : > { %v4159_v34 = vmul.f32 0.0078125, %v4158_v33 }
0x1001   : > { %v4160_v35 = vsub.f32 %v4154_v26, %v4159_v34 }
0x1003   : > { %v4161_v36 = vmul.f32 %v4160_v35, %v4160_v35 }
0x1005   : > { %4162 = vadd.xlane.f32.xlu1 %v4161_v36 }
0x1092   : > { %v4163_v63 = vpop.xlane.xlu1 %4162 }
0x1093   : > { %v4164_v1 = vmul.f32 0.0078125, %v4163_v63 }
0x1095   : > { %v4165_v2 = vadd.f32 1e-05, %v4164_v1 }
0x1097   : > { %5763 = vrsqrt.f32 %v4165_v2 }
0x10a1   : > { %v5764_v5 = vpop.eup %5763 }
0x10a2   : > { %v4167_v8 = vmul.f32 %v5764_v5, %v4160_v35 }
0x10a4   : > { %v4174_v9 = vmul.f32 %v4961_v6, %v4167_v8 }
0x10a6   : > { %v4181_v10 = vadd.f32 %v4962_v62, %v4174_v9 }
0x10a8   : > { %v4182_v0 = vpack.c.bf16 %v4181_v10, %v4181_v10 }
0x10aa   : > { %4324 = vmatmul.mubr.bf16.vlgmr.msra.gmra.mrb[60].mxu1 %v4182_v0 }
0x117d   : > { %v4325_v18 = vpop.f32.mrb[60].mxu1 }
0x117e   : > { %v4326_v19 = vadd.f32 %v4325_v18, %v4204_v16  ;;  %v4327_v20 = vpop.f32.mrb[61].mxu1 }
0x117f   : > { %v4328_v13 = vadd.f32 %v4327_v20, %v4208_v17  ;;  %v4329_v21 = vpop.f32.mrb[62].mxu1 }
0x1180   : > { %v4332_v22 = vmax.f32 %v4326_v19, 0.0  ;;  %v4330_v50 = vpop.f32.mrb[63].mxu1 }
0x1181   : > { %v4333_v23 = vmax.f32 %v4328_v13, 0.0 }
0x1182   : > { %v4334_v25 = vpack.c.bf16 %v4332_v22, %v4332_v22 }
0x1183   : > { %v4335_v24 = vpack.c.bf16 %v4333_v23, %v4333_v23 }
0x1185   : > { %4503 = vmatprep.mubr.bf16.mxu0 %v4335_v24 }
0x1186   : > { %4504 = vmatmul.mubr.bf16.vlgmr.msra.gmra.mrb[36].mxu0 %v4334_v25 }
0x1259   : > { %v5122_v26 = vpop.f32.mrb[36].mxu0 }
0x125a   : > { %v5123_v3 = vpop.f32.mrb[37].mxu0 }
0x125b   : > { %v5124_v28 = vadd.f32 %v5123_v3, %v5122_v26  ;;  %v5125_v29 = vpop.f32.mrb[38].mxu0 }
0x125c   : > { %v5126_v30 = vpop.f32.mrb[39].mxu0 }
0x125d   : > { %v4506_v31 = vadd.f32 %v5124_v28, %v4979_v27 }
0x125f   : > { %v4511_v61 = vadd.f32 %v4506_v31, %v4181_v10 }
0x1261   : > { %4514 = vadd.xlane.f32.xlu0 %v4511_v61 }
0x12ee   : > { %v4515_v33 = vpop.xlane.xlu0 %4514 }
0x12ef   : > { %v4516_v34 = vmul.f32 0.0078125, %v4515_v33 }
0x12f1   : > { %v4517_v35 = vsub.f32 %v4511_v61, %v4516_v34 }
0x12f3   : > { %v4518_v36 = vmul.f32 %v4517_v35, %v4517_v35 }
0x12f5   : > { %4519 = vadd.xlane.f32.xlu0 %v4518_v36 }
0x1382   : > { %v4520_v38 = vpop.xlane.xlu0 %4519 }
0x1383   : > { %v4521_v56 = vmul.f32 0.0078125, %v4520_v38 }
0x1385   : > { %v4522_v39 = vadd.f32 1e-05, %v4521_v56 }
0x1387   : > { %5765 = vrsqrt.f32 %v4522_v39 }
0x1391   : > { %v5766_v40 = vpop.eup %5765 }
0x1392   : > { %v4524_v42 = vmul.f32 %v5766_v40, %v4517_v35 }
0x1394   : > { %v4531_v44 = vmul.f32 %v4996_v41, %v4524_v42 }
0x1396   : > { %v4538_v45 = vadd.f32 %v4997_v43, %v4531_v44 }
0x1398   : > { %4539 = vst [vmem:[%s1129_s30] sm:$0xff] %v4538_v45 }
0x1399   : > { %6289 = shalt.err (!%p6286_p7)
}
0x139a   : > { %s6290_s13 = scalar_lea.hbm %s7613_s10, 128  ;;  %s6294_s7 = scalar_lea.hbm %s7811_s26, 256 }
0x139b   : > { %p6291_p12 = scmp.ne.s32.totalorder %s7613_s10, %s6290_s13  ;;  %p6295_p1 = scmp.lt.u32.totalorder %s7613_s10, %s7811_s26 }
0x139c   : > { %p6296_p5 = scmp.lt.u32.totalorder %s6294_s7, %s6290_s13  ;;  %p6298_p3 = scmp.lt.u32.totalorder %s6290_s13, %s7613_s10 }
0x139d   : > { %p6292_p2 = pnand %p6291_p12, %p7812_p11 }
0x139e   : > { %p6297_p8 = por %p6296_p5, %p6295_p1 }
0x139f   : > { %p6293_p10 = pneg %p6292_p2 }
0x13a0   : > { %p6299_p6 = por %p6298_p3, %p6297_p8 }
0x13a2   : > { %p6300_p13 = pnand %p6299_p6, %p6293_p10 }
0x13a4   : > { %6303 = shalt.err (!%p6300_p13)
}
0x13a5   : > { %5452 = dma.vmem_to_hbm [thread:$0]  (%p7812_p11), %s7615_s17, 128, %s7613_s10, %s4541_s11  }
0x13a6 PF: > { %s4567_s14 = sand.u32 1, %s6378_s8   ;;  %p7813_p4 = scmp.ne.s32.totalorder %s7774_s20, 0 }
0x13a7   : > { %p7814_p9 = scmp.ge.s32.totalorder %s6398_s6, 2  ;;  %s4568_s23 = scalar_lea.sflag [#allocation8], %s4567_s14 }
0x13a9   : > { %p5511_p0 = pnand %p7814_p9, %p7813_p4 }
0x13ab   : > { %6373 = dma.done.wait (!%p5511_p0), %s4568_s23, 128  }
0x13ac   : > { %6375 = vsyncadd (!%p5511_p0), %s4568_s23, 4294967168  ;;  %s55_s6 = sadd.s32 1, %s6398_s6   ;;  %s7815_s8 = smov %s6382_s5 }
0x13ad   : > { %p52_p7 = scmp.ge.s32.totalorder %s55_s6, 4   ;;  %s7816_s5 = smov %s6386_s9 }
0x13ae   : > { %s7817_s9 = smov %s6989_s15  ;;  %s7818_s30 = smov %s6394_s3 }
0x13af   : > { %s7819_s3 = smov %s7821_s2  ;;  %54 = sbr.rel (!%p52_p7) target bundleno = 44 (0x2c), region = 259 }
0x13b6   :  { %4573 = vsyncpa [#allocation7], 1 }
0x13b7   :  { %4575 = vsyncpa [#allocation7 + $0x1], 1 }
0x13b8   :  { %4576 = vsyncpa [#allocation10], 1 }
0x13b9   :  { %4578 = vsyncpa [#allocation10 + $0x1], 1 }
0x13ba   :  { %4579 = vsyncpa [#allocation13], 1 }
0x13bb   :  { %4580 = vsyncpa [#allocation16], 1 }
0x13bc   :  { %4581 = vsyncpa [#allocation19], 1 }
0x13bd   :  { %4582 = vsyncpa [#allocation22], 1 }
0x13be   :  { %4583 = vsyncpa [#allocation25], 1 }
0x13bf   :  { %4584 = vsyncpa [#allocation28], 1 }
0x13c0   :  { %4585 = vsyncpa [#allocation31], 1 }
0x13c1   :  { %4586 = vsyncpa [#allocation34], 1 }
0x13c2   :  { %4587 = vsyncpa [#allocation8], 1 }
0x13c3   :  { %4589 = vsyncpa [#allocation8 + $0x1], 1 }

</bundles_post_ra>
